<compile_context>
chip_gen: v6e
topology: v6e:2x2x1
jax: 0.10.0
libtpu: 0.0.40
codegen_flags: <defaults>
</compile_context>

<pallas_src>
import jax
import jax.numpy as jnp
import numpy as np
from jax.experimental import pallas as pl
from jax.experimental.pallas import tpu as pltpu

# ---- config (feature widths are fixed by the hardcoded slices in forward()) ----
CONFIG = dict(
    num_rate=6,
    num_genre=25,          # x[:, 1:26]
    num_director=2186,     # x[:, 26:2212]
    num_actor=8030,        # x[:, 2212:10242]
    num_gender=2,          # x[:, 10242]
    num_age=7,             # x[:, 10243]
    num_occupation=21,     # x[:, 10244]
    num_zipcode=101,       # x[:, 10245]
    embedding_dim=32,
    first_fc_hidden_dim=64,
    second_fc_hidden_dim=64,
)
TOTAL_COLS = 1 + CONFIG["num_genre"] + CONFIG["num_director"] + CONFIG["num_actor"] + 4  # 10246
H2_PAD = 128   # lane-dense pad of the fc2 output written by the kernel


def _round_up(n, m):
    return ((n + m - 1) // m) * m


# ------------------------------- Pallas kernel ----------------------------------
def _upe_kernel(small_ref, genre_ref, dir_ref, act_ref,
                invg_ref, invd_ref, inva_ref,
                w_small_ref, w_genre_ref, w_dir_ref, w_act_ref,
                fc1_b_ref, fc2_w_ref, fc2_b_ref,
                h2_ref):
    """One batch tile of the fused forward (fc1 with folded embeddings, fc2)."""
    f32 = jnp.float32

    def mm(x_ref, w_ref):
        # bf16 activations are promoted to f32; accumulate in f32 on the MXU.
        return jnp.dot(x_ref[...], w_ref[...], preferred_element_type=f32)

    # fc1 = sum of partial matmuls against the folded (table @ fc1-slice) weights
    h1 = fc1_b_ref[...] + mm(small_ref, w_small_ref)            # (TB, 64)
    h1 = h1 + mm(genre_ref, w_genre_ref) * invg_ref[...]        # normalized multi-hot
    h1 = h1 + mm(dir_ref, w_dir_ref) * invd_ref[...]
    h1 = h1 + mm(act_ref, w_act_ref) * inva_ref[...]
    h1 = jnp.maximum(h1, 0.0)                                   # ReLU

    h2 = jnp.dot(h1, fc2_w_ref[...], preferred_element_type=f32) + fc2_b_ref[...]
    h2_ref[...] = jnp.maximum(h2, 0.0)                          # (TB, 128) lane-dense store


# --------------------------------- params ---------------------------------------
def init_params(key, cfg):
    D = cfg["embedding_dim"]
    H1 = cfg["first_fc_hidden_dim"]
    H2 = cfg["second_fc_hidden_dim"]
    ks = jax.random.split(key, 14)

    def w(k, shape, scale=0.05):
        return (scale * jax.random.normal(k, shape)).astype(jnp.float32)

    return dict(
        w_rate=w(ks[0], (cfg["num_rate"], D)),
        w_genre=w(ks[1], (cfg["num_genre"], D)),
        w_dir=w(ks[2], (cfg["num_director"], D)),
        w_act=w(ks[3], (cfg["num_actor"], D)),
        w_gender=w(ks[4], (cfg["num_gender"], D)),
        w_age=w(ks[5], (cfg["num_age"], D)),
        w_occ=w(ks[6], (cfg["num_occupation"], D)),
        w_area=w(ks[7], (cfg["num_zipcode"], D)),
        fc1_w=w(ks[8], (8 * D, H1)),
        fc1_b=w(ks[9], (1, H1)),
        fc2_w=w(ks[10], (H1, H2)),
        fc2_b=w(ks[11], (1, H2)),
        out_w=w(ks[12], (H2, 1)),
        out_b=w(ks[13], (1, 1)),
    )


def fold_params(params, cfg):
    """Fold each embedding table into its fc1 row-slice (mathematically identical)."""
    D = cfg["embedding_dim"]
    H1 = cfg["first_fc_hidden_dim"]
    H2 = cfg["second_fc_hidden_dim"]
    fc1_w = params["fc1_w"]

    def sl(i):  # fc1 rows that multiply embedding #i in the concat order
        return fc1_w[i * D:(i + 1) * D, :]

    # concat order: rate(0) genre(1) director(2) actor(3) gender(4) age(5) occ(6) area(7)
    w_small = jnp.concatenate(
        [params["w_rate"] @ sl(0),
         params["w_gender"] @ sl(4),
         params["w_age"] @ sl(5),
         params["w_occ"] @ sl(6),
         params["w_area"] @ sl(7)], axis=0)                      # (137, 64)
    w_genre_f = params["w_genre"] @ sl(1)                        # (25, 64)
    w_dir_f = params["w_dir"] @ sl(2)                            # (2186, 64)
    w_act_f = params["w_act"] @ sl(3)                            # (8030, 64)

    fc2_w_pad = jnp.zeros((H1, H2_PAD), jnp.float32).at[:, :H2].set(params["fc2_w"])
    fc2_b_pad = jnp.zeros((1, H2_PAD), jnp.float32).at[:, :H2].set(params["fc2_b"])
    return dict(w_small=w_small, w_genre=w_genre_f, w_dir=w_dir_f, w_act=w_act_f,
                fc1_b=params["fc1_b"], fc2_w=fc2_w_pad, fc2_b=fc2_b_pad)


# ------------------------------ input splitting ----------------------------------
def _split_x(x, cfg):
    ng, nd, na = cfg["num_genre"], cfg["num_director"], cfg["num_actor"]
    o1 = 1
    o2 = o1 + ng      # 26
    o3 = o2 + nd      # 2212
    o4 = o3 + na      # 10242
    rate_oh = jax.nn.one_hot(x[:, 0], cfg["num_rate"], dtype=jnp.float32)
    genre = x[:, o1:o2].astype(jnp.float32)
    director = x[:, o2:o3].astype(jnp.float32)
    actor = x[:, o3:o4].astype(jnp.float32)
    gender_oh = jax.nn.one_hot(x[:, o4 + 0], cfg["num_gender"], dtype=jnp.float32)
    age_oh = jax.nn.one_hot(x[:, o4 + 1], cfg["num_age"], dtype=jnp.float32)
    occ_oh = jax.nn.one_hot(x[:, o4 + 2], cfg["num_occupation"], dtype=jnp.float32)
    area_oh = jax.nn.one_hot(x[:, o4 + 3], cfg["num_zipcode"], dtype=jnp.float32)
    return rate_oh, genre, director, actor, gender_oh, age_oh, occ_oh, area_oh


# ---------------------------------- forward --------------------------------------
def user_preference_estimator_forward(x, params, cfg=CONFIG, block_b=256):
    B = x.shape[0]
    (rate_oh, genre, director, actor,
     gender_oh, age_oh, occ_oh, area_oh) = _split_x(x, cfg)

    # Merge the five tiny one-hot features into one K=137 operand (1 matmul).
    small = jnp.concatenate([rate_oh, gender_oh, age_oh, occ_oh, area_oh], axis=1)

    # Exact per-row normalization reciprocals, computed once in XLA.
    # (max(count, 1) only differs from PyTorch on degenerate all-zero rows, which
    #  would produce inf/NaN in the original.)
    inv_g = 1.0 / jnp.maximum(genre.sum(axis=1, keepdims=True), 1.0)
    inv_d = 1.0 / jnp.maximum(director.sum(axis=1, keepdims=True), 1.0)
    inv_a = 1.0 / jnp.maximum(actor.sum(axis=1, keepdims=True), 1.0)

    fp = fold_params(params, cfg)

    # Batch tiling: pad B up to a multiple of the tile (>= 16 rows).
    TB = min(block_b, _round_up(B, 16))
    Bp = _round_up(B, TB)
    pad = Bp - B

    def prep(a, dtype):
        if pad:
            a = jnp.pad(a, ((0, pad), (0, 0)))
        return a.astype(dtype)

    bf16 = jnp.bfloat16        # 0/1 multi-hots are exact in bf16 -> halves HBM traffic
    small_p = prep(small, bf16)
    genre_p = prep(genre, bf16)
    dir_p = prep(director, bf16)
    act_p = prep(actor, bf16)
    invg_p = prep(inv_g, jnp.float32)
    invd_p = prep(inv_d, jnp.float32)
    inva_p = prep(inv_a, jnp.float32)

    K_small = small.shape[1]
    ng, nd, na = cfg["num_genre"], cfg["num_director"], cfg["num_actor"]
    H1 = cfg["first_fc_hidden_dim"]
    H2 = cfg["second_fc_hidden_dim"]

    def act_spec(k):
        return pl.BlockSpec((TB, k), lambda i: (i, 0))

    def wgt_spec(r, c):
        return pl.BlockSpec((r, c), lambda i: (0, 0))   # resident weight block

    k_total = K_small + ng + nd + na
    flops = 2 * Bp * k_total * H1 + 2 * Bp * H1 * H2_PAD
    bytes_accessed = (Bp * k_total * 2 + 3 * Bp * 4 + Bp * H2_PAD * 4
                      + 4 * (k_total * H1 + H1 + H1 * H2_PAD + H2_PAD))

    h2 = pl.pallas_call(
        _upe_kernel,
        out_shape=jax.ShapeDtypeStruct((Bp, H2_PAD), jnp.float32),
        grid_spec=pltpu.PrefetchScalarGridSpec(
            num_scalar_prefetch=0,
            grid=(Bp // TB,),
            in_specs=[
                act_spec(K_small), act_spec(ng), act_spec(nd), act_spec(na),
                act_spec(1), act_spec(1), act_spec(1),
                wgt_spec(K_small, H1), wgt_spec(ng, H1),
                wgt_spec(nd, H1), wgt_spec(na, H1),
                wgt_spec(1, H1), wgt_spec(H1, H2_PAD), wgt_spec(1, H2_PAD),
            ],
            out_specs=pl.BlockSpec((TB, H2_PAD), lambda i: (i, 0)),
        ),
        compiler_params=pltpu.CompilerParams(
            dimension_semantics=("parallel",),          # megacore sharding on v7x
            vmem_limit_bytes=48 * 1024 * 1024,          # fits 256-row tiles on all gens
        ),
        cost_estimate=pl.CostEstimate(
            flops=int(flops), transcendentals=0, bytes_accessed=int(bytes_accessed)),
    )(small_p, genre_p, dir_p, act_p, invg_p, invd_p, inva_p,
      fp["w_small"], fp["w_genre"], fp["w_dir"], fp["w_act"],
      fp["fc1_b"], fp["fc2_w"], fp["fc2_b"])

    # Finish the tiny (64,1) projection outside the kernel (avoids a width-1 store).
    h2 = h2[:B, :H2]
    return h2 @ params["out_w"] + params["out_b"]


# ----------------------------- pure-JAX reference --------------------------------
def reference_forward(x, params, cfg=CONFIG):
    (rate_oh, genre, director, actor,
     gender_oh, age_oh, occ_oh, area_oh) = _split_x(x, cfg)
    rate_e = rate_oh @ params["w_rate"]
    genre_e = (genre @ params["w_genre"]) / genre.sum(1, keepdims=True)
    dir_e = (director @ params["w_dir"]) / director.sum(1, keepdims=True)
    act_e = (actor @ params["w_act"]) / actor.sum(1, keepdims=True)
    gender_e = gender_oh @ params["w_gender"]
    age_e = age_oh @ params["w_age"]
    occ_e = occ_oh @ params["w_occ"]
    area_e = area_oh @ params["w_area"]
    emb = jnp.concatenate(
        [rate_e, genre_e, dir_e, act_e, gender_e, age_e, occ_e, area_e], axis=1)
    h1 = jax.nn.relu(emb @ params["fc1_w"] + params["fc1_b"])
    h2 = jax.nn.relu(h1 @ params["fc2_w"] + params["fc2_b"])
    return h2 @ params["out_w"] + params["out_b"]


# ------------------------------------ main ----------------------------------------
if __name__ == "__main__":
    cfg = CONFIG
    B = 2
    key = jax.random.PRNGKey(0)
    k_param, k_rate, k_genre, k_dir, k_act, k_user = jax.random.split(key, 6)

    params = init_params(k_param, cfg)

    # Build synthetic integer input x of shape (B, 10246):
    rate = jax.random.randint(k_rate, (B, 1), 0, cfg["num_rate"], dtype=jnp.int32)
    genre = (jax.random.uniform(k_genre, (B, cfg["num_genre"])) < 0.2).astype(jnp.int32)
    genre = genre.at[:, 0].set(1)          # ensure nonzero row sums
    director = (jax.random.uniform(k_dir, (B, cfg["num_director"])) < 0.01).astype(jnp.int32)
    director = director.at[:, 0].set(1)
    actor = (jax.random.uniform(k_act, (B, cfg["num_actor"])) < 0.01).astype(jnp.int32)
    actor = actor.at[:, 0].set(1)
    ku = jax.random.split(k_user, 4)
    gender = jax.random.randint(ku[0], (B, 1), 0, cfg["num_gender"], dtype=jnp.int32)
    age = jax.random.randint(ku[1], (B, 1), 0, cfg["num_age"], dtype=jnp.int32)
    occ = jax.random.randint(ku[2], (B, 1), 0, cfg["num_occupation"], dtype=jnp.int32)
    area = jax.random.randint(ku[3], (B, 1), 0, cfg["num_zipcode"], dtype=jnp.int32)
    x = jnp.concatenate([rate, genre, director, actor, gender, age, occ, area], axis=1)
    assert x.shape == (B, TOTAL_COLS)

    out = jax.block_until_ready(user_preference_estimator_forward(x, params, cfg))
    ref = jax.block_until_ready(reference_forward(x, params, cfg))

    np.testing.assert_allclose(np.asarray(out), np.asarray(ref), rtol=5e-4, atol=1e-5)
    assert out.shape == (B, 1)
    print("KERNEL_OK")
</pallas_src>

<mosaic_0001>
module attributes {stable_mosaic.version = 11 : i64} {
  func.func @_upe_kernel(%arg0: i32, %arg1: memref<16x137xbf16, #tpu.memory_space<vmem>>, %arg2: memref<16x25xbf16, #tpu.memory_space<vmem>>, %arg3: memref<16x2186xbf16, #tpu.memory_space<vmem>>, %arg4: memref<16x8030xbf16, #tpu.memory_space<vmem>>, %arg5: memref<16x1xf32, #tpu.memory_space<vmem>>, %arg6: memref<16x1xf32, #tpu.memory_space<vmem>>, %arg7: memref<16x1xf32, #tpu.memory_space<vmem>>, %arg8: memref<137x64xf32, #tpu.memory_space<vmem>>, %arg9: memref<25x64xf32, #tpu.memory_space<vmem>>, %arg10: memref<2186x64xf32, #tpu.memory_space<vmem>>, %arg11: memref<8030x64xf32, #tpu.memory_space<vmem>>, %arg12: memref<1x64xf32, #tpu.memory_space<vmem>>, %arg13: memref<64x128xf32, #tpu.memory_space<vmem>>, %arg14: memref<1x128xf32, #tpu.memory_space<vmem>>, %arg15: memref<16x128xf32, #tpu.memory_space<vmem>>) attributes {dimension_semantics = [#tpu.dimension_semantics<parallel>], iteration_bounds = array<i64: 1>, scalar_prefetch = 0 : i64, scratch_operands = 0 : i64, tpu.core_type = #tpu.core_type<tc>, window_params = [{transform_indices = @transform_0, window_bounds = array<i64: 16, 137>}, {transform_indices = @transform_1, window_bounds = array<i64: 16, 25>}, {transform_indices = @transform_2, window_bounds = array<i64: 16, 2186>}, {transform_indices = @transform_3, window_bounds = array<i64: 16, 8030>}, {transform_indices = @transform_4, window_bounds = array<i64: 16, 1>}, {transform_indices = @transform_5, window_bounds = array<i64: 16, 1>}, {transform_indices = @transform_6, window_bounds = array<i64: 16, 1>}, {pipeline_mode = #tpu.pipeline_mode<synchronous>, transform_indices = @transform_7, window_bounds = array<i64: 137, 64>}, {pipeline_mode = #tpu.pipeline_mode<synchronous>, transform_indices = @transform_8, window_bounds = array<i64: 25, 64>}, {pipeline_mode = #tpu.pipeline_mode<synchronous>, transform_indices = @transform_9, window_bounds = array<i64: 2186, 64>}, {pipeline_mode = #tpu.pipeline_mode<synchronous>, transform_indices = @transform_10, window_bounds = array<i64: 8030, 64>}, {pipeline_mode = #tpu.pipeline_mode<synchronous>, transform_indices = @transform_11, window_bounds = array<i64: 1, 64>}, {pipeline_mode = #tpu.pipeline_mode<synchronous>, transform_indices = @transform_12, window_bounds = array<i64: 64, 128>}, {pipeline_mode = #tpu.pipeline_mode<synchronous>, transform_indices = @transform_13, window_bounds = array<i64: 1, 128>}, {transform_indices = @transform_14, window_bounds = array<i64: 16, 128>}]} {
    %c0 = arith.constant 0 : index
    %c0_0 = arith.constant 0 : index
    %0 = vector.load %arg12[%c0, %c0_0] : memref<1x64xf32, #tpu.memory_space<vmem>>, vector<1x64xf32>
    %c0_1 = arith.constant 0 : index
    %c0_2 = arith.constant 0 : index
    %1 = vector.load %arg1[%c0_1, %c0_2] : memref<16x137xbf16, #tpu.memory_space<vmem>>, vector<16x137xbf16>
    %c0_3 = arith.constant 0 : index
    %c0_4 = arith.constant 0 : index
    %2 = vector.load %arg8[%c0_3, %c0_4] : memref<137x64xf32, #tpu.memory_space<vmem>>, vector<137x64xf32>
    %cst = arith.constant dense<0.000000e+00> : vector<16x64xf32>
    %3 = tpu.matmul %1, %2, %cst {dimension_numbers = #tpu.dot_dimension_numbers<[1], [0], [0], [1], [0, 0, 1, 1], [], []>} : vector<16x137xbf16>, vector<137x64xf32>, vector<16x64xf32> -> vector<16x64xf32>
    %4 = vector.broadcast %0 : vector<1x64xf32> to vector<16x64xf32>
    %5 = arith.addf %4, %3 : vector<16x64xf32>
    %c0_5 = arith.constant 0 : index
    %c0_6 = arith.constant 0 : index
    %6 = vector.load %arg2[%c0_5, %c0_6] : memref<16x25xbf16, #tpu.memory_space<vmem>>, vector<16x25xbf16>
    %c0_7 = arith.constant 0 : index
    %c0_8 = arith.constant 0 : index
    %7 = vector.load %arg9[%c0_7, %c0_8] : memref<25x64xf32, #tpu.memory_space<vmem>>, vector<25x64xf32>
    %cst_9 = arith.constant dense<0.000000e+00> : vector<16x64xf32>
    %8 = tpu.matmul %6, %7, %cst_9 {dimension_numbers = #tpu.dot_dimension_numbers<[1], [0], [0], [1], [0, 0, 1, 1], [], []>} : vector<16x25xbf16>, vector<25x64xf32>, vector<16x64xf32> -> vector<16x64xf32>
    %c0_10 = arith.constant 0 : index
    %c0_11 = arith.constant 0 : index
    %9 = vector.load %arg5[%c0_10, %c0_11] : memref<16x1xf32, #tpu.memory_space<vmem>>, vector<16x1xf32>
    %10 = vector.broadcast %9 : vector<16x1xf32> to vector<16x64xf32>
    %11 = arith.mulf %8, %10 : vector<16x64xf32>
    %12 = arith.addf %5, %11 : vector<16x64xf32>
    %c0_12 = arith.constant 0 : index
    %c0_13 = arith.constant 0 : index
    %13 = vector.load %arg3[%c0_12, %c0_13] : memref<16x2186xbf16, #tpu.memory_space<vmem>>, vector<16x2186xbf16>
    %c0_14 = arith.constant 0 : index
    %c0_15 = arith.constant 0 : index
    %14 = vector.load %arg10[%c0_14, %c0_15] : memref<2186x64xf32, #tpu.memory_space<vmem>>, vector<2186x64xf32>
    %cst_16 = arith.constant dense<0.000000e+00> : vector<16x64xf32>
    %15 = tpu.matmul %13, %14, %cst_16 {dimension_numbers = #tpu.dot_dimension_numbers<[1], [0], [0], [1], [0, 0, 1, 1], [], []>} : vector<16x2186xbf16>, vector<2186x64xf32>, vector<16x64xf32> -> vector<16x64xf32>
    %c0_17 = arith.constant 0 : index
    %c0_18 = arith.constant 0 : index
    %16 = vector.load %arg6[%c0_17, %c0_18] : memref<16x1xf32, #tpu.memory_space<vmem>>, vector<16x1xf32>
    %17 = vector.broadcast %16 : vector<16x1xf32> to vector<16x64xf32>
    %18 = arith.mulf %15, %17 : vector<16x64xf32>
    %19 = arith.addf %12, %18 : vector<16x64xf32>
    %c0_19 = arith.constant 0 : index
    %c0_20 = arith.constant 0 : index
    %20 = vector.load %arg4[%c0_19, %c0_20] : memref<16x8030xbf16, #tpu.memory_space<vmem>>, vector<16x8030xbf16>
    %c0_21 = arith.constant 0 : index
    %c0_22 = arith.constant 0 : index
    %21 = vector.load %arg11[%c0_21, %c0_22] : memref<8030x64xf32, #tpu.memory_space<vmem>>, vector<8030x64xf32>
    %cst_23 = arith.constant dense<0.000000e+00> : vector<16x64xf32>
    %22 = tpu.matmul %20, %21, %cst_23 {dimension_numbers = #tpu.dot_dimension_numbers<[1], [0], [0], [1], [0, 0, 1, 1], [], []>} : vector<16x8030xbf16>, vector<8030x64xf32>, vector<16x64xf32> -> vector<16x64xf32>
    %c0_24 = arith.constant 0 : index
    %c0_25 = arith.constant 0 : index
    %23 = vector.load %arg7[%c0_24, %c0_25] : memref<16x1xf32, #tpu.memory_space<vmem>>, vector<16x1xf32>
    %24 = vector.broadcast %23 : vector<16x1xf32> to vector<16x64xf32>
    %25 = arith.mulf %22, %24 : vector<16x64xf32>
    %26 = arith.addf %19, %25 : vector<16x64xf32>
    %cst_26 = arith.constant 0.000000e+00 : f32
    %27 = vector.broadcast %cst_26 : f32 to vector<16x64xf32>
    %28 = arith.maximumf %26, %27 : vector<16x64xf32>
    %c0_27 = arith.constant 0 : index
    %c0_28 = arith.constant 0 : index
    %29 = vector.load %arg13[%c0_27, %c0_28] : memref<64x128xf32, #tpu.memory_space<vmem>>, vector<64x128xf32>
    %cst_29 = arith.constant dense<0.000000e+00> : vector<16x128xf32>
    %30 = tpu.matmul %28, %29, %cst_29 {dimension_numbers = #tpu.dot_dimension_numbers<[1], [0], [0], [1], [0, 0, 1, 1], [], []>} : vector<16x64xf32>, vector<64x128xf32>, vector<16x128xf32> -> vector<16x128xf32>
    %c0_30 = arith.constant 0 : index
    %c0_31 = arith.constant 0 : index
    %31 = vector.load %arg14[%c0_30, %c0_31] : memref<1x128xf32, #tpu.memory_space<vmem>>, vector<1x128xf32>
    %32 = vector.broadcast %31 : vector<1x128xf32> to vector<16x128xf32>
    %33 = arith.addf %30, %32 : vector<16x128xf32>
    %cst_32 = arith.constant 0.000000e+00 : f32
    %34 = vector.broadcast %cst_32 : f32 to vector<16x128xf32>
    %35 = arith.maximumf %33, %34 : vector<16x128xf32>
    %c0_33 = arith.constant 0 : index
    %c0_34 = arith.constant 0 : index
    %36 = vector.load %arg15[%c0_33, %c0_34] : memref<16x128xf32, #tpu.memory_space<vmem>>, vector<16x128xf32>
    tpu.vector_store %arg15[%c0_33, %c0_34], %35 {strides = array<i32>} : memref<16x128xf32, #tpu.memory_space<vmem>>, vector<16x128xf32>,
    return
  }
  func.func @transform_0(%arg0: i32) -> (i32, i32) {
    %c0_i32 = arith.constant 0 : i32
    %c0_i32_0 = arith.constant 0 : i32
    return %arg0, %c0_i32 : i32, i32
  }
  func.func @transform_1(%arg0: i32) -> (i32, i32) {
    %c0_i32 = arith.constant 0 : i32
    %c0_i32_0 = arith.constant 0 : i32
    return %arg0, %c0_i32 : i32, i32
  }
  func.func @transform_2(%arg0: i32) -> (i32, i32) {
    %c0_i32 = arith.constant 0 : i32
    %c0_i32_0 = arith.constant 0 : i32
    return %arg0, %c0_i32 : i32, i32
  }
  func.func @transform_3(%arg0: i32) -> (i32, i32) {
    %c0_i32 = arith.constant 0 : i32
    %c0_i32_0 = arith.constant 0 : i32
    return %arg0, %c0_i32 : i32, i32
  }
  func.func @transform_4(%arg0: i32) -> (i32, i32) {
    %c0_i32 = arith.constant 0 : i32
    %c0_i32_0 = arith.constant 0 : i32
    return %arg0, %c0_i32 : i32, i32
  }
  func.func @transform_5(%arg0: i32) -> (i32, i32) {
    %c0_i32 = arith.constant 0 : i32
    %c0_i32_0 = arith.constant 0 : i32
    return %arg0, %c0_i32 : i32, i32
  }
  func.func @transform_6(%arg0: i32) -> (i32, i32) {
    %c0_i32 = arith.constant 0 : i32
    %c0_i32_0 = arith.constant 0 : i32
    return %arg0, %c0_i32 : i32, i32
  }
  func.func @transform_7(%arg0: i32) -> (i32, i32) {
    %c0_i32 = arith.constant 0 : i32
    %c0_i32_0 = arith.constant 0 : i32
    %c0_i32_1 = arith.constant 0 : i32
    return %c0_i32, %c0_i32_0 : i32, i32
  }
  func.func @transform_8(%arg0: i32) -> (i32, i32) {
    %c0_i32 = arith.constant 0 : i32
    %c0_i32_0 = arith.constant 0 : i32
    %c0_i32_1 = arith.constant 0 : i32
    return %c0_i32, %c0_i32_0 : i32, i32
  }
  func.func @transform_9(%arg0: i32) -> (i32, i32) {
    %c0_i32 = arith.constant 0 : i32
    %c0_i32_0 = arith.constant 0 : i32
    %c0_i32_1 = arith.constant 0 : i32
    return %c0_i32, %c0_i32_0 : i32, i32
  }
  func.func @transform_10(%arg0: i32) -> (i32, i32) {
    %c0_i32 = arith.constant 0 : i32
    %c0_i32_0 = arith.constant 0 : i32
    %c0_i32_1 = arith.constant 0 : i32
    return %c0_i32, %c0_i32_0 : i32, i32
  }
  func.func @transform_11(%arg0: i32) -> (i32, i32) {
    %c0_i32 = arith.constant 0 : i32
    %c0_i32_0 = arith.constant 0 : i32
    %c0_i32_1 = arith.constant 0 : i32
    return %c0_i32, %c0_i32_0 : i32, i32
  }
  func.func @transform_12(%arg0: i32) -> (i32, i32) {
    %c0_i32 = arith.constant 0 : i32
    %c0_i32_0 = arith.constant 0 : i32
    %c0_i32_1 = arith.constant 0 : i32
    return %c0_i32, %c0_i32_0 : i32, i32
  }
  func.func @transform_13(%arg0: i32) -> (i32, i32) {
    %c0_i32 = arith.constant 0 : i32
    %c0_i32_0 = arith.constant 0 : i32
    %c0_i32_1 = arith.constant 0 : i32
    return %c0_i32, %c0_i32_0 : i32, i32
  }
  func.func @transform_14(%arg0: i32) -> (i32, i32) {
    %c0_i32 = arith.constant 0 : i32
    %c0_i32_0 = arith.constant 0 : i32
    return %arg0, %c0_i32 : i32, i32
  }
}

</mosaic_0001>

<bundles_post_ra>
// kernel: tpu_custom_call.1
= control target key start
LH: loop header
LB: loop body
LE: loop exit
PB: predicated region body
PF: predicated region fallthrough
CT: control target
= control target key end

     0   :  { %vm83_vm0 = vcmask 1040384   ;;  %v7019_v2 = vmov 0.0   ;;  %vm179_vm1 = vcmask 203776   ;;  %vm7020_vm2 = vmmov 0   ;;  %s11696_s0 = inlined_call_operand.vmem [shape: bf16[16,137], index: 0, kind: input, shape index: {}]   ;;  %s11697_s1 = inlined_call_operand.vmem [shape: bf16[16,25], index: 1, kind: input, shape index: {}]   ;;  %s11698_s2 = inlined_call_operand.vmem [shape: bf16[16,2186], index: 2, kind: input, shape index: {}]   ;;  %s11699_s3 = inlined_call_operand.vmem [shape: bf16[16,8030], index: 3, kind: input, shape index: {}]   ;;  %s11700_s4 = inlined_call_operand.vmem [shape: f32[16,1], index: 4, kind: input, shape index: {}]   ;;  %s11701_s5 = inlined_call_operand.vmem [shape: f32[16,1], index: 5, kind: input, shape index: {}]   ;;  %s11702_s6 = inlined_call_operand.vmem [shape: f32[16,1], index: 6, kind: input, shape index: {}]   ;;  %s11703_s7 = inlined_call_operand.vmem [shape: f32[137,64], index: 7, kind: input, shape index: {}]   ;;  %s11704_s8 = inlined_call_operand.vmem [shape: f32[25,64], index: 8, kind: input, shape index: {}]   ;;  %s11705_s9 = inlined_call_operand.vmem [shape: f32[2186,64], index: 9, kind: input, shape index: {}]   ;;  %s11706_s10 = inlined_call_operand.vmem [shape: f32[8030,64], index: 10, kind: input, shape index: {}]   ;;  %s11707_s11 = inlined_call_operand.vmem [shape: f32[1,64], index: 11, kind: input, shape index: {}]   ;;  %s11708_s12 = inlined_call_operand.vmem [shape: f32[64,128], index: 12, kind: input, shape index: {}]   ;;  %s11709_s13 = inlined_call_operand.vmem [shape: f32[1,128], index: 13, kind: input, shape index: {}]   ;;  %s11710_s14 = inlined_call_operand.hbm [shape: f32[16,128], index: 14, kind: output, shape index: {}]  }
   0x1   :  { %v67_v0 = vld [vmem:[%s11703_s7 + $0x78] sm:$0xff]  ;;  %87 = vmatprep.subr.mxu0 %v7019_v2  ;;  %6805 = vmatprep.subr.mxu1 %v7019_v2  ;;  %v66_v3 = vld [vmem:[%s11703_s7 + $0x70] sm:$0xff]  ;;  %v65_v5 = vld [vmem:[%s11703_s7 + $0x68] sm:$0xff]  ;;  %vm79_vm3 = vcmask 72704   ;;  %vm660_vm4 = vcmask 1041408   ;;  %vm656_vm5 = vcmask 80896  }
   0x2   :  { %v173_v1 = vld [vmem:[%s11704_s8 + $0x18] sm:$0x1]  ;;  %v172_v4 = vld [vmem:[%s11704_s8 + $0x10] sm:$0xff]  ;;  %88 = vmatpush1.msra.mxu0 %v67_v0  ;;  %v171_v6 = vld [vmem:[%s11704_s8 + $0x8] sm:$0xff]  ;;  %6813 = vmatprep.mubr.msk.bf16.mxu1 %vm7020_vm2, %v7019_v2 }
   0x3   :  { %6806 = vmatpush3.msk.msra.mxu1 %vm83_vm0, %v173_v1  ;;  %89 = vmatprep.subr.mxu0 %v7019_v2  ;;  %v64_v7 = vld [vmem:[%s11703_s7 + $0x60] sm:$0xff]  ;;  %v324_v9 = vld [vmem:[%s11705_s9 + $0xf8] sm:$0xff]  ;;  %v62_v13 = vld [vmem:[%s11703_s7 + $0x50] sm:$0xff] }
   0x4   :  { %6807 = vmatprep.subr.mxu1 %v7019_v2  ;;  %90 = vmatpush1.msra.mxu0 %v66_v3  ;;  %v170_v8 = vld [vmem:[%s11704_s8] sm:$0xff]  ;;  %v63_v10 = vld [vmem:[%s11703_s7 + $0x58] sm:$0xff]  ;;  %v323_v14 = vld [vmem:[%s11705_s9 + $0xf0] sm:$0xff] }
   0x5   :  { %6808 = vmatpush3.msra.mxu1 %v172_v4  ;;  %91 = vmatprep.subr.mxu0 %v7019_v2  ;;  %v6872_v11 = vld [vmem:[%s11697_s1] sm:$0xff]   ;;  %v308_v12 = vld [vmem:[%s11705_s9 + $0x78] sm:$0xff]  ;;  %v307_v15 = vld [vmem:[%s11705_s9 + $0x70] sm:$0xff] }
   0x6   :  { %6809 = vmatprep.subr.mxu1 %v7019_v2  ;;  %92 = vmatpush1.msra.mxu0 %v65_v5  ;;  %v61_v16 = vld [vmem:[%s11703_s7 + $0x48] sm:$0xff]  ;;  %v60_v19 = vld [vmem:[%s11703_s7 + $0x40] sm:$0xff]  ;;  %v59_v22 = vld [vmem:[%s11703_s7 + $0x38] sm:$0xff] }
   0x7   :  { %6810 = vmatpush3.msra.mxu1 %v171_v6  ;;  %93 = vmatprep.subr.mxu0 %v7019_v2  ;;  %v322_v17 = vld [vmem:[%s11705_s9 + $0xe8] sm:$0xff]  ;;  %v321_v20 = vld [vmem:[%s11705_s9 + $0xe0] sm:$0xff]  ;;  %v320_v23 = vld [vmem:[%s11705_s9 + $0xd8] sm:$0xff] }
   0x8   :  { %6811 = vmatprep.subr.mxu1 %v7019_v2  ;;  %94 = vmatpush1.msra.mxu0 %v64_v7  ;;  %v306_v18 = vld [vmem:[%s11705_s9 + $0x68] sm:$0xff]  ;;  %v305_v21 = vld [vmem:[%s11705_s9 + $0x60] sm:$0xff]  ;;  %v304_v24 = vld [vmem:[%s11705_s9 + $0x58] sm:$0xff] }
   0x9   :  { %6812 = vmatpush3.msra.mxu1 %v170_v8  ;;  %95 = vmatprep.subr.mxu0 %v7019_v2  ;;  %v58_v25 = vld [vmem:[%s11703_s7 + $0x30] sm:$0xff]  ;;  %v57_v28 = vld [vmem:[%s11703_s7 + $0x28] sm:$0xff]  ;;  %v56_v31 = vld [vmem:[%s11703_s7 + $0x20] sm:$0xff] }
   0xa   :  { %5300 = vmatprep.subr.mxu1 %v324_v9  ;;  %96 = vmatpush1.msra.mxu0 %v63_v10  ;;  %v319_v26 = vld [vmem:[%s11705_s9 + $0xd0] sm:$0xff]  ;;  %v318_v29 = vld [vmem:[%s11705_s9 + $0xc8] sm:$0xff]  ;;  %v317_v32 = vld [vmem:[%s11705_s9 + $0xc0] sm:$0xff] }
   0xb   :  { %6814 = vmatmul.mubr.msk.bf16.vlgmr.msra.gmra.mxu1 %vm179_vm1, %v6872_v11  ;;  %97 = vmatprep.subr.mxu0 %v7019_v2  ;;  %v303_v27 = vld [vmem:[%s11705_s9 + $0x50] sm:$0xff]  ;;  %v302_v30 = vld [vmem:[%s11705_s9 + $0x48] sm:$0xff]  ;;  %v301_v33 = vld [vmem:[%s11705_s9 + $0x40] sm:$0xff] }
   0xc   :  { %5301 = vmatpush3.msra.mxu1 %v308_v12  ;;  %98 = vmatpush1.msra.mxu0 %v62_v13  ;;  %v55_v34 = vld [vmem:[%s11703_s7 + $0x18] sm:$0xff]  ;;  %v54_v37 = vld [vmem:[%s11703_s7 + $0x10] sm:$0xff]  ;;  %v53_v40 = vld [vmem:[%s11703_s7 + $0x8] sm:$0xff] }
   0xd   :  { %5302 = vmatprep.subr.mxu1 %v323_v14  ;;  %99 = vmatprep.subr.mxu0 %v7019_v2  ;;  %v316_v35 = vld [vmem:[%s11705_s9 + $0xb8] sm:$0xff]  ;;  %v315_v38 = vld [vmem:[%s11705_s9 + $0xb0] sm:$0xff]  ;;  %v314_v41 = vld [vmem:[%s11705_s9 + $0xa8] sm:$0xff] }
   0xe   :  { %5303 = vmatpush3.msra.mxu1 %v307_v15  ;;  %100 = vmatpush1.msra.mxu0 %v61_v16  ;;  %v300_v36 = vld [vmem:[%s11705_s9 + $0x38] sm:$0xff]  ;;  %v299_v39 = vld [vmem:[%s11705_s9 + $0x30] sm:$0xff]  ;;  %v298_v42 = vld [vmem:[%s11705_s9 + $0x28] sm:$0xff] }
   0xf   :  { %5304 = vmatprep.subr.mxu1 %v322_v17  ;;  %101 = vmatprep.subr.mxu0 %v7019_v2  ;;  %v52_v43 = vld [vmem:[%s11703_s7] sm:$0xff]  ;;  %v69_v46 = vld [vmem:[%s11703_s7 + $0x88] sm:$0x1]  ;;  %v312_v47 = vld [vmem:[%s11705_s9 + $0x98] sm:$0xff] }
  0x10   :  { %5305 = vmatpush3.msra.mxu1 %v306_v18  ;;  %102 = vmatpush1.msra.mxu0 %v60_v19  ;;  %v313_v44 = vld [vmem:[%s11705_s9 + $0xa0] sm:$0xff]  ;;  %v296_v48 = vld [vmem:[%s11705_s9 + $0x18] sm:$0xff]  ;;  %v311_v51 = vld [vmem:[%s11705_s9 + $0x90] sm:$0xff] }
  0x11   :  { %5306 = vmatprep.subr.mxu1 %v321_v20  ;;  %103 = vmatprep.subr.mxu0 %v7019_v2  ;;  %v297_v45 = vld [vmem:[%s11705_s9 + $0x20] sm:$0xff]  ;;  %v295_v53 = vld [vmem:[%s11705_s9 + $0x10] sm:$0xff]  ;;  %v310_v54 = vld [vmem:[%s11705_s9 + $0x88] sm:$0xff] }
  0x12   :  { %5307 = vmatpush3.msra.mxu1 %v305_v21  ;;  %104 = vmatpush1.msra.mxu0 %v59_v22  ;;  %v68_v49 = vld [vmem:[%s11703_s7 + $0x80] sm:$0xff]  ;;  %v356_v55 = vld [vmem:[%s11705_s9 + $0x1f8] sm:$0xff]  ;;  %v294_v56 = vld [vmem:[%s11705_s9 + $0x8] sm:$0xff] }
  0x13   :  { %5308 = vmatprep.subr.mxu1 %v320_v23  ;;  %105 = vmatprep.subr.mxu0 %v7019_v2  ;;  %v6875_v50 = vld [vmem:[%s11696_s0 + $0x4] ss:$8 sps:$4 sm:$0xff]   ;;  %v6873_v52 = vld [vmem:[%s11696_s0] ss:$8 sps:$4 sm:$0xff]   ;;  %v340_v57 = vld [vmem:[%s11705_s9 + $0x178] sm:$0xff] }
  0x14   :  { %5309 = vmatpush3.msra.mxu1 %v304_v24  ;;  %106 = vmatpush1.msra.mxu0 %v58_v25  ;;  %v309_v58 = vld [vmem:[%s11705_s9 + $0x80] sm:$0xff]  ;;  %v355_v59 = vld [vmem:[%s11705_s9 + $0x1f0] sm:$0xff]  ;;  %v354_v0 = vld [vmem:[%s11705_s9 + $0x1e8] sm:$0xff] }
  0x15   :  { %5310 = vmatprep.subr.mxu1 %v319_v26  ;;  %107 = vmatprep.subr.mxu0 %v7019_v2  ;;  %v293_v60 = vld [vmem:[%s11705_s9] sm:$0xff]  ;;  %v339_v61 = vld [vmem:[%s11705_s9 + $0x170] sm:$0xff]  ;;  %v388_v1 = vld [vmem:[%s11705_s9 + $0x2f8] sm:$0xff] }
  0x16   :  { %5311 = vmatpush3.msra.mxu1 %v303_v27  ;;  %108 = vmatpush1.msra.mxu0 %v57_v28  ;;  %v6878_v62 = vld [vmem:[%s11698_s2 + $0x4] ss:$72 sps:$4 sm:$0xff]   ;;  %v6876_v63 = vld [vmem:[%s11698_s2] ss:$72 sps:$4 sm:$0xff]   ;;  %v372_v4 = vld [vmem:[%s11705_s9 + $0x278] sm:$0xff] }
  0x17   :  { %5312 = vmatprep.subr.mxu1 %v318_v29  ;;  %109 = vmatprep.subr.mxu0 %v7019_v2  ;;  %v338_v3 = vld [vmem:[%s11705_s9 + $0x168] sm:$0xff]  ;;  %v353_v5 = vld [vmem:[%s11705_s9 + $0x1e0] sm:$0xff]  ;;  %v387_v6 = vld [vmem:[%s11705_s9 + $0x2f0] sm:$0xff] }
  0x18   :  { %5313 = vmatpush3.msra.mxu1 %v302_v30  ;;  %110 = vmatpush1.msra.mxu0 %v56_v31  ;;  %v337_v7 = vld [vmem:[%s11705_s9 + $0x160] sm:$0xff]  ;;  %v371_v8 = vld [vmem:[%s11705_s9 + $0x270] sm:$0xff]  ;;  %v352_v9 = vld [vmem:[%s11705_s9 + $0x1d8] sm:$0xff] }
  0x19   :  { %5314 = vmatprep.subr.mxu1 %v317_v32  ;;  %111 = vmatprep.subr.mxu0 %v7019_v2  ;;  %v386_v10 = vld [vmem:[%s11705_s9 + $0x2e8] sm:$0xff]  ;;  %v336_v11 = vld [vmem:[%s11705_s9 + $0x158] sm:$0xff]  ;;  %v351_v13 = vld [vmem:[%s11705_s9 + $0x1d0] sm:$0xff] }
  0x1a   :  { %5315 = vmatpush3.msra.mxu1 %v301_v33  ;;  %112 = vmatpush1.msra.mxu0 %v55_v34  ;;  %v370_v12 = vld [vmem:[%s11705_s9 + $0x268] sm:$0xff]  ;;  %v385_v14 = vld [vmem:[%s11705_s9 + $0x2e0] sm:$0xff]  ;;  %v335_v15 = vld [vmem:[%s11705_s9 + $0x150] sm:$0xff] }
  0x1b   :  { %5316 = vmatprep.subr.mxu1 %v316_v35  ;;  %113 = vmatprep.subr.mxu0 %v7019_v2  ;;  %v369_v16 = vld [vmem:[%s11705_s9 + $0x260] sm:$0xff]  ;;  %v350_v17 = vld [vmem:[%s11705_s9 + $0x1c8] sm:$0xff]  ;;  %v384_v18 = vld [vmem:[%s11705_s9 + $0x2d8] sm:$0xff] }
  0x1c   :  { %5317 = vmatpush3.msra.mxu1 %v300_v36  ;;  %114 = vmatpush1.msra.mxu0 %v54_v37  ;;  %v334_v19 = vld [vmem:[%s11705_s9 + $0x148] sm:$0xff]  ;;  %v368_v20 = vld [vmem:[%s11705_s9 + $0x258] sm:$0xff]  ;;  %v349_v21 = vld [vmem:[%s11705_s9 + $0x1c0] sm:$0xff] }
  0x1d   :  { %5318 = vmatprep.subr.mxu1 %v315_v38  ;;  %115 = vmatprep.subr.mxu0 %v7019_v2  ;;  %v383_v22 = vld [vmem:[%s11705_s9 + $0x2d0] sm:$0xff]  ;;  %v333_v23 = vld [vmem:[%s11705_s9 + $0x140] sm:$0xff]  ;;  %v348_v25 = vld [vmem:[%s11705_s9 + $0x1b8] sm:$0xff] }
  0x1e   :  { %5319 = vmatpush3.msra.mxu1 %v299_v39  ;;  %116 = vmatpush1.msra.mxu0 %v53_v40  ;;  %v367_v24 = vld [vmem:[%s11705_s9 + $0x250] sm:$0xff]  ;;  %v382_v26 = vld [vmem:[%s11705_s9 + $0x2c8] sm:$0xff]  ;;  %v332_v27 = vld [vmem:[%s11705_s9 + $0x138] sm:$0xff] }
  0x1f   :  { %5320 = vmatprep.subr.mxu1 %v314_v41  ;;  %117 = vmatprep.subr.mxu0 %v7019_v2  ;;  %v366_v28 = vld [vmem:[%s11705_s9 + $0x248] sm:$0xff]  ;;  %v347_v29 = vld [vmem:[%s11705_s9 + $0x1b0] sm:$0xff]  ;;  %v381_v30 = vld [vmem:[%s11705_s9 + $0x2c0] sm:$0xff] }
  0x20   :  { %5321 = vmatpush3.msra.mxu1 %v298_v42  ;;  %118 = vmatpush1.msra.mxu0 %v52_v43  ;;  %v331_v31 = vld [vmem:[%s11705_s9 + $0x130] sm:$0xff]  ;;  %v365_v32 = vld [vmem:[%s11705_s9 + $0x240] sm:$0xff]  ;;  %v346_v33 = vld [vmem:[%s11705_s9 + $0x1a8] sm:$0xff] }
  0x21   :  { %5322 = vmatprep.subr.mxu1 %v313_v44  ;;  %147 = vmatprep.subr.mxu0 %v7019_v2  ;;  %v380_v34 = vld [vmem:[%s11705_s9 + $0x2b8] sm:$0xff]  ;;  %v330_v35 = vld [vmem:[%s11705_s9 + $0x128] sm:$0xff]  ;;  %v345_v37 = vld [vmem:[%s11705_s9 + $0x1a0] sm:$0xff] }
  0x22   :  { %5323 = vmatpush3.msra.mxu1 %v297_v45  ;;  %5201 = vmatpush2.msk.msra.mxu0 %vm83_vm0, %v69_v46  ;;  %v364_v36 = vld [vmem:[%s11705_s9 + $0x238] sm:$0xff]  ;;  %v379_v38 = vld [vmem:[%s11705_s9 + $0x2b0] sm:$0xff]  ;;  %v329_v39 = vld [vmem:[%s11705_s9 + $0x120] sm:$0xff] }
  0x23   :  { %5324 = vmatprep.subr.mxu1 %v312_v47  ;;  %149 = vmatprep.subr.mxu0 %v7019_v2  ;;  %v363_v40 = vld [vmem:[%s11705_s9 + $0x230] sm:$0xff]  ;;  %v344_v41 = vld [vmem:[%s11705_s9 + $0x198] sm:$0xff]  ;;  %v378_v42 = vld [vmem:[%s11705_s9 + $0x2a8] sm:$0xff] }
  0x24   :  { %5325 = vmatpush3.msra.mxu1 %v296_v48  ;;  %150 = vmatpush2.msra.mxu0 %v68_v49  ;;  %v328_v43 = vld [vmem:[%s11705_s9 + $0x118] sm:$0xff]  ;;  %v362_v44 = vld [vmem:[%s11705_s9 + $0x228] sm:$0xff]  ;;  %v343_v45 = vld [vmem:[%s11705_s9 + $0x190] sm:$0xff] }
  0x25   :  { %5326 = vmatprep.subr.mxu1 %v311_v51  ;;  %5202 = vmatprep.mubr.msk.bf16.mxu0 %vm79_vm3, %v6875_v50  ;;  %v377_v46 = vld [vmem:[%s11705_s9 + $0x2a0] sm:$0xff]  ;;  %v327_v47 = vld [vmem:[%s11705_s9 + $0x110] sm:$0xff]  ;;  %v342_v49 = vld [vmem:[%s11705_s9 + $0x188] sm:$0xff] }
  0x26   :  { %5327 = vmatpush3.msra.mxu1 %v295_v53  ;;  %152 = vmatmul.mubr.bf16.vlgmr.msra.gmra.mxu0 %v6873_v52  ;;  %v361_v48 = vld [vmem:[%s11705_s9 + $0x220] sm:$0xff]  ;;  %v376_v50 = vld [vmem:[%s11705_s9 + $0x298] sm:$0xff]  ;;  %v326_v51 = vld [vmem:[%s11705_s9 + $0x108] sm:$0xff] }
  0x27   :  { %5328 = vmatprep.subr.mxu1 %v310_v54  ;;  %5338 = vmatprep.subr.mxu0 %v356_v55  ;;  %v360_v52 = vld [vmem:[%s11705_s9 + $0x218] sm:$0xff]  ;;  %v341_v53 = vld [vmem:[%s11705_s9 + $0x180] sm:$0xff]  ;;  %v375_v54 = vld [vmem:[%s11705_s9 + $0x290] sm:$0xff] }
  0x28   :  { %5329 = vmatpush3.msra.mxu1 %v294_v56  ;;  %5339 = vmatpush3.msra.mxu0 %v340_v57  ;;  %v6881_v55 = vld [vmem:[%s11698_s2 + $0xc] ss:$72 sps:$4 sm:$0xff]   ;;  %v325_v56 = vld [vmem:[%s11705_s9 + $0x100] sm:$0xff]  ;;  %v6879_v57 = vld [vmem:[%s11698_s2 + $0x8] ss:$72 sps:$4 sm:$0xff]  }
  0x29   :  { %5330 = vmatprep.subr.mxu1 %v309_v58  ;;  %5340 = vmatprep.subr.mxu0 %v355_v59  ;;  %v359_v58 = vld [vmem:[%s11705_s9 + $0x210] sm:$0xff]  ;;  %v374_v59 = vld [vmem:[%s11705_s9 + $0x288] sm:$0xff] }
  0x2a   :  { %5331 = vmatpush3.msra.mxu1 %v293_v60  ;;  %5341 = vmatpush3.msra.mxu0 %v339_v61  ;;  %v420_v60 = vld [vmem:[%s11705_s9 + $0x3f8] sm:$0xff]  ;;  %v358_v61 = vld [vmem:[%s11705_s9 + $0x208] sm:$0xff] }
  0x2b   :  { %728 = vmatprep.mubr.bf16.mxu1 %v6878_v62  ;;  %5342 = vmatprep.subr.mxu0 %v354_v0  ;;  %v404_v62 = vld [vmem:[%s11705_s9 + $0x378] sm:$0xff]  ;;  %v419_v0 = vld [vmem:[%s11705_s9 + $0x3f0] sm:$0xff] }
  0x2c   :  { %5376 = vmatprep.subr.mxu1 %v388_v1  ;;  %729 = vmatmul.mubr.bf16.vlgmr.msra.gmra.mxu1 %v6876_v63  ;;  %v373_v63 = vld [vmem:[%s11705_s9 + $0x280] sm:$0xff]  ;;  %v6884_v1 = vld [vmem:[%s11698_s2 + $0x14] ss:$72 sps:$4 sm:$0xff]  }
  0x2d   :  { %5343 = vmatpush3.msra.mxu0 %v338_v3  ;;  %5377 = vmatpush3.msra.mxu1 %v372_v4  ;;  %v357_v3 = vld [vmem:[%s11705_s9 + $0x200] sm:$0xff]  ;;  %v6882_v4 = vld [vmem:[%s11698_s2 + $0x10] ss:$72 sps:$4 sm:$0xff]  }
  0x2e   :  { %5344 = vmatprep.subr.mxu0 %v353_v5  ;;  %5378 = vmatprep.subr.mxu1 %v387_v6  ;;  %v403_v5 = vld [vmem:[%s11705_s9 + $0x370] sm:$0xff]  ;;  %v418_v6 = vld [vmem:[%s11705_s9 + $0x3e8] sm:$0xff] }
  0x2f   :  { %5345 = vmatpush3.msra.mxu0 %v337_v7  ;;  %5379 = vmatpush3.msra.mxu1 %v371_v8  ;;  %v452_v7 = vld [vmem:[%s11705_s9 + $0x4f8] sm:$0xff]  ;;  %v402_v8 = vld [vmem:[%s11705_s9 + $0x368] sm:$0xff] }
  0x30   :  { %5346 = vmatprep.subr.mxu0 %v352_v9  ;;  %5380 = vmatprep.subr.mxu1 %v386_v10  ;;  %v436_v9 = vld [vmem:[%s11705_s9 + $0x478] sm:$0xff]  ;;  %v417_v10 = vld [vmem:[%s11705_s9 + $0x3e0] sm:$0xff] }
  0x31   :  { %5347 = vmatpush3.msra.mxu0 %v336_v11  ;;  %5381 = vmatpush3.msra.mxu1 %v370_v12  ;;  %v451_v11 = vld [vmem:[%s11705_s9 + $0x4f0] sm:$0xff]  ;;  %v401_v12 = vld [vmem:[%s11705_s9 + $0x360] sm:$0xff] }
  0x32   :  { %5348 = vmatprep.subr.mxu0 %v351_v13  ;;  %5382 = vmatprep.subr.mxu1 %v385_v14  ;;  %v435_v13 = vld [vmem:[%s11705_s9 + $0x470] sm:$0xff]  ;;  %v416_v14 = vld [vmem:[%s11705_s9 + $0x3d8] sm:$0xff] }
  0x33   :  { %5349 = vmatpush3.msra.mxu0 %v335_v15  ;;  %5383 = vmatpush3.msra.mxu1 %v369_v16  ;;  %v450_v15 = vld [vmem:[%s11705_s9 + $0x4e8] sm:$0xff]  ;;  %v400_v16 = vld [vmem:[%s11705_s9 + $0x358] sm:$0xff] }
  0x34   :  { %5350 = vmatprep.subr.mxu0 %v350_v17  ;;  %5384 = vmatprep.subr.mxu1 %v384_v18  ;;  %v434_v17 = vld [vmem:[%s11705_s9 + $0x468] sm:$0xff]  ;;  %v415_v18 = vld [vmem:[%s11705_s9 + $0x3d0] sm:$0xff] }
  0x35   :  { %5351 = vmatpush3.msra.mxu0 %v334_v19  ;;  %5385 = vmatpush3.msra.mxu1 %v368_v20  ;;  %v449_v19 = vld [vmem:[%s11705_s9 + $0x4e0] sm:$0xff]  ;;  %v399_v20 = vld [vmem:[%s11705_s9 + $0x350] sm:$0xff] }
  0x36   :  { %5352 = vmatprep.subr.mxu0 %v349_v21  ;;  %5386 = vmatprep.subr.mxu1 %v383_v22  ;;  %v433_v21 = vld [vmem:[%s11705_s9 + $0x460] sm:$0xff] }
  0x37   :  { %5353 = vmatpush3.msra.mxu0 %v333_v23  ;;  %5387 = vmatpush3.msra.mxu1 %v367_v24  ;;  %v259_v22 = vld [vmem:[%s11700_s4] sm:$0xff]  ;;  %v414_v23 = vld [vmem:[%s11705_s9 + $0x3c8] sm:$0xff]  ;;  %v448_v24 = vld [vmem:[%s11705_s9 + $0x4d8] sm:$0xff] }
  0x38   :  { %5354 = vmatprep.subr.mxu0 %v348_v25  ;;  %5388 = vmatprep.subr.mxu1 %v382_v26  ;;  %v7021_v25 = vmov 0   ;;  %v398_v26 = vld [vmem:[%s11705_s9 + $0x348] sm:$0xff] }
  0x39   :  { %5355 = vmatpush3.msra.mxu0 %v332_v27  ;;  %5389 = vmatpush3.msra.mxu1 %v366_v28  ;;  %v432_v27 = vld [vmem:[%s11705_s9 + $0x458] sm:$0xff]  ;;  %v413_v28 = vld [vmem:[%s11705_s9 + $0x3c0] sm:$0xff] }
  0x3a   :  { %5356 = vmatprep.subr.mxu0 %v347_v29  ;;  %5390 = vmatprep.subr.mxu1 %v381_v30  ;;  %v447_v29 = vld [vmem:[%s11705_s9 + $0x4d0] sm:$0xff]  ;;  %v397_v30 = vld [vmem:[%s11705_s9 + $0x340] sm:$0xff] }
  0x3b   :  { %5357 = vmatpush3.msra.mxu0 %v331_v31  ;;  %5391 = vmatpush3.msra.mxu1 %v365_v32  ;;  %v431_v31 = vld [vmem:[%s11705_s9 + $0x450] sm:$0xff]  ;;  %v260_v32 = vld [vmem:[%s11700_s4 + $0x8] sm:$0xff] }
  0x3c   :  { %5358 = vmatprep.subr.mxu0 %v346_v33  ;;  %5392 = vmatprep.subr.mxu1 %v380_v34  ;;  %v412_v33 = vld [vmem:[%s11705_s9 + $0x3b8] sm:$0xff]  ;;  %v446_v34 = vld [vmem:[%s11705_s9 + $0x4c8] sm:$0xff] }
  0x3d   :  { %5359 = vmatpush3.msra.mxu0 %v330_v35  ;;  %5393 = vmatpush3.msra.mxu1 %v364_v36  ;;  %v396_v35 = vld [vmem:[%s11705_s9 + $0x338] sm:$0xff]  ;;  %v430_v36 = vld [vmem:[%s11705_s9 + $0x448] sm:$0xff] }
  0x3e   :  { %5360 = vmatprep.subr.mxu0 %v345_v37  ;;  %5394 = vmatprep.subr.mxu1 %v379_v38  ;;  %v411_v37 = vld [vmem:[%s11705_s9 + $0x3b0] sm:$0xff]  ;;  %v445_v38 = vld [vmem:[%s11705_s9 + $0x4c0] sm:$0xff] }
  0x3f   :  { %5361 = vmatpush3.msra.mxu0 %v329_v39  ;;  %5395 = vmatpush3.msra.mxu1 %v363_v40  ;;  %v395_v39 = vld [vmem:[%s11705_s9 + $0x330] sm:$0xff]  ;;  %v429_v40 = vld [vmem:[%s11705_s9 + $0x440] sm:$0xff] }
  0x40   :  { %5362 = vmatprep.subr.mxu0 %v344_v41  ;;  %5396 = vmatprep.subr.mxu1 %v378_v42  ;;  %v410_v41 = vld [vmem:[%s11705_s9 + $0x3a8] sm:$0xff]  ;;  %v444_v42 = vld [vmem:[%s11705_s9 + $0x4b8] sm:$0xff] }
  0x41   :  { %5363 = vmatpush3.msra.mxu0 %v328_v43  ;;  %5397 = vmatpush3.msra.mxu1 %v362_v44  ;;  %v394_v43 = vld [vmem:[%s11705_s9 + $0x328] sm:$0xff]  ;;  %v428_v44 = vld [vmem:[%s11705_s9 + $0x438] sm:$0xff] }
  0x42   :  { %5364 = vmatprep.subr.mxu0 %v343_v45  ;;  %5398 = vmatprep.subr.mxu1 %v377_v46  ;;  %v409_v45 = vld [vmem:[%s11705_s9 + $0x3a0] sm:$0xff]  ;;  %v443_v46 = vld [vmem:[%s11705_s9 + $0x4b0] sm:$0xff] }
  0x43   :  { %5365 = vmatpush3.msra.mxu0 %v327_v47  ;;  %5399 = vmatpush3.msra.mxu1 %v361_v48  ;;  %v393_v47 = vld [vmem:[%s11705_s9 + $0x320] sm:$0xff]  ;;  %v427_v48 = vld [vmem:[%s11705_s9 + $0x430] sm:$0xff] }
  0x44   :  { %5366 = vmatprep.subr.mxu0 %v342_v49  ;;  %5400 = vmatprep.subr.mxu1 %v376_v50  ;;  %v408_v49 = vld [vmem:[%s11705_s9 + $0x398] sm:$0xff]  ;;  %v442_v50 = vld [vmem:[%s11705_s9 + $0x4a8] sm:$0xff] }
  0x45   :  { %5367 = vmatpush3.msra.mxu0 %v326_v51  ;;  %5401 = vmatpush3.msra.mxu1 %v360_v52  ;;  %v392_v51 = vld [vmem:[%s11705_s9 + $0x318] sm:$0xff]  ;;  %v426_v52 = vld [vmem:[%s11705_s9 + $0x428] sm:$0xff] }
  0x46   :  { %5368 = vmatprep.subr.mxu0 %v341_v53  ;;  %5402 = vmatprep.subr.mxu1 %v375_v54  ;;  %v407_v53 = vld [vmem:[%s11705_s9 + $0x390] sm:$0xff]  ;;  %v441_v54 = vld [vmem:[%s11705_s9 + $0x4a0] sm:$0xff] }
  0x47   :  { %5369 = vmatpush3.msra.mxu0 %v325_v56  ;;  %801 = vmatprep.mubr.bf16.mxu0 %v6881_v55  ;;  %v391_v55 = vld [vmem:[%s11705_s9 + $0x310] sm:$0xff]  ;;  %v425_v56 = vld [vmem:[%s11705_s9 + $0x420] sm:$0xff] }
  0x48   :  { %5403 = vmatpush3.msra.mxu1 %v359_v58  ;;  %802 = vmatmul.mubr.bf16.vlgmr.msra.gmra.mxu0 %v6879_v57  ;;  %v406_v57 = vld [vmem:[%s11705_s9 + $0x388] sm:$0xff]  ;;  %v440_v58 = vld [vmem:[%s11705_s9 + $0x498] sm:$0xff] }
  0x49   :  { %5404 = vmatprep.subr.mxu1 %v374_v59  ;;  %5414 = vmatprep.subr.mxu0 %v420_v60  ;;  %v390_v59 = vld [vmem:[%s11705_s9 + $0x308] sm:$0xff]  ;;  %v424_v60 = vld [vmem:[%s11705_s9 + $0x418] sm:$0xff] }
  0x4a   :  { %5405 = vmatpush3.msra.mxu1 %v358_v61  ;;  %5415 = vmatpush3.msra.mxu0 %v404_v62  ;;  %v405_v61 = vld [vmem:[%s11705_s9 + $0x380] sm:$0xff]  ;;  %v439_v62 = vld [vmem:[%s11705_s9 + $0x490] sm:$0xff] }
  0x4b   :  { %5406 = vmatprep.subr.mxu1 %v373_v63  ;;  %5416 = vmatprep.subr.mxu0 %v419_v0  ;;  %v389_v63 = vld [vmem:[%s11705_s9 + $0x300] sm:$0xff] }
  0x4c   :  { %5407 = vmatpush3.msra.mxu1 %v357_v3  ;;  %874 = vmatprep.mubr.bf16.mxu1 %v6884_v1  ;;  %v6887_v0 = vld [vmem:[%s11698_s2 + $0x1c] ss:$72 sps:$4 sm:$0xff]   ;;  %v6885_v1 = vld [vmem:[%s11698_s2 + $0x18] ss:$72 sps:$4 sm:$0xff]   ;;  %v423_v3 = vld [vmem:[%s11705_s9 + $0x410] sm:$0xff] }
  0x4d   :  { %5417 = vmatpush3.msra.mxu0 %v403_v5  ;;  %875 = vmatmul.mubr.bf16.vlgmr.msra.gmra.mxu1 %v6882_v4  ;;  %v438_v4 = vld [vmem:[%s11705_s9 + $0x488] sm:$0xff]  ;;  %v484_v5 = vld [vmem:[%s11705_s9 + $0x5f8] sm:$0xff] }
  0x4e   :  { %5418 = vmatprep.subr.mxu0 %v418_v6  ;;  %5452 = vmatprep.subr.mxu1 %v452_v7  ;;  %v422_v6 = vld [vmem:[%s11705_s9 + $0x408] sm:$0xff]  ;;  %v468_v7 = vld [vmem:[%s11705_s9 + $0x578] sm:$0xff] }
  0x4f   :  { %5419 = vmatpush3.msra.mxu0 %v402_v8  ;;  %5453 = vmatpush3.msra.mxu1 %v436_v9  ;;  %v437_v8 = vld [vmem:[%s11705_s9 + $0x480] sm:$0xff]  ;;  %v483_v9 = vld [vmem:[%s11705_s9 + $0x5f0] sm:$0xff] }
  0x50   :  { %5420 = vmatprep.subr.mxu0 %v417_v10  ;;  %5454 = vmatprep.subr.mxu1 %v451_v11  ;;  %v421_v10 = vld [vmem:[%s11705_s9 + $0x400] sm:$0xff] }
  0x51   :  { %5421 = vmatpush3.msra.mxu0 %v401_v12  ;;  %5455 = vmatpush3.msra.mxu1 %v435_v13  ;;  %v6888_v11 = vld [vmem:[%s11698_s2 + $0x20] ss:$72 sps:$4 sm:$0xff]   ;;  %v6890_v12 = vld [vmem:[%s11698_s2 + $0x24] ss:$72 sps:$4 sm:$0xff]   ;;  %v467_v13 = vld [vmem:[%s11705_s9 + $0x570] sm:$0xff] }
  0x52   :  { %5422 = vmatprep.subr.mxu0 %v416_v14  ;;  %5456 = vmatprep.subr.mxu1 %v450_v15  ;;  %v482_v14 = vld [vmem:[%s11705_s9 + $0x5e8] sm:$0xff]  ;;  %v516_v15 = vld [vmem:[%s11705_s9 + $0x6f8] sm:$0xff] }
  0x53   :  { %5423 = vmatpush3.msra.mxu0 %v400_v16  ;;  %5457 = vmatpush3.msra.mxu1 %v434_v17  ;;  %v466_v16 = vld [vmem:[%s11705_s9 + $0x568] sm:$0xff]  ;;  %v500_v17 = vld [vmem:[%s11705_s9 + $0x678] sm:$0xff] }
  0x54   :  { %5424 = vmatprep.subr.mxu0 %v415_v18  ;;  %5458 = vmatprep.subr.mxu1 %v449_v19  ;;  %v481_v18 = vld [vmem:[%s11705_s9 + $0x5e0] sm:$0xff]  ;;  %v515_v19 = vld [vmem:[%s11705_s9 + $0x6f0] sm:$0xff] }
  0x55   :  { %6870 = vset.pattern.permute.xlu0 %v7021_v25  ;;  %5425 = vmatpush3.msra.mxu0 %v399_v20  ;;  %v465_v20 = vld [vmem:[%s11705_s9 + $0x560] sm:$0xff] }
  0x56   :  { %5459 = vmatpush3.msra.mxu1 %v433_v21  ;;  %263 = vperm.xlu0 %6870, %v259_v22   ;;  %v499_v21 = vld [vmem:[%s11705_s9 + $0x670] sm:$0xff]  ;;  %v480_v22 = vld [vmem:[%s11705_s9 + $0x5d8] sm:$0xff] }
  0x57   :  { %5426 = vmatprep.subr.mxu0 %v414_v23  ;;  %5460 = vmatprep.subr.mxu1 %v448_v24  ;;  %v514_v23 = vld [vmem:[%s11705_s9 + $0x6e8] sm:$0xff]  ;;  %v464_v24 = vld [vmem:[%s11705_s9 + $0x558] sm:$0xff] }
  0x58   :  { %5427 = vmatpush3.msra.mxu0 %v398_v26  ;;  %5461 = vmatpush3.msra.mxu1 %v432_v27  ;;  %v498_v26 = vld [vmem:[%s11705_s9 + $0x668] sm:$0xff]  ;;  %v479_v27 = vld [vmem:[%s11705_s9 + $0x5d0] sm:$0xff] }
  0x59   :  { %5428 = vmatprep.subr.mxu0 %v413_v28  ;;  %5462 = vmatprep.subr.mxu1 %v447_v29  ;;  %v513_v28 = vld [vmem:[%s11705_s9 + $0x6e0] sm:$0xff]  ;;  %v463_v29 = vld [vmem:[%s11705_s9 + $0x550] sm:$0xff] }
  0x5a   :  { %5429 = vmatpush3.msra.mxu0 %v397_v30  ;;  %5463 = vmatpush3.msra.mxu1 %v431_v31  ;;  %v497_v30 = vld [vmem:[%s11705_s9 + $0x660] sm:$0xff]  ;;  %v478_v31 = vld [vmem:[%s11705_s9 + $0x5c8] sm:$0xff] }
  0x5b   :  { %268 = vperm.xlu0 %6870, %v260_v32   ;;  %5430 = vmatprep.subr.mxu0 %v412_v33  ;;  %v512_v32 = vld [vmem:[%s11705_s9 + $0x6d8] sm:$0xff]  ;;  %v462_v33 = vld [vmem:[%s11705_s9 + $0x548] sm:$0xff] }
  0x5c   :  { %5464 = vmatprep.subr.mxu1 %v446_v34  ;;  %5431 = vmatpush3.msra.mxu0 %v396_v35  ;;  %v496_v34 = vld [vmem:[%s11705_s9 + $0x658] sm:$0xff]  ;;  %v477_v35 = vld [vmem:[%s11705_s9 + $0x5c0] sm:$0xff] }
  0x5d   :  { %5465 = vmatpush3.msra.mxu1 %v430_v36  ;;  %5432 = vmatprep.subr.mxu0 %v411_v37  ;;  %v511_v36 = vld [vmem:[%s11705_s9 + $0x6d0] sm:$0xff]  ;;  %v461_v37 = vld [vmem:[%s11705_s9 + $0x540] sm:$0xff] }
  0x5e   :  { %5466 = vmatprep.subr.mxu1 %v445_v38  ;;  %5433 = vmatpush3.msra.mxu0 %v395_v39  ;;  %v495_v38 = vld [vmem:[%s11705_s9 + $0x650] sm:$0xff]  ;;  %v476_v39 = vld [vmem:[%s11705_s9 + $0x5b8] sm:$0xff] }
  0x5f   :  { %5467 = vmatpush3.msra.mxu1 %v429_v40  ;;  %5434 = vmatprep.subr.mxu0 %v410_v41  ;;  %v510_v40 = vld [vmem:[%s11705_s9 + $0x6c8] sm:$0xff]  ;;  %v460_v41 = vld [vmem:[%s11705_s9 + $0x538] sm:$0xff] }
  0x60   :  { %5468 = vmatprep.subr.mxu1 %v444_v42  ;;  %5435 = vmatpush3.msra.mxu0 %v394_v43  ;;  %v494_v42 = vld [vmem:[%s11705_s9 + $0x648] sm:$0xff]  ;;  %v475_v43 = vld [vmem:[%s11705_s9 + $0x5b0] sm:$0xff] }
  0x61   :  { %5469 = vmatpush3.msra.mxu1 %v428_v44  ;;  %5436 = vmatprep.subr.mxu0 %v409_v45  ;;  %v509_v44 = vld [vmem:[%s11705_s9 + $0x6c0] sm:$0xff]  ;;  %v459_v45 = vld [vmem:[%s11705_s9 + $0x530] sm:$0xff] }
  0x62   :  { %5470 = vmatprep.subr.mxu1 %v443_v46  ;;  %5437 = vmatpush3.msra.mxu0 %v393_v47  ;;  %v493_v46 = vld [vmem:[%s11705_s9 + $0x640] sm:$0xff]  ;;  %v474_v47 = vld [vmem:[%s11705_s9 + $0x5a8] sm:$0xff] }
  0x63   :  { %5471 = vmatpush3.msra.mxu1 %v427_v48  ;;  %5438 = vmatprep.subr.mxu0 %v408_v49  ;;  %v508_v48 = vld [vmem:[%s11705_s9 + $0x6b8] sm:$0xff]  ;;  %v458_v49 = vld [vmem:[%s11705_s9 + $0x528] sm:$0xff] }
  0x64   :  { %5472 = vmatprep.subr.mxu1 %v442_v50  ;;  %5439 = vmatpush3.msra.mxu0 %v392_v51  ;;  %v492_v50 = vld [vmem:[%s11705_s9 + $0x638] sm:$0xff]  ;;  %v473_v51 = vld [vmem:[%s11705_s9 + $0x5a0] sm:$0xff] }
  0x65   :  { %5473 = vmatpush3.msra.mxu1 %v426_v52  ;;  %5440 = vmatprep.subr.mxu0 %v407_v53  ;;  %v507_v52 = vld [vmem:[%s11705_s9 + $0x6b0] sm:$0xff]  ;;  %v457_v53 = vld [vmem:[%s11705_s9 + $0x520] sm:$0xff] }
  0x66   :  { %5474 = vmatprep.subr.mxu1 %v441_v54  ;;  %5441 = vmatpush3.msra.mxu0 %v391_v55  ;;  %v491_v54 = vld [vmem:[%s11705_s9 + $0x630] sm:$0xff]  ;;  %v472_v55 = vld [vmem:[%s11705_s9 + $0x598] sm:$0xff] }
  0x67   :  { %5475 = vmatpush3.msra.mxu1 %v425_v56  ;;  %5442 = vmatprep.subr.mxu0 %v406_v57  ;;  %v506_v56 = vld [vmem:[%s11705_s9 + $0x6a8] sm:$0xff]  ;;  %v456_v57 = vld [vmem:[%s11705_s9 + $0x518] sm:$0xff] }
  0x68   :  { %5476 = vmatprep.subr.mxu1 %v440_v58  ;;  %5443 = vmatpush3.msra.mxu0 %v390_v59  ;;  %v490_v58 = vld [vmem:[%s11705_s9 + $0x628] sm:$0xff]  ;;  %v471_v59 = vld [vmem:[%s11705_s9 + $0x590] sm:$0xff] }
  0x69   :  { %5477 = vmatpush3.msra.mxu1 %v424_v60  ;;  %5444 = vmatprep.subr.mxu0 %v405_v61  ;;  %v505_v60 = vld [vmem:[%s11705_s9 + $0x6a0] sm:$0xff]  ;;  %v455_v61 = vld [vmem:[%s11705_s9 + $0x510] sm:$0xff] }
  0x6a   :  { %5478 = vmatprep.subr.mxu1 %v439_v62  ;;  %5445 = vmatpush3.msra.mxu0 %v389_v63  ;;  %v489_v62 = vld [vmem:[%s11705_s9 + $0x620] sm:$0xff]  ;;  %v470_v63 = vld [vmem:[%s11705_s9 + $0x588] sm:$0xff] }
  0x6b   :  { %947 = vmatprep.mubr.bf16.mxu0 %v6887_v0  ;;  %5479 = vmatpush3.msra.mxu1 %v423_v3  ;;  %v504_v0 = vld [vmem:[%s11705_s9 + $0x698] sm:$0xff] }
  0x6c   :  { %948 = vmatmul.mubr.bf16.vlgmr.msra.gmra.mxu0 %v6885_v1  ;;  %5480 = vmatprep.subr.mxu1 %v438_v4  ;;  %v454_v1 = vld [vmem:[%s11705_s9 + $0x508] sm:$0xff]  ;;  %v488_v3 = vld [vmem:[%s11705_s9 + $0x618] sm:$0xff]  ;;  %v469_v4 = vld [vmem:[%s11705_s9 + $0x580] sm:$0xff] }
  0x6d   :  { %5490 = vmatprep.subr.mxu0 %v484_v5  ;;  %5481 = vmatpush3.msra.mxu1 %v422_v6  ;;  %v503_v5 = vld [vmem:[%s11705_s9 + $0x690] sm:$0xff]  ;;  %v453_v6 = vld [vmem:[%s11705_s9 + $0x500] sm:$0xff] }
  0x6e   :  { %5491 = vmatpush3.msra.mxu0 %v468_v7  ;;  %5482 = vmatprep.subr.mxu1 %v437_v8  ;;  %v6893_v7 = vld [vmem:[%s11698_s2 + $0x2c] ss:$72 sps:$4 sm:$0xff]   ;;  %v6891_v8 = vld [vmem:[%s11698_s2 + $0x28] ss:$72 sps:$4 sm:$0xff]  }
  0x6f   :  { %5492 = vmatprep.subr.mxu0 %v483_v9  ;;  %5483 = vmatpush3.msra.mxu1 %v421_v10  ;;  %v487_v9 = vld [vmem:[%s11705_s9 + $0x610] sm:$0xff]  ;;  %v502_v10 = vld [vmem:[%s11705_s9 + $0x688] sm:$0xff] }
  0x70   :  { %1020 = vmatprep.mubr.bf16.mxu1 %v6890_v12  ;;  %5493 = vmatpush3.msra.mxu0 %v467_v13  ;;  %v486_v12 = vld [vmem:[%s11705_s9 + $0x608] sm:$0xff]  ;;  %v532_v13 = vld [vmem:[%s11705_s9 + $0x778] sm:$0xff] }
  0x71   :  { %1021 = vmatmul.mubr.bf16.vlgmr.msra.gmra.mxu1 %v6888_v11  ;;  %5494 = vmatprep.subr.mxu0 %v482_v14  ;;  %v548_v11 = vld [vmem:[%s11705_s9 + $0x7f8] sm:$0xff]  ;;  %v501_v14 = vld [vmem:[%s11705_s9 + $0x680] sm:$0xff] }
  0x72   :  { %5528 = vmatprep.subr.mxu1 %v516_v15  ;;  %5495 = vmatpush3.msra.mxu0 %v466_v16  ;;  %v547_v15 = vld [vmem:[%s11705_s9 + $0x7f0] sm:$0xff]  ;;  %v485_v16 = vld [vmem:[%s11705_s9 + $0x600] sm:$0xff] }
  0x73   :  { %5529 = vmatpush3.msra.mxu1 %v500_v17  ;;  %5496 = vmatprep.subr.mxu0 %v481_v18  ;;  %v6896_v17 = vld [vmem:[%s11698_s2 + $0x34] ss:$72 sps:$4 sm:$0xff]   ;;  %v6894_v18 = vld [vmem:[%s11698_s2 + $0x30] ss:$72 sps:$4 sm:$0xff]  }
  0x74   :  { %5530 = vmatprep.subr.mxu1 %v515_v19  ;;  %5497 = vmatpush3.msra.mxu0 %v465_v20  ;;  %v531_v19 = vld [vmem:[%s11705_s9 + $0x770] sm:$0xff]  ;;  %v546_v20 = vld [vmem:[%s11705_s9 + $0x7e8] sm:$0xff] }
  0x75   :  { %5531 = vmatpush3.msra.mxu1 %v499_v21  ;;  %5498 = vmatprep.subr.mxu0 %v480_v22  ;;  %v530_v21 = vld [vmem:[%s11705_s9 + $0x768] sm:$0xff]  ;;  %v564_v22 = vld [vmem:[%s11705_s9 + $0x878] sm:$0xff] }
  0x76   :  { %5532 = vmatprep.subr.mxu1 %v514_v23  ;;  %5499 = vmatpush3.msra.mxu0 %v464_v24  ;;  %v545_v23 = vld [vmem:[%s11705_s9 + $0x7e0] sm:$0xff] }
  0x77   :  { %5533 = vmatpush3.msra.mxu1 %v498_v26  ;;  %5500 = vmatprep.subr.mxu0 %v479_v27  ;;  %v529_v24 = vld [vmem:[%s11705_s9 + $0x760] sm:$0xff]  ;;  %v563_v26 = vld [vmem:[%s11705_s9 + $0x870] sm:$0xff]  ;;  %v544_v27 = vld [vmem:[%s11705_s9 + $0x7d8] sm:$0xff] }
  0x78   :  { %5534 = vmatprep.subr.mxu1 %v513_v28  ;;  %5501 = vmatpush3.msra.mxu0 %v463_v29  ;;  %v528_v28 = vld [vmem:[%s11705_s9 + $0x758] sm:$0xff]  ;;  %v562_v29 = vld [vmem:[%s11705_s9 + $0x868] sm:$0xff] }
  0x79   :  { %5535 = vmatpush3.msra.mxu1 %v497_v30  ;;  %5502 = vmatprep.subr.mxu0 %v478_v31  ;;  %v543_v30 = vld [vmem:[%s11705_s9 + $0x7d0] sm:$0xff] }
  0x7a   :  { %5536 = vmatprep.subr.mxu1 %v512_v32  ;;  %5503 = vmatpush3.msra.mxu0 %v462_v33  ;;  %v527_v31 = vld [vmem:[%s11705_s9 + $0x750] sm:$0xff]  ;;  %v561_v32 = vld [vmem:[%s11705_s9 + $0x860] sm:$0xff]  ;;  %v542_v33 = vld [vmem:[%s11705_s9 + $0x7c8] sm:$0xff] }
  0x7b   :  { %5537 = vmatpush3.msra.mxu1 %v496_v34  ;;  %5504 = vmatprep.subr.mxu0 %v477_v35  ;;  %v526_v34 = vld [vmem:[%s11705_s9 + $0x748] sm:$0xff]  ;;  %v560_v35 = vld [vmem:[%s11705_s9 + $0x858] sm:$0xff] }
  0x7c   :  { %5538 = vmatprep.subr.mxu1 %v511_v36  ;;  %5505 = vmatpush3.msra.mxu0 %v461_v37  ;;  %v541_v36 = vld [vmem:[%s11705_s9 + $0x7c0] sm:$0xff] }
  0x7d   :  { %5539 = vmatpush3.msra.mxu1 %v495_v38  ;;  %5506 = vmatprep.subr.mxu0 %v476_v39  ;;  %v525_v37 = vld [vmem:[%s11705_s9 + $0x740] sm:$0xff]  ;;  %v559_v38 = vld [vmem:[%s11705_s9 + $0x850] sm:$0xff]  ;;  %v540_v39 = vld [vmem:[%s11705_s9 + $0x7b8] sm:$0xff] }
  0x7e   :  { %5540 = vmatprep.subr.mxu1 %v510_v40  ;;  %5507 = vmatpush3.msra.mxu0 %v460_v41  ;;  %v524_v40 = vld [vmem:[%s11705_s9 + $0x738] sm:$0xff]  ;;  %v558_v41 = vld [vmem:[%s11705_s9 + $0x848] sm:$0xff] }
  0x7f   :  { %5541 = vmatpush3.msra.mxu1 %v494_v42  ;;  %5508 = vmatprep.subr.mxu0 %v475_v43  ;;  %v539_v42 = vld [vmem:[%s11705_s9 + $0x7b0] sm:$0xff] }
  0x80   :  { %5542 = vmatprep.subr.mxu1 %v509_v44  ;;  %5509 = vmatpush3.msra.mxu0 %v459_v45  ;;  %v523_v43 = vld [vmem:[%s11705_s9 + $0x730] sm:$0xff]  ;;  %v557_v44 = vld [vmem:[%s11705_s9 + $0x840] sm:$0xff]  ;;  %v538_v45 = vld [vmem:[%s11705_s9 + $0x7a8] sm:$0xff] }
  0x81   :  { %5543 = vmatpush3.msra.mxu1 %v493_v46  ;;  %5510 = vmatprep.subr.mxu0 %v474_v47  ;;  %v522_v46 = vld [vmem:[%s11705_s9 + $0x728] sm:$0xff]  ;;  %v556_v47 = vld [vmem:[%s11705_s9 + $0x838] sm:$0xff] }
  0x82   :  { %5544 = vmatprep.subr.mxu1 %v508_v48  ;;  %5511 = vmatpush3.msra.mxu0 %v458_v49  ;;  %v537_v48 = vld [vmem:[%s11705_s9 + $0x7a0] sm:$0xff] }
  0x83   :  { %5545 = vmatpush3.msra.mxu1 %v492_v50  ;;  %5512 = vmatprep.subr.mxu0 %v473_v51  ;;  %v521_v49 = vld [vmem:[%s11705_s9 + $0x720] sm:$0xff]  ;;  %v555_v50 = vld [vmem:[%s11705_s9 + $0x830] sm:$0xff]  ;;  %v536_v51 = vld [vmem:[%s11705_s9 + $0x798] sm:$0xff] }
  0x84   :  { %5546 = vmatprep.subr.mxu1 %v507_v52  ;;  %5513 = vmatpush3.msra.mxu0 %v457_v53  ;;  %v520_v52 = vld [vmem:[%s11705_s9 + $0x718] sm:$0xff]  ;;  %v554_v53 = vld [vmem:[%s11705_s9 + $0x828] sm:$0xff] }
  0x85   :  { %5547 = vmatpush3.msra.mxu1 %v491_v54  ;;  %5514 = vmatprep.subr.mxu0 %v472_v55  ;;  %v535_v54 = vld [vmem:[%s11705_s9 + $0x790] sm:$0xff] }
  0x86   :  { %5548 = vmatprep.subr.mxu1 %v506_v56  ;;  %5515 = vmatpush3.msra.mxu0 %v456_v57  ;;  %v519_v55 = vld [vmem:[%s11705_s9 + $0x710] sm:$0xff]  ;;  %v553_v56 = vld [vmem:[%s11705_s9 + $0x820] sm:$0xff]  ;;  %v534_v57 = vld [vmem:[%s11705_s9 + $0x788] sm:$0xff] }
  0x87   :  { %5549 = vmatpush3.msra.mxu1 %v490_v58  ;;  %5516 = vmatprep.subr.mxu0 %v471_v59  ;;  %v518_v58 = vld [vmem:[%s11705_s9 + $0x708] sm:$0xff]  ;;  %v552_v59 = vld [vmem:[%s11705_s9 + $0x818] sm:$0xff] }
  0x88   :  { %5550 = vmatprep.subr.mxu1 %v505_v60  ;;  %5517 = vmatpush3.msra.mxu0 %v455_v61  ;;  %v533_v60 = vld [vmem:[%s11705_s9 + $0x780] sm:$0xff] }
  0x89   :  { %5551 = vmatpush3.msra.mxu1 %v489_v62  ;;  %5518 = vmatprep.subr.mxu0 %v470_v63  ;;  %v517_v61 = vld [vmem:[%s11705_s9 + $0x700] sm:$0xff] }
  0x8a   :  { %5552 = vmatprep.subr.mxu1 %v504_v0  ;;  %5519 = vmatpush3.msra.mxu0 %v454_v1  ;;  %v6899_v62 = vld [vmem:[%s11698_s2 + $0x3c] ss:$72 sps:$4 sm:$0xff]   ;;  %v6897_v63 = vld [vmem:[%s11698_s2 + $0x38] ss:$72 sps:$4 sm:$0xff]   ;;  %v551_v0 = vld [vmem:[%s11705_s9 + $0x810] sm:$0xff] }
  0x8b   :  { %5553 = vmatpush3.msra.mxu1 %v488_v3  ;;  %5520 = vmatprep.subr.mxu0 %v469_v4  ;;  %v1432_v1 = vld [vmem:[%s11706_s10 + $0xf8] sm:$0xff]  ;;  %v550_v3 = vld [vmem:[%s11705_s9 + $0x808] sm:$0xff] }
  0x8c   :  { %5554 = vmatprep.subr.mxu1 %v503_v5  ;;  %5521 = vmatpush3.msra.mxu0 %v453_v6  ;;  %v1416_v4 = vld [vmem:[%s11706_s10 + $0x78] sm:$0xff]  ;;  %v1431_v5 = vld [vmem:[%s11706_s10 + $0xf0] sm:$0xff]  ;;  %v549_v6 = vld [vmem:[%s11705_s9 + $0x800] sm:$0xff] }
  0x8d   :  { %1093 = vmatprep.mubr.bf16.mxu0 %v6893_v7  ;;  %5555 = vmatpush3.msra.mxu1 %v487_v9  ;;  %v1415_v7 = vld [vmem:[%s11706_s10 + $0x70] sm:$0xff]  ;;  %v566_v9 = vld [vmem:[%s11705_s9 + $0x888] sm:$0x3] }
  0x8e   :  { %1094 = vmatmul.mubr.bf16.vlgmr.msra.gmra.mxu0 %v6891_v8  ;;  %5556 = vmatprep.subr.mxu1 %v502_v10  ;;  %v1430_v8 = vld [vmem:[%s11706_s10 + $0xe8] sm:$0xff] }
  0x8f   :  { %5566 = vmatprep.subr.mxu0 %v548_v11  ;;  %5557 = vmatpush3.msra.mxu1 %v486_v12  ;;  %v1414_v10 = vld [vmem:[%s11706_s10 + $0x68] sm:$0xff]  ;;  %v1429_v11 = vld [vmem:[%s11706_s10 + $0xe0] sm:$0xff] }
  0x90   :  { %5567 = vmatpush3.msra.mxu0 %v532_v13  ;;  %5558 = vmatprep.subr.mxu1 %v501_v14  ;;  %v565_v12 = vld [vmem:[%s11705_s9 + $0x880] sm:$0xff] }
  0x91   :  { %5568 = vmatprep.subr.mxu0 %v547_v15  ;;  %5559 = vmatpush3.msra.mxu1 %v485_v16  ;;  %v6900_v13 = vld [vmem:[%s11698_s2 + $0x44] ss:$72 sps:$4 sm:$0xff]   ;;  %v6902_v15 = vld [vmem:[%s11698_s2 + $0x40] ss:$72 sps:$4 sm:$0xff]   ;;  %v1428_v16 = vld [vmem:[%s11706_s10 + $0xd8] sm:$0xff] }
  0x92   :  { %1166 = vmatprep.mubr.bf16.mxu1 %v6896_v17  ;;  %5569 = vmatpush3.msra.mxu0 %v531_v19  ;;  %v1413_v14 = vld [vmem:[%s11706_s10 + $0x60] sm:$0xff]  ;;  %v1464_v17 = vld [vmem:[%s11706_s10 + $0x1f8] sm:$0xff] }
  0x93   :  { %1167 = vmatmul.mubr.bf16.vlgmr.msra.gmra.mxu1 %v6894_v18  ;;  %5570 = vmatprep.subr.mxu0 %v546_v20  ;;  %v1412_v18 = vld [vmem:[%s11706_s10 + $0x58] sm:$0xff]  ;;  %v1427_v20 = vld [vmem:[%s11706_s10 + $0xd0] sm:$0xff] }
  0x94   :  { %1248 = vmatprep.subr.mxu1 %v7019_v2  ;;  %5571 = vmatpush3.msra.mxu0 %v530_v21  ;;  %v1448_v19 = vld [vmem:[%s11706_s10 + $0x178] sm:$0xff]  ;;  %v1463_v21 = vld [vmem:[%s11706_s10 + $0x1f0] sm:$0xff] }
  0x95   :  { %1249 = vmatpush1.msra.mxu1 %v564_v22  ;;  %5572 = vmatprep.subr.mxu0 %v545_v23  ;;  %v1411_v22 = vld [vmem:[%s11706_s10 + $0x50] sm:$0xff] }
  0x96   :  { %1250 = vmatprep.subr.mxu1 %v7019_v2  ;;  %5573 = vmatpush3.msra.mxu0 %v529_v24  ;;  %v1447_v23 = vld [vmem:[%s11706_s10 + $0x170] sm:$0xff]  ;;  %v1426_v24 = vld [vmem:[%s11706_s10 + $0xc8] sm:$0xff] }
  0x97   :  { %1251 = vmatpush1.msra.mxu1 %v563_v26  ;;  %5574 = vmatprep.subr.mxu0 %v544_v27  ;;  %v1462_v26 = vld [vmem:[%s11706_s10 + $0x1e8] sm:$0xff] }
  0x98   :  { %1252 = vmatprep.subr.mxu1 %v7019_v2  ;;  %5575 = vmatpush3.msra.mxu0 %v528_v28  ;;  %v1410_v27 = vld [vmem:[%s11706_s10 + $0x48] sm:$0xff] }
  0x99   :  { %1253 = vmatpush1.msra.mxu1 %v562_v29  ;;  %5576 = vmatprep.subr.mxu0 %v543_v30  ;;  %v1446_v28 = vld [vmem:[%s11706_s10 + $0x168] sm:$0xff]  ;;  %v1425_v29 = vld [vmem:[%s11706_s10 + $0xc0] sm:$0xff] }
  0x9a   :  { %1254 = vmatprep.subr.mxu1 %v7019_v2  ;;  %5577 = vmatpush3.msra.mxu0 %v527_v31  ;;  %v1461_v30 = vld [vmem:[%s11706_s10 + $0x1e0] sm:$0xff] }
  0x9b   :  { %1255 = vmatpush1.msra.mxu1 %v561_v32  ;;  %5578 = vmatprep.subr.mxu0 %v542_v33  ;;  %v1409_v31 = vld [vmem:[%s11706_s10 + $0x40] sm:$0xff]  ;;  %v1424_v33 = vld [vmem:[%s11706_s10 + $0xb8] sm:$0xff] }
  0x9c   :  { %1256 = vmatprep.subr.mxu1 %v7019_v2  ;;  %5579 = vmatpush3.msra.mxu0 %v526_v34  ;;  %v1445_v32 = vld [vmem:[%s11706_s10 + $0x160] sm:$0xff]  ;;  %v1460_v34 = vld [vmem:[%s11706_s10 + $0x1d8] sm:$0xff] }
  0x9d   :  { %1257 = vmatpush1.msra.mxu1 %v560_v35  ;;  %5580 = vmatprep.subr.mxu0 %v541_v36  ;;  %v1408_v35 = vld [vmem:[%s11706_s10 + $0x38] sm:$0xff] }
  0x9e   :  { %1258 = vmatprep.subr.mxu1 %v7019_v2  ;;  %5581 = vmatpush3.msra.mxu0 %v525_v37  ;;  %v1444_v36 = vld [vmem:[%s11706_s10 + $0x158] sm:$0xff]  ;;  %v1423_v37 = vld [vmem:[%s11706_s10 + $0xb0] sm:$0xff] }
  0x9f   :  { %1259 = vmatpush1.msra.mxu1 %v559_v38  ;;  %5582 = vmatprep.subr.mxu0 %v540_v39  ;;  %v1459_v38 = vld [vmem:[%s11706_s10 + $0x1d0] sm:$0xff] }
  0xa0   :  { %1260 = vmatprep.subr.mxu1 %v7019_v2  ;;  %5583 = vmatpush3.msra.mxu0 %v524_v40  ;;  %v1407_v39 = vld [vmem:[%s11706_s10 + $0x30] sm:$0xff] }
  0xa1   :  { %1261 = vmatpush1.msra.mxu1 %v558_v41  ;;  %5584 = vmatprep.subr.mxu0 %v539_v42  ;;  %v1443_v40 = vld [vmem:[%s11706_s10 + $0x150] sm:$0xff]  ;;  %v1422_v41 = vld [vmem:[%s11706_s10 + $0xa8] sm:$0xff] }
  0xa2   :  { %1262 = vmatprep.subr.mxu1 %v7019_v2  ;;  %5585 = vmatpush3.msra.mxu0 %v523_v43  ;;  %v1458_v42 = vld [vmem:[%s11706_s10 + $0x1c8] sm:$0xff] }
  0xa3   :  { %1263 = vmatpush1.msra.mxu1 %v557_v44  ;;  %5586 = vmatprep.subr.mxu0 %v538_v45  ;;  %v1406_v43 = vld [vmem:[%s11706_s10 + $0x28] sm:$0xff]  ;;  %v1421_v45 = vld [vmem:[%s11706_s10 + $0xa0] sm:$0xff] }
  0xa4   :  { %1264 = vmatprep.subr.mxu1 %v7019_v2  ;;  %5587 = vmatpush3.msra.mxu0 %v522_v46  ;;  %v1442_v44 = vld [vmem:[%s11706_s10 + $0x148] sm:$0xff]  ;;  %v1457_v46 = vld [vmem:[%s11706_s10 + $0x1c0] sm:$0xff] }
  0xa5   :  { %1265 = vmatpush1.msra.mxu1 %v556_v47  ;;  %5588 = vmatprep.subr.mxu0 %v537_v48  ;;  %v1405_v47 = vld [vmem:[%s11706_s10 + $0x20] sm:$0xff] }
  0xa6   :  { %1266 = vmatprep.subr.mxu1 %v7019_v2  ;;  %5589 = vmatpush3.msra.mxu0 %v521_v49  ;;  %v1441_v48 = vld [vmem:[%s11706_s10 + $0x140] sm:$0xff]  ;;  %v1420_v49 = vld [vmem:[%s11706_s10 + $0x98] sm:$0xff] }
  0xa7   :  { %1267 = vmatpush1.msra.mxu1 %v555_v50  ;;  %5590 = vmatprep.subr.mxu0 %v536_v51  ;;  %v1456_v50 = vld [vmem:[%s11706_s10 + $0x1b8] sm:$0xff] }
  0xa8   :  { %1268 = vmatprep.subr.mxu1 %v7019_v2  ;;  %5591 = vmatpush3.msra.mxu0 %v520_v52  ;;  %v1404_v51 = vld [vmem:[%s11706_s10 + $0x18] sm:$0xff] }
  0xa9   :  { %1269 = vmatpush1.msra.mxu1 %v554_v53  ;;  %5592 = vmatprep.subr.mxu0 %v535_v54  ;;  %v1440_v52 = vld [vmem:[%s11706_s10 + $0x138] sm:$0xff]  ;;  %v1419_v53 = vld [vmem:[%s11706_s10 + $0x90] sm:$0xff] }
  0xaa   :  { %1270 = vmatprep.subr.mxu1 %v7019_v2  ;;  %5593 = vmatpush3.msra.mxu0 %v519_v55  ;;  %v1455_v54 = vld [vmem:[%s11706_s10 + $0x1b0] sm:$0xff] }
  0xab   :  { %1271 = vmatpush1.msra.mxu1 %v553_v56  ;;  %5594 = vmatprep.subr.mxu0 %v534_v57  ;;  %v1403_v55 = vld [vmem:[%s11706_s10 + $0x10] sm:$0xff]  ;;  %v1418_v57 = vld [vmem:[%s11706_s10 + $0x88] sm:$0xff] }
  0xac   :  { %1272 = vmatprep.subr.mxu1 %v7019_v2  ;;  %5595 = vmatpush3.msra.mxu0 %v518_v58  ;;  %v1439_v56 = vld [vmem:[%s11706_s10 + $0x130] sm:$0xff]  ;;  %v1454_v58 = vld [vmem:[%s11706_s10 + $0x1a8] sm:$0xff] }
  0xad   :  { %1273 = vmatpush1.msra.mxu1 %v552_v59  ;;  %5596 = vmatprep.subr.mxu0 %v533_v60  ;;  %v1402_v59 = vld [vmem:[%s11706_s10 + $0x8] sm:$0xff] }
  0xae   :  { %1274 = vmatprep.subr.mxu1 %v7019_v2  ;;  %5597 = vmatpush3.msra.mxu0 %v517_v61  ;;  %v1438_v60 = vld [vmem:[%s11706_s10 + $0x128] sm:$0xff] }
  0xaf   :  { %1239 = vmatprep.mubr.bf16.mxu0 %v6899_v62  ;;  %1275 = vmatpush1.msra.mxu1 %v551_v0  ;;  %v1417_v62 = vld [vmem:[%s11706_s10 + $0x80] sm:$0xff] }
  0xb0   :  { %1240 = vmatmul.mubr.bf16.vlgmr.msra.gmra.mxu0 %v6897_v63  ;;  %1276 = vmatprep.subr.mxu1 %v7019_v2  ;;  %v1453_v63 = vld [vmem:[%s11706_s10 + $0x1a0] sm:$0xff] }
  0xb1   :  { %5604 = vmatprep.subr.mxu0 %v1432_v1  ;;  %1277 = vmatpush1.msra.mxu1 %v550_v3  ;;  %v1401_v0 = vld [vmem:[%s11706_s10] sm:$0xff] }
  0xb2   :  { %5605 = vmatpush3.msra.mxu0 %v1416_v4  ;;  %1278 = vmatprep.subr.mxu1 %v7019_v2  ;;  %v6905_v1 = vld [vmem:[%s11699_s3 + $0x4] ss:$252 sps:$4 sm:$0xff]  }
  0xb3   :  { %5606 = vmatprep.subr.mxu0 %v1431_v5  ;;  %1279 = vmatpush1.msra.mxu1 %v549_v6  ;;  %v6903_v4 = vld [vmem:[%s11699_s3] ss:$252 sps:$4 sm:$0xff]  }
  0xb4   :  { %5607 = vmatpush3.msra.mxu0 %v1415_v7  ;;  %1308 = vmatprep.subr.mxu1 %v7019_v2  ;;  %v1437_v5 = vld [vmem:[%s11706_s10 + $0x120] sm:$0xff]  ;;  %v1452_v6 = vld [vmem:[%s11706_s10 + $0x198] sm:$0xff] }
  0xb5   :  { %5608 = vmatprep.subr.mxu0 %v1430_v8  ;;  %5225 = vmatpush2.msk.msra.mxu1 %vm660_vm4, %v566_v9  ;;  %v1496_v8 = vld [vmem:[%s11706_s10 + $0x2f8] sm:$0xff] }
  0xb6   :  { %5609 = vmatpush3.msra.mxu0 %v1414_v10  ;;  %1310 = vmatprep.subr.mxu1 %v7019_v2  ;;  %v1436_v9 = vld [vmem:[%s11706_s10 + $0x118] sm:$0xff] }
  0xb7   :  { %5610 = vmatprep.subr.mxu0 %v1429_v11  ;;  %1311 = vmatpush2.msra.mxu1 %v565_v12  ;;  %v1480_v10 = vld [vmem:[%s11706_s10 + $0x278] sm:$0xff]  ;;  %v1451_v11 = vld [vmem:[%s11706_s10 + $0x190] sm:$0xff] }
  0xb8   :  { %5226 = vmatprep.mubr.msk.bf16.mxu1 %vm656_vm5, %v6900_v13  ;;  %5611 = vmatpush3.msra.mxu0 %v1413_v14  ;;  %v1495_v13 = vld [vmem:[%s11706_s10 + $0x2f0] sm:$0xff] }
  0xb9   :  { %1313 = vmatmul.mubr.bf16.vlgmr.msra.gmra.mxu1 %v6902_v15  ;;  %5612 = vmatprep.subr.mxu0 %v1428_v16  ;;  %v1435_v14 = vld [vmem:[%s11706_s10 + $0x110] sm:$0xff]  ;;  %v1450_v16 = vld [vmem:[%s11706_s10 + $0x188] sm:$0xff] }
  0xba   :  { %5642 = vmatprep.subr.mxu1 %v1464_v17  ;;  %5613 = vmatpush3.msra.mxu0 %v1412_v18  ;;  %v1479_v15 = vld [vmem:[%s11706_s10 + $0x270] sm:$0xff]  ;;  %v1494_v17 = vld [vmem:[%s11706_s10 + $0x2e8] sm:$0xff] }
  0xbb   :  { %5643 = vmatpush3.msra.mxu1 %v1448_v19  ;;  %5614 = vmatprep.subr.mxu0 %v1427_v20  ;;  %v1434_v18 = vld [vmem:[%s11706_s10 + $0x108] sm:$0xff]  ;;  %v1449_v20 = vld [vmem:[%s11706_s10 + $0x180] sm:$0xff] }
  0xbc   :  { %5644 = vmatprep.subr.mxu1 %v1463_v21  ;;  %5615 = vmatpush3.msra.mxu0 %v1411_v22  ;;  %v1478_v19 = vld [vmem:[%s11706_s10 + $0x268] sm:$0xff]  ;;  %v1493_v21 = vld [vmem:[%s11706_s10 + $0x2e0] sm:$0xff] }
  0xbd   :  { %5645 = vmatpush3.msra.mxu1 %v1447_v23  ;;  %5616 = vmatprep.subr.mxu0 %v1426_v24  ;;  %v1433_v22 = vld [vmem:[%s11706_s10 + $0x100] sm:$0xff]  ;;  %v6908_v23 = vld [vmem:[%s11699_s3 + $0xc] ss:$252 sps:$4 sm:$0xff]  }
  0xbe   :  { %5646 = vmatprep.subr.mxu1 %v1462_v26  ;;  %5617 = vmatpush3.msra.mxu0 %v1410_v27  ;;  %v6906_v24 = vld [vmem:[%s11699_s3 + $0x8] ss:$252 sps:$4 sm:$0xff]   ;;  %v1492_v27 = vld [vmem:[%s11706_s10 + $0x2d8] sm:$0xff] }
  0xbf   :  { %5647 = vmatpush3.msra.mxu1 %v1446_v28  ;;  %5618 = vmatprep.subr.mxu0 %v1425_v29  ;;  %v1477_v26 = vld [vmem:[%s11706_s10 + $0x260] sm:$0xff]  ;;  %v1528_v28 = vld [vmem:[%s11706_s10 + $0x3f8] sm:$0xff] }
  0xc0   :  { %5648 = vmatprep.subr.mxu1 %v1461_v30  ;;  %5619 = vmatpush3.msra.mxu0 %v1409_v31  ;;  %v1476_v29 = vld [vmem:[%s11706_s10 + $0x258] sm:$0xff]  ;;  %v1491_v31 = vld [vmem:[%s11706_s10 + $0x2d0] sm:$0xff] }
  0xc1   :  { %5649 = vmatpush3.msra.mxu1 %v1445_v32  ;;  %5620 = vmatprep.subr.mxu0 %v1424_v33  ;;  %v1512_v30 = vld [vmem:[%s11706_s10 + $0x378] sm:$0xff]  ;;  %v1527_v32 = vld [vmem:[%s11706_s10 + $0x3f0] sm:$0xff] }
  0xc2   :  { %5650 = vmatprep.subr.mxu1 %v1460_v34  ;;  %5621 = vmatpush3.msra.mxu0 %v1408_v35  ;;  %v1475_v33 = vld [vmem:[%s11706_s10 + $0x250] sm:$0xff]  ;;  %v1490_v35 = vld [vmem:[%s11706_s10 + $0x2c8] sm:$0xff] }
  0xc3   :  { %5651 = vmatpush3.msra.mxu1 %v1444_v36  ;;  %5622 = vmatprep.subr.mxu0 %v1423_v37  ;;  %v1511_v34 = vld [vmem:[%s11706_s10 + $0x370] sm:$0xff]  ;;  %v1526_v36 = vld [vmem:[%s11706_s10 + $0x3e8] sm:$0xff] }
  0xc4   :  { %5652 = vmatprep.subr.mxu1 %v1459_v38  ;;  %5623 = vmatpush3.msra.mxu0 %v1407_v39  ;;  %v1474_v37 = vld [vmem:[%s11706_s10 + $0x248] sm:$0xff]  ;;  %v1489_v39 = vld [vmem:[%s11706_s10 + $0x2c0] sm:$0xff] }
  0xc5   :  { %5653 = vmatpush3.msra.mxu1 %v1443_v40  ;;  %5624 = vmatprep.subr.mxu0 %v1422_v41  ;;  %v1510_v38 = vld [vmem:[%s11706_s10 + $0x368] sm:$0xff]  ;;  %v1525_v40 = vld [vmem:[%s11706_s10 + $0x3e0] sm:$0xff] }
  0xc6   :  { %5654 = vmatprep.subr.mxu1 %v1458_v42  ;;  %5625 = vmatpush3.msra.mxu0 %v1406_v43  ;;  %v1473_v41 = vld [vmem:[%s11706_s10 + $0x240] sm:$0xff]  ;;  %v1488_v43 = vld [vmem:[%s11706_s10 + $0x2b8] sm:$0xff] }
  0xc7   :  { %5655 = vmatpush3.msra.mxu1 %v1442_v44  ;;  %5626 = vmatprep.subr.mxu0 %v1421_v45  ;;  %v1509_v42 = vld [vmem:[%s11706_s10 + $0x360] sm:$0xff]  ;;  %v1524_v44 = vld [vmem:[%s11706_s10 + $0x3d8] sm:$0xff] }
  0xc8   :  { %5656 = vmatprep.subr.mxu1 %v1457_v46  ;;  %5627 = vmatpush3.msra.mxu0 %v1405_v47  ;;  %v1472_v45 = vld [vmem:[%s11706_s10 + $0x238] sm:$0xff] }
  0xc9   :  { %5657 = vmatpush3.msra.mxu1 %v1441_v48  ;;  %5628 = vmatprep.subr.mxu0 %v1420_v49  ;;  %v1508_v47 = vld [vmem:[%s11706_s10 + $0x358] sm:$0xff]  ;;  %v1487_v48 = vld [vmem:[%s11706_s10 + $0x2b0] sm:$0xff] }
  0xca   :  { %5658 = vmatprep.subr.mxu1 %v1456_v50  ;;  %5629 = vmatpush3.msra.mxu0 %v1404_v51  ;;  %v1523_v49 = vld [vmem:[%s11706_s10 + $0x3d0] sm:$0xff] }
  0xcb   :  { %5659 = vmatpush3.msra.mxu1 %v1440_v52  ;;  %5630 = vmatprep.subr.mxu0 %v1419_v53  ;;  %v8258_v61 = vpop.f32.mrf.mxu1  ;;  %v1471_v50 = vld [vmem:[%s11706_s10 + $0x230] sm:$0xff]  ;;  %v1486_v52 = vld [vmem:[%s11706_s10 + $0x2a8] sm:$0xff] }
  0xcc   :  { %5660 = vmatprep.subr.mxu1 %v1455_v54  ;;  %5631 = vmatpush3.msra.mxu0 %v1403_v55  ;;  %v1507_v51 = vld [vmem:[%s11706_s10 + $0x350] sm:$0xff]  ;;  %v1522_v53 = vld [vmem:[%s11706_s10 + $0x3c8] sm:$0xff]  ;;  %v5203_v54 = vld [vmem:[%s11707_s11] ss:$0 sm:$0xff] }
  0xcd   :  { %5661 = vmatpush3.msra.mxu1 %v1439_v56  ;;  %5632 = vmatprep.subr.mxu0 %v1418_v57  ;;  %v6815_v3 = vpop.f32.mrf.mxu1  ;;  %v1470_v55 = vld [vmem:[%s11706_s10 + $0x228] sm:$0xff]  ;;  %v1485_v57 = vld [vmem:[%s11706_s10 + $0x2a0] sm:$0xff] }
  0xce   :  { %5662 = vmatprep.subr.mxu1 %v1454_v58  ;;  %5633 = vmatpush3.msra.mxu0 %v1402_v59  ;;  %v1506_v56 = vld [vmem:[%s11706_s10 + $0x348] sm:$0xff] }
  0xcf   :  { %5663 = vmatpush3.msra.mxu1 %v1438_v60  ;;  %5634 = vmatprep.subr.mxu0 %v1417_v62  ;;  %v8281_v7 = vpop.f32.mrf.mxu1  ;;  %v1521_v60 = vld [vmem:[%s11706_s10 + $0x3c0] sm:$0xff] }
  0xd0   :  { %5664 = vmatprep.subr.mxu1 %v1453_v63  ;;  %5635 = vmatpush3.msra.mxu0 %v1401_v0  ;;  %v1469_v62 = vld [vmem:[%s11706_s10 + $0x220] sm:$0xff] }
  0xd1   :  { %2792 = vmatprep.mubr.bf16.mxu0 %v6905_v1  ;;  %5665 = vmatpush3.msra.mxu1 %v1437_v5  ;;  %v6816_v12 = vpop.f32.mrf.mxu1  ;;  %v264_v46 = vpop.permute.xlu0 %263  ;;  %v1505_v1 = vld [vmem:[%s11706_s10 + $0x340] sm:$0xff]  ;;  %v1468_v5 = vld [vmem:[%s11706_s10 + $0x218] sm:$0xff] }
  0xd2   :  { %2793 = vmatmul.mubr.bf16.vlgmr.msra.gmra.mxu0 %v6903_v4  ;;  %5666 = vmatprep.subr.mxu1 %v1452_v6  ;;  %v271_v59 = vmul.f32 %v264_v46, %v8258_v61  ;;  %v1484_v61 = vld [vmem:[%s11706_s10 + $0x298] sm:$0xff]  ;;  %v1519_v12 = vld [vmem:[%s11706_s10 + $0x3b0] sm:$0xff]  ;;  %v1513_v46 = vld [vmem:[%s11706_s10 + $0x380] sm:$0xff] }
  0xd3   :  { %5680 = vmatprep.subr.mxu0 %v1496_v8  ;;  %5667 = vmatpush3.msra.mxu1 %v1436_v9  ;;  %v1520_v4 = vld [vmem:[%s11706_s10 + $0x3b8] sm:$0xff]  ;;  %v1483_v9 = vld [vmem:[%s11706_s10 + $0x290] sm:$0xff] }
  0xd4   :  { %5681 = vmatpush3.msra.mxu0 %v1480_v10  ;;  %5668 = vmatprep.subr.mxu1 %v1451_v11  ;;  %v1504_v8 = vld [vmem:[%s11706_s10 + $0x338] sm:$0xff] }
  0xd5   :  { %5682 = vmatprep.subr.mxu0 %v1495_v13  ;;  %5669 = vmatpush3.msra.mxu1 %v1435_v14  ;;  %v1467_v13 = vld [vmem:[%s11706_s10 + $0x210] sm:$0xff] }
  0xd6   :  { %5683 = vmatpush3.msra.mxu0 %v1479_v15  ;;  %5670 = vmatprep.subr.mxu1 %v1450_v16  ;;  %v269_v0 = vpop.permute.xlu0 %268  ;;  %v1503_v15 = vld [vmem:[%s11706_s10 + $0x330] sm:$0xff] }
  0xd7   :  { %5684 = vmatprep.subr.mxu0 %v1494_v17  ;;  %5671 = vmatpush3.msra.mxu1 %v1434_v18  ;;  %v272_v11 = vmul.f32 %v269_v0, %v8281_v7  ;;  %v1482_v7 = vld [vmem:[%s11706_s10 + $0x288] sm:$0xff] }
  0xd8   :  { %5685 = vmatpush3.msra.mxu0 %v1478_v19  ;;  %5672 = vmatprep.subr.mxu1 %v1449_v20  ;;  %v1518_v18 = vld [vmem:[%s11706_s10 + $0x3a8] sm:$0xff] }
  0xd9   :  { %5686 = vmatprep.subr.mxu0 %v1493_v21  ;;  %5673 = vmatpush3.msra.mxu1 %v1433_v22  ;;  %v1466_v19 = vld [vmem:[%s11706_s10 + $0x208] sm:$0xff]  ;;  %v1481_v22 = vld [vmem:[%s11706_s10 + $0x280] sm:$0xff] }
  0xda   :  { %2865 = vmatprep.mubr.bf16.mxu1 %v6908_v23  ;;  %5687 = vmatpush3.msra.mxu0 %v1477_v26  ;;  %v1502_v21 = vld [vmem:[%s11706_s10 + $0x328] sm:$0xff]  ;;  %v1465_v26 = vld [vmem:[%s11706_s10 + $0x200] sm:$0xff] }
  0xdb   :  { %2866 = vmatmul.mubr.bf16.vlgmr.msra.gmra.mxu1 %v6906_v24  ;;  %5688 = vmatprep.subr.mxu0 %v1492_v27  ;;  %v1517_v24 = vld [vmem:[%s11706_s10 + $0x3a0] sm:$0xff]  ;;  %v6911_v27 = vld [vmem:[%s11699_s3 + $0x14] ss:$252 sps:$4 sm:$0xff]   ;;  %v1574_v0 = vld [vmem:[%s11706_s10 + $0x568] sm:$0xff] }
  0xdc   :  { %5718 = vmatprep.subr.mxu1 %v1528_v28  ;;  %5689 = vmatpush3.msra.mxu0 %v1476_v29  ;;  %v6909_v29 = vld [vmem:[%s11699_s3 + $0x10] ss:$252 sps:$4 sm:$0xff]  }
  0xdd   :  { %5719 = vmatpush3.msra.mxu1 %v1512_v30  ;;  %5690 = vmatprep.subr.mxu0 %v1491_v31  ;;  %v1501_v30 = vld [vmem:[%s11706_s10 + $0x320] sm:$0xff] }
  0xde   :  { %5720 = vmatprep.subr.mxu1 %v1527_v32  ;;  %5691 = vmatpush3.msra.mxu0 %v1475_v33  ;;  %v1516_v32 = vld [vmem:[%s11706_s10 + $0x398] sm:$0xff] }
  0xdf   :  { %5721 = vmatpush3.msra.mxu1 %v1511_v34  ;;  %5692 = vmatprep.subr.mxu0 %v1490_v35  ;;  %v1560_v33 = vld [vmem:[%s11706_s10 + $0x4f8] sm:$0xff] }
  0xe0   :  { %5722 = vmatprep.subr.mxu1 %v1526_v36  ;;  %5693 = vmatpush3.msra.mxu0 %v1474_v37  ;;  %v1500_v34 = vld [vmem:[%s11706_s10 + $0x318] sm:$0xff]  ;;  %v1515_v37 = vld [vmem:[%s11706_s10 + $0x390] sm:$0xff] }
  0xe1   :  { %5723 = vmatpush3.msra.mxu1 %v1510_v38  ;;  %5694 = vmatprep.subr.mxu0 %v1489_v39  ;;  %v1544_v36 = vld [vmem:[%s11706_s10 + $0x478] sm:$0xff]  ;;  %v1559_v39 = vld [vmem:[%s11706_s10 + $0x4f0] sm:$0xff] }
  0xe2   :  { %5724 = vmatprep.subr.mxu1 %v1525_v40  ;;  %5695 = vmatpush3.msra.mxu0 %v1473_v41  ;;  %v1499_v40 = vld [vmem:[%s11706_s10 + $0x310] sm:$0xff] }
  0xe3   :  { %5725 = vmatpush3.msra.mxu1 %v1509_v42  ;;  %5696 = vmatprep.subr.mxu0 %v1488_v43  ;;  %v1543_v41 = vld [vmem:[%s11706_s10 + $0x470] sm:$0xff]  ;;  %v1514_v42 = vld [vmem:[%s11706_s10 + $0x388] sm:$0xff] }
  0xe4   :  { %5726 = vmatprep.subr.mxu1 %v1524_v44  ;;  %5697 = vmatpush3.msra.mxu0 %v1472_v45  ;;  %v1558_v43 = vld [vmem:[%s11706_s10 + $0x4e8] sm:$0xff] }
  0xe5   :  { %5727 = vmatpush3.msra.mxu1 %v1508_v47  ;;  %5698 = vmatprep.subr.mxu0 %v1487_v48  ;;  %v1498_v44 = vld [vmem:[%s11706_s10 + $0x308] sm:$0xff]  ;;  %v1557_v47 = vld [vmem:[%s11706_s10 + $0x4e0] sm:$0xff] }
  0xe6   :  { %5728 = vmatprep.subr.mxu1 %v1523_v49  ;;  %5699 = vmatpush3.msra.mxu0 %v1471_v50  ;;  %v153_v58 = vpop.f32.mrf.mxu0  ;;  %v1542_v45 = vld [vmem:[%s11706_s10 + $0x468] sm:$0xff]  ;;  %v1497_v48 = vld [vmem:[%s11706_s10 + $0x300] sm:$0xff]  ;;  %v6914_v49 = vld [vmem:[%s11699_s3 + $0x1c] ss:$252 sps:$4 sm:$0xff]  }
  0xe7   :  { %5729 = vmatpush3.msra.mxu1 %v1507_v51  ;;  %5700 = vmatprep.subr.mxu0 %v1486_v52  ;;  %v166_v63 = vadd.f32 %v5203_v54, %v153_v58  ;;  %v6912_v50 = vld [vmem:[%s11699_s3 + $0x18] ss:$252 sps:$4 sm:$0xff]   ;;  %v1541_v51 = vld [vmem:[%s11706_s10 + $0x460] sm:$0xff] }
  0xe8   :  { %5730 = vmatprep.subr.mxu1 %v1522_v53  ;;  %5701 = vmatpush3.msra.mxu0 %v1470_v55  ;;  %v155_v3 = vpop.f32.mrf.mxu0  ;;  %v1556_v52 = vld [vmem:[%s11706_s10 + $0x4d8] sm:$0xff]  ;;  %v1539_v58 = vld [vmem:[%s11706_s10 + $0x450] sm:$0xff] }
  0xe9   :  { %5731 = vmatpush3.msra.mxu1 %v1506_v56  ;;  %5702 = vmatprep.subr.mxu0 %v1485_v57  ;;  %v8443_v6 = vadd.f32 %v271_v59, %v166_v63  ;;  %v1592_v53 = vld [vmem:[%s11706_s10 + $0x5f8] sm:$0xff]  ;;  %v1555_v56 = vld [vmem:[%s11706_s10 + $0x4d0] sm:$0xff]  ;;  %v1538_v63 = vld [vmem:[%s11706_s10 + $0x448] sm:$0xff] }
  0xea   :  { %5732 = vmatprep.subr.mxu1 %v1521_v60  ;;  %5703 = vmatpush3.msra.mxu0 %v1469_v62  ;;  %v156_v10 = vpop.f32.mrf.mxu0  ;;  %v1576_v55 = vld [vmem:[%s11706_s10 + $0x578] sm:$0xff]  ;;  %v1591_v57 = vld [vmem:[%s11706_s10 + $0x5f0] sm:$0xff]  ;;  %v1554_v60 = vld [vmem:[%s11706_s10 + $0x4c8] sm:$0xff] }
  0xeb   :  { %5733 = vmatpush3.msra.mxu1 %v1505_v1  ;;  %5704 = vmatprep.subr.mxu0 %v1484_v61  ;;  %v167_v14 = vadd.f32 %v5203_v54, %v156_v10  ;;  %v1540_v54 = vld [vmem:[%s11706_s10 + $0x458] sm:$0xff]  ;;  %v1575_v59 = vld [vmem:[%s11706_s10 + $0x570] sm:$0xff]  ;;  %v1590_v62 = vld [vmem:[%s11706_s10 + $0x5e8] sm:$0xff] }
  0xec   :  { %5734 = vmatprep.subr.mxu1 %v1520_v4  ;;  %5705 = vmatpush3.msra.mxu0 %v1468_v5  ;;  %v5332_v16 = vpop.f32.mrf.mxu1  ;;  %v158_v17 = vpop.f32.mrf.mxu0  ;;  %v1553_v1 = vld [vmem:[%s11706_s10 + $0x4c0] sm:$0xff]  ;;  %v1536_v10 = vld [vmem:[%s11706_s10 + $0x438] sm:$0xff] }
  0xed   :  { %5735 = vmatpush3.msra.mxu1 %v1504_v8  ;;  %5706 = vmatprep.subr.mxu0 %v1483_v9  ;;  %v8470_v20 = vadd.f32 %v272_v11, %v167_v14  ;;  %v1589_v61 = vld [vmem:[%s11706_s10 + $0x5e0] sm:$0xff]  ;;  %v1552_v8 = vld [vmem:[%s11706_s10 + $0x4b8] sm:$0xff]  ;;  %v1535_v14 = vld [vmem:[%s11706_s10 + $0x430] sm:$0xff] }
  0xee   :  { %5736 = vmatprep.subr.mxu1 %v1519_v12  ;;  %5707 = vmatpush3.msra.mxu0 %v1467_v13  ;;  %v5333_v23 = vpop.f32.mrf.mxu1  ;;  %v1321_v3 = vld [vmem:[%s11701_s5] sm:$0xff]  ;;  %v1588_v9 = vld [vmem:[%s11706_s10 + $0x5d8] sm:$0xff]  ;;  %v1587_v12 = vld [vmem:[%s11706_s10 + $0x5d0] sm:$0xff] }
  0xef   :  { %5737 = vmatpush3.msra.mxu1 %v1503_v15  ;;  %5708 = vmatprep.subr.mxu0 %v1482_v7  ;;  %v8487_v28 = vadd.f32 %v5333_v23, %v5332_v16  ;;  %v1537_v4 = vld [vmem:[%s11706_s10 + $0x440] sm:$0xff]  ;;  %v1572_v11 = vld [vmem:[%s11706_s10 + $0x558] sm:$0xff]  ;;  %v1322_v13 = vld [vmem:[%s11701_s5 + $0x8] sm:$0xff] }
  0xf0   :  { %5738 = vmatprep.subr.mxu1 %v1518_v18  ;;  %5709 = vmatpush3.msra.mxu0 %v1466_v19  ;;  %v5335_v31 = vpop.f32.mrf.mxu1  ;;  %v1573_v5 = vld [vmem:[%s11706_s10 + $0x560] sm:$0xff]  ;;  %v1571_v15 = vld [vmem:[%s11706_s10 + $0x550] sm:$0xff]  ;;  %v1550_v7 = vld [vmem:[%s11706_s10 + $0x4a8] sm:$0xff] }
  0xf1   :  { %5739 = vmatpush3.msra.mxu1 %v1502_v21  ;;  %5710 = vmatprep.subr.mxu0 %v1481_v22  ;;  %v1586_v16 = vld [vmem:[%s11706_s10 + $0x5c8] sm:$0xff]  ;;  %v1549_v21 = vld [vmem:[%s11706_s10 + $0x4a0] sm:$0xff] }
  0xf2   :  { %5740 = vmatprep.subr.mxu1 %v1517_v24  ;;  %5711 = vmatpush3.msra.mxu0 %v1465_v26  ;;  %v5336_v35 = vpop.f32.mrf.mxu1  ;;  %v1534_v17 = vld [vmem:[%s11706_s10 + $0x428] sm:$0xff]  ;;  %v1585_v22 = vld [vmem:[%s11706_s10 + $0x5c0] sm:$0xff] }
  0xf3   :  { %2938 = vmatprep.mubr.bf16.mxu0 %v6911_v27  ;;  %5741 = vmatpush3.msra.mxu1 %v1501_v30  ;;  %v8510_v38 = vadd.f32 %v5336_v35, %v5335_v31  ;;  %v1570_v19 = vld [vmem:[%s11706_s10 + $0x548] sm:$0xff]  ;;  %v1533_v23 = vld [vmem:[%s11706_s10 + $0x420] sm:$0xff]  ;;  %v1548_v27 = vld [vmem:[%s11706_s10 + $0x498] sm:$0xff] }
  0xf4   :  { %2939 = vmatmul.mubr.bf16.vlgmr.msra.gmra.mxu0 %v6909_v29  ;;  %5742 = vmatprep.subr.mxu1 %v1516_v32  ;;  %v1569_v26 = vld [vmem:[%s11706_s10 + $0x540] sm:$0xff]  ;;  %v1584_v30 = vld [vmem:[%s11706_s10 + $0x5b8] sm:$0xff] }
  0xf5   :  { %5756 = vmatprep.subr.mxu0 %v1560_v33  ;;  %5743 = vmatpush3.msra.mxu1 %v1500_v34  ;;  %v1532_v31 = vld [vmem:[%s11706_s10 + $0x418] sm:$0xff]  ;;  %v1547_v34 = vld [vmem:[%s11706_s10 + $0x490] sm:$0xff] }
  0xf6   :  { %5757 = vmatpush3.msra.mxu0 %v1544_v36  ;;  %5744 = vmatprep.subr.mxu1 %v1515_v37  ;;  %v1568_v33 = vld [vmem:[%s11706_s10 + $0x538] sm:$0xff]  ;;  %v1583_v37 = vld [vmem:[%s11706_s10 + $0x5b0] sm:$0xff] }
  0xf7   :  { %5758 = vmatprep.subr.mxu0 %v1559_v39  ;;  %5745 = vmatpush3.msra.mxu1 %v1499_v40  ;;  %v1531_v39 = vld [vmem:[%s11706_s10 + $0x410] sm:$0xff] }
  0xf8   :  { %5759 = vmatpush3.msra.mxu0 %v1543_v41  ;;  %5746 = vmatprep.subr.mxu1 %v1514_v42  ;;  %v1567_v41 = vld [vmem:[%s11706_s10 + $0x530] sm:$0xff] }
  0xf9   :  { %5760 = vmatprep.subr.mxu0 %v1558_v43  ;;  %5747 = vmatpush3.msra.mxu1 %v1498_v44  ;;  %v1582_v44 = vld [vmem:[%s11706_s10 + $0x5a8] sm:$0xff] }
  0xfa   :  { %5761 = vmatpush3.msra.mxu0 %v1542_v45  ;;  %5748 = vmatprep.subr.mxu1 %v1513_v46  ;;  %v1530_v45 = vld [vmem:[%s11706_s10 + $0x408] sm:$0xff] }
  0xfb   :  { %5762 = vmatprep.subr.mxu0 %v1557_v47  ;;  %5749 = vmatpush3.msra.mxu1 %v1497_v48  ;;  %v1566_v47 = vld [vmem:[%s11706_s10 + $0x528] sm:$0xff]  ;;  %v1545_v48 = vld [vmem:[%s11706_s10 + $0x480] sm:$0xff] }
  0xfc   :  { %3011 = vmatprep.mubr.bf16.mxu1 %v6914_v49  ;;  %5763 = vmatpush3.msra.mxu0 %v1541_v51  ;;  %v1581_v51 = vld [vmem:[%s11706_s10 + $0x5a0] sm:$0xff] }
  0xfd   :  { %3012 = vmatmul.mubr.bf16.vlgmr.msra.gmra.mxu1 %v6912_v50  ;;  %5764 = vmatprep.subr.mxu0 %v1556_v52  ;;  %v6917_v52 = vld [vmem:[%s11699_s3 + $0x24] ss:$252 sps:$4 sm:$0xff]  }
  0xfe   :  { %5794 = vmatprep.subr.mxu1 %v1592_v53  ;;  %5765 = vmatpush3.msra.mxu0 %v1540_v54  ;;  %v1529_v54 = vld [vmem:[%s11706_s10 + $0x400] sm:$0xff] }
  0xff   :  { %5795 = vmatpush3.msra.mxu1 %v1576_v55  ;;  %5766 = vmatprep.subr.mxu0 %v1555_v56  ;;  %v1565_v56 = vld [vmem:[%s11706_s10 + $0x520] sm:$0xff] }
 0x100   :  { %5796 = vmatprep.subr.mxu1 %v1591_v57  ;;  %5767 = vmatpush3.msra.mxu0 %v1539_v58  ;;  %v1580_v57 = vld [vmem:[%s11706_s10 + $0x598] sm:$0xff] }
 0x101   :  { %5797 = vmatpush3.msra.mxu1 %v1575_v59  ;;  %5768 = vmatprep.subr.mxu0 %v1554_v60  ;;  %v1624_v59 = vld [vmem:[%s11706_s10 + $0x6f8] sm:$0xff] }
 0x102   :  { %5798 = vmatprep.subr.mxu1 %v1590_v62  ;;  %5769 = vmatpush3.msra.mxu0 %v1538_v63  ;;  %v1564_v60 = vld [vmem:[%s11706_s10 + $0x518] sm:$0xff]  ;;  %v1579_v63 = vld [vmem:[%s11706_s10 + $0x590] sm:$0xff] }
 0x103   :  { %5799 = vmatpush3.msra.mxu1 %v1574_v0  ;;  %6871 = vset.pattern.permute.xlu1 %v7021_v25  ;;  %v1551_v25 = vld [vmem:[%s11706_s10 + $0x4b0] sm:$0xff]  ;;  %v1608_v62 = vld [vmem:[%s11706_s10 + $0x678] sm:$0xff] }
 0x104   :  { %5770 = vmatprep.subr.mxu0 %v1553_v1  ;;  %5800 = vmatprep.subr.mxu1 %v1589_v61  ;;  %v1623_v1 = vld [vmem:[%s11706_s10 + $0x6f0] sm:$0xff] }
 0x105   :  { %1325 = vperm.xlu1 %6871, %v1321_v3   ;;  %5771 = vmatpush3.msra.mxu0 %v1537_v4  ;;  %v1563_v61 = vld [vmem:[%s11706_s10 + $0x510] sm:$0xff]  ;;  %v1578_v4 = vld [vmem:[%s11706_s10 + $0x588] sm:$0xff] }
 0x106   :  { %5801 = vmatpush3.msra.mxu1 %v1573_v5  ;;  %5772 = vmatprep.subr.mxu0 %v1552_v8  ;;  %v1607_v3 = vld [vmem:[%s11706_s10 + $0x670] sm:$0xff]  ;;  %v1622_v5 = vld [vmem:[%s11706_s10 + $0x6e8] sm:$0xff] }
 0x107   :  { %5802 = vmatprep.subr.mxu1 %v1588_v9  ;;  %5773 = vmatpush3.msra.mxu0 %v1536_v10  ;;  %v1562_v8 = vld [vmem:[%s11706_s10 + $0x508] sm:$0xff]  ;;  %v1577_v10 = vld [vmem:[%s11706_s10 + $0x580] sm:$0xff] }
 0x108   :  { %5803 = vmatpush3.msra.mxu1 %v1572_v11  ;;  %5774 = vmatprep.subr.mxu0 %v1551_v25  ;;  %v5370_v18 = vpop.f32.mrf.mxu0  ;;  %v1606_v9 = vld [vmem:[%s11706_s10 + $0x668] sm:$0xff]  ;;  %v1621_v11 = vld [vmem:[%s11706_s10 + $0x6e0] sm:$0xff] }
 0x109   :  { %5804 = vmatprep.subr.mxu1 %v1587_v12  ;;  %1330 = vperm.xlu1 %6871, %v1322_v13   ;;  %v6920_v25 = vld [vmem:[%s11699_s3 + $0x2c] ss:$252 sps:$4 sm:$0xff]   ;;  %v1561_v12 = vld [vmem:[%s11706_s10 + $0x500] sm:$0xff] }
 0x10a   :  { %5775 = vmatpush3.msra.mxu0 %v1535_v14  ;;  %5805 = vmatpush3.msra.mxu1 %v1571_v15  ;;  %v5371_v24 = vpop.f32.mrf.mxu0  ;;  %v6918_v13 = vld [vmem:[%s11699_s3 + $0x28] ss:$252 sps:$4 sm:$0xff]   ;;  %v1620_v15 = vld [vmem:[%s11706_s10 + $0x6d8] sm:$0xff] }
 0x10b   :  { %5776 = vmatprep.subr.mxu0 %v1550_v7  ;;  %5806 = vmatprep.subr.mxu1 %v1586_v16  ;;  %v5372_v29 = vadd.f32 %v5371_v24, %v5370_v18  ;;  %v1605_v14 = vld [vmem:[%s11706_s10 + $0x660] sm:$0xff]  ;;  %v1656_v7 = vld [vmem:[%s11706_s10 + $0x7f8] sm:$0xff]  ;;  %v1619_v18 = vld [vmem:[%s11706_s10 + $0x6d0] sm:$0xff] }
 0x10c   :  { %5777 = vmatpush3.msra.mxu0 %v1534_v17  ;;  %5807 = vmatpush3.msra.mxu1 %v1570_v19  ;;  %v5373_v32 = vpop.f32.mrf.mxu0  ;;  %v1604_v16 = vld [vmem:[%s11706_s10 + $0x658] sm:$0xff]  ;;  %v1655_v19 = vld [vmem:[%s11706_s10 + $0x7f0] sm:$0xff]  ;;  %v1654_v24 = vld [vmem:[%s11706_s10 + $0x7e8] sm:$0xff] }
 0x10d   :  { %5778 = vmatprep.subr.mxu0 %v1549_v21  ;;  %5808 = vmatprep.subr.mxu1 %v1585_v22  ;;  %v804_v35 = vadd.f32 %v5372_v29, %v8487_v28  ;;  %v5408_v36 = vpop.f32.mrf.mxu1  ;;  %v1546_v28 = vld [vmem:[%s11706_s10 + $0x488] sm:$0xff]  ;;  %v1640_v17 = vld [vmem:[%s11706_s10 + $0x778] sm:$0xff]  ;;  %v1603_v21 = vld [vmem:[%s11706_s10 + $0x650] sm:$0xff] }
 0x10e   :  { %5779 = vmatpush3.msra.mxu0 %v1533_v23  ;;  %5809 = vmatpush3.msra.mxu1 %v1569_v26  ;;  %v5374_v40 = vpop.f32.mrf.mxu0  ;;  %v1639_v22 = vld [vmem:[%s11706_s10 + $0x770] sm:$0xff]  ;;  %v1618_v23 = vld [vmem:[%s11706_s10 + $0x6c8] sm:$0xff]  ;;  %v1617_v29 = vld [vmem:[%s11706_s10 + $0x6c0] sm:$0xff] }
 0x10f   :  { %5780 = vmatprep.subr.mxu0 %v1548_v27  ;;  %5810 = vmatprep.subr.mxu1 %v1584_v30  ;;  %v5375_v42 = vadd.f32 %v5374_v40, %v5373_v32  ;;  %v5409_v43 = vpop.f32.mrf.mxu1  ;;  %v1602_v26 = vld [vmem:[%s11706_s10 + $0x648] sm:$0xff]  ;;  %v1653_v30 = vld [vmem:[%s11706_s10 + $0x7e0] sm:$0xff]  ;;  %v1599_v40 = vld [vmem:[%s11706_s10 + $0x630] sm:$0xff] }
 0x110   :  { %5781 = vmatpush3.msra.mxu0 %v1532_v31  ;;  %5811 = vmatpush3.msra.mxu1 %v1568_v33  ;;  %v5410_v46 = vadd.f32 %v5409_v43, %v5408_v36  ;;  %v1638_v27 = vld [vmem:[%s11706_s10 + $0x768] sm:$0xff]  ;;  %v1601_v31 = vld [vmem:[%s11706_s10 + $0x640] sm:$0xff]  ;;  %v1616_v33 = vld [vmem:[%s11706_s10 + $0x6b8] sm:$0xff] }
 0x111   :  { %5782 = vmatprep.subr.mxu0 %v1547_v34  ;;  %5812 = vmatprep.subr.mxu1 %v1583_v37  ;;  %v807_v49 = vadd.f32 %v5375_v42, %v8510_v38  ;;  %v5411_v50 = vpop.f32.mrf.mxu1  ;;  %v6915_v38 = vld [vmem:[%s11699_s3 + $0x20] ss:$252 sps:$4 sm:$0xff]   ;;  %v1615_v37 = vld [vmem:[%s11706_s10 + $0x6b0] sm:$0xff]  ;;  %v1650_v42 = vld [vmem:[%s11706_s10 + $0x7c8] sm:$0xff] }
 0x112   :  { %5783 = vmatpush3.msra.mxu0 %v1531_v39  ;;  %5813 = vmatpush3.msra.mxu1 %v1567_v41  ;;  %v8701_v53 = vadd.f32 %v5410_v46, %v804_v35  ;;  %v1637_v32 = vld [vmem:[%s11706_s10 + $0x760] sm:$0xff]  ;;  %v1652_v34 = vld [vmem:[%s11706_s10 + $0x7d8] sm:$0xff]  ;;  %v1651_v39 = vld [vmem:[%s11706_s10 + $0x7d0] sm:$0xff] }
 0x113   :  { %5784 = vmatprep.subr.mxu0 %v1546_v28  ;;  %5814 = vmatprep.subr.mxu1 %v1582_v44  ;;  %v5412_v55 = vpop.f32.mrf.mxu1  ;;  %v1600_v35 = vld [vmem:[%s11706_s10 + $0x638] sm:$0xff]  ;;  %v1635_v41 = vld [vmem:[%s11706_s10 + $0x750] sm:$0xff]  ;;  %v1614_v28 = vld [vmem:[%s11706_s10 + $0x6a8] sm:$0xff] }
 0x114   :  { %5785 = vmatpush3.msra.mxu0 %v1530_v45  ;;  %5815 = vmatpush3.msra.mxu1 %v1566_v47  ;;  %v5413_v58 = vadd.f32 %v5412_v55, %v5411_v50  ;;  %v1636_v36 = vld [vmem:[%s11706_s10 + $0x758] sm:$0xff]  ;;  %v1598_v43 = vld [vmem:[%s11706_s10 + $0x628] sm:$0xff]  ;;  %v1613_v45 = vld [vmem:[%s11706_s10 + $0x6a0] sm:$0xff] }
 0x115   :  { %5786 = vmatprep.subr.mxu0 %v1545_v48  ;;  %5816 = vmatprep.subr.mxu1 %v1581_v51  ;;  %v1634_v44 = vld [vmem:[%s11706_s10 + $0x748] sm:$0xff]  ;;  %v1649_v46 = vld [vmem:[%s11706_s10 + $0x7c0] sm:$0xff] }
 0x116   :  { %5787 = vmatpush3.msra.mxu0 %v1529_v54  ;;  %3084 = vmatprep.mubr.bf16.mxu0 %v6917_v52  ;;  %v8727_v0 = vadd.f32 %v5413_v58, %v807_v49 }
 0x117   :  { %5817 = vmatpush3.msra.mxu1 %v1565_v56  ;;  %3085 = vmatmul.mubr.bf16.vlgmr.msra.gmra.mxu0 %v6915_v38 }
 0x118   :  { %5818 = vmatprep.subr.mxu1 %v1580_v57  ;;  %5832 = vmatprep.subr.mxu0 %v1624_v59 }
 0x119   :  { %5819 = vmatpush3.msra.mxu1 %v1564_v60  ;;  %5833 = vmatpush3.msra.mxu0 %v1608_v62 }
 0x11a   :  { %5820 = vmatprep.subr.mxu1 %v1579_v63  ;;  %5834 = vmatprep.subr.mxu0 %v1623_v1 }
 0x11b   :  { %5821 = vmatpush3.msra.mxu1 %v1563_v61  ;;  %5835 = vmatpush3.msra.mxu0 %v1607_v3 }
 0x11c   :  { %5822 = vmatprep.subr.mxu1 %v1578_v4  ;;  %5836 = vmatprep.subr.mxu0 %v1622_v5 }
 0x11d   :  { %5823 = vmatpush3.msra.mxu1 %v1562_v8  ;;  %5837 = vmatpush3.msra.mxu0 %v1606_v9 }
 0x11e   :  { %5824 = vmatprep.subr.mxu1 %v1577_v10  ;;  %5838 = vmatprep.subr.mxu0 %v1621_v11 }
 0x11f   :  { %5825 = vmatpush3.msra.mxu1 %v1561_v12  ;;  %3157 = vmatprep.mubr.bf16.mxu1 %v6920_v25 }
 0x120   :  { %5839 = vmatpush3.msra.mxu0 %v1605_v14  ;;  %3158 = vmatmul.mubr.bf16.vlgmr.msra.gmra.mxu1 %v6918_v13 }
 0x121   :  { %5840 = vmatprep.subr.mxu0 %v1620_v15  ;;  %5870 = vmatprep.subr.mxu1 %v1656_v7 }
 0x122   :  { %5841 = vmatpush3.msra.mxu0 %v1604_v16  ;;  %5871 = vmatpush3.msra.mxu1 %v1640_v17 }
 0x123   :  { %5842 = vmatprep.subr.mxu0 %v1619_v18  ;;  %5872 = vmatprep.subr.mxu1 %v1655_v19 }
 0x124   :  { %5843 = vmatpush3.msra.mxu0 %v1603_v21  ;;  %5873 = vmatpush3.msra.mxu1 %v1639_v22 }
 0x125   :  { %5844 = vmatprep.subr.mxu0 %v1618_v23  ;;  %5874 = vmatprep.subr.mxu1 %v1654_v24 }
 0x126   :  { %5845 = vmatpush3.msra.mxu0 %v1602_v26  ;;  %5875 = vmatpush3.msra.mxu1 %v1638_v27 }
 0x127   :  { %5846 = vmatprep.subr.mxu0 %v1617_v29  ;;  %5876 = vmatprep.subr.mxu1 %v1653_v30 }
 0x128   :  { %5847 = vmatpush3.msra.mxu0 %v1601_v31  ;;  %5877 = vmatpush3.msra.mxu1 %v1637_v32 }
 0x129   :  { %5848 = vmatprep.subr.mxu0 %v1616_v33  ;;  %5878 = vmatprep.subr.mxu1 %v1652_v34 }
 0x12a   :  { %5849 = vmatpush3.msra.mxu0 %v1600_v35  ;;  %5879 = vmatpush3.msra.mxu1 %v1636_v36 }
 0x12b   :  { %5850 = vmatprep.subr.mxu0 %v1615_v37  ;;  %5880 = vmatprep.subr.mxu1 %v1651_v39 }
 0x12c   :  { %5851 = vmatpush3.msra.mxu0 %v1599_v40  ;;  %5881 = vmatpush3.msra.mxu1 %v1635_v41  ;;  %v5446_v47 = vpop.f32.mrf.mxu0 }
 0x12d   :  { %19 = vsyncpa [#allocation3], 0  ;;  %5852 = vmatprep.subr.mxu0 %v1614_v28  ;;  %5882 = vmatprep.subr.mxu1 %v1650_v42  ;;  %v1597_v48 = vld [vmem:[%s11706_s10 + $0x620] sm:$0xff]  ;;  %v1612_v50 = vld [vmem:[%s11706_s10 + $0x698] sm:$0xff]  ;;  %vm2724_vm6 = vcmask 1045504   ;;  %vm2720_vm7 = vcmask 769024  }
 0x12e   :  { %v1633_v49 = vld [vmem:[%s11706_s10 + $0x740] sm:$0xff]  ;;  %5853 = vmatpush3.msra.mxu0 %v1598_v43  ;;  %5883 = vmatpush3.msra.mxu1 %v1634_v44  ;;  %v1648_v51 = vld [vmem:[%s11706_s10 + $0x7b8] sm:$0xff]  ;;  %v5447_v52 = vpop.f32.mrf.mxu0  ;;  %v1611_v56 = vld [vmem:[%s11706_s10 + $0x690] sm:$0xff]  ;;  %vm5097_vm8 = vcmask 523264   ;;  %s7022_s29 = smov [#allocation2]  }
 0x12f   :  { %5854 = vmatprep.subr.mxu0 %v1613_v45  ;;  %5884 = vmatprep.subr.mxu1 %v1649_v46  ;;  %v1596_v54 = vld [vmem:[%s11706_s10 + $0x618] sm:$0xff]  ;;  %v5448_v55 = vadd.f32 %v5447_v52, %v5446_v47  ;;  %v1647_v57 = vld [vmem:[%s11706_s10 + $0x7b0] sm:$0xff]  ;;  %v1610_v1 = vld [vmem:[%s11706_s10 + $0x688] sm:$0xff]  ;;  %s5188_s30 = sshll.u32 %s7022_s29, 4  ;;  %s5189_s30 = int_to_ptr.vmem [resolvable:$true] %s5188_s30 }
 0x130   :  { %v1632_v38 = vld [vmem:[%s11706_s10 + $0x738] sm:$0xff]  ;;  %5855 = vmatpush3.msra.mxu0 %v1597_v48  ;;  %5885 = vmatpush3.msra.mxu1 %v1633_v49  ;;  %v5449_v58 = vpop.f32.mrf.mxu0  ;;  %v1595_v59 = vld [vmem:[%s11706_s10 + $0x610] sm:$0xff]  ;;  %v1646_v61 = vld [vmem:[%s11706_s10 + $0x7a8] sm:$0xff]  ;;  %s6997_s15 = scalar_lea.vmem %s5189_s30, 256  ;;  %p7002_p1 = scmp.lt.s32.totalorder %s5189_s30, %s5189_s30 }
 0x131   :  { %5856 = vmatprep.subr.mxu0 %v1612_v50  ;;  %5886 = vmatprep.subr.mxu1 %v1648_v51  ;;  %v1631_v60 = vld [vmem:[%s11706_s10 + $0x730] sm:$0xff]  ;;  %v950_v62 = vadd.f32 %v5448_v55, %v8701_v53  ;;  %v5484_v63 = vpop.f32.mrf.mxu1  ;;  %v1594_v4 = vld [vmem:[%s11706_s10 + $0x608] sm:$0xff]  ;;  %v1609_v9 = vld [vmem:[%s11706_s10 + $0x680] sm:$0xff]  ;;  %p6998_p0 = scmp.ne.s32.totalorder %s5189_s30, %s6997_s15  ;;  %p7003_p2 = scmp.lt.s32.totalorder %s6997_s15, %s6997_s15 }
 0x132   :  { %5857 = vmatpush3.msra.mxu0 %v1596_v54  ;;  %5887 = vmatpush3.msra.mxu1 %v1632_v38  ;;  %v5450_v3 = vpop.f32.mrf.mxu0  ;;  %v1630_v53 = vld [vmem:[%s11706_s10 + $0x728] sm:$0xff]  ;;  %v1645_v10 = vld [vmem:[%s11706_s10 + $0x7a0] sm:$0xff]  ;;  %v6923_v11 = vld [vmem:[%s11699_s3 + $0x34] ss:$252 sps:$4 sm:$0xff]  }
 0x133   :  { %5858 = vmatprep.subr.mxu0 %v1611_v56  ;;  %5888 = vmatprep.subr.mxu1 %v1647_v57  ;;  %v5451_v5 = vadd.f32 %v5450_v3, %v5449_v58  ;;  %v5485_v8 = vpop.f32.mrf.mxu1  ;;  %v1593_v12 = vld [vmem:[%s11706_s10 + $0x600] sm:$0xff]  ;;  %v6921_v13 = vld [vmem:[%s11699_s3 + $0x30] ss:$252 sps:$4 sm:$0xff]   ;;  %v1644_v17 = vld [vmem:[%s11706_s10 + $0x798] sm:$0xff]  ;;  %p7004_p3 = por %p7003_p2, %p7002_p1 }
 0x134   :  { %5859 = vmatpush3.msra.mxu0 %v1595_v59  ;;  %5889 = vmatpush3.msra.mxu1 %v1631_v60  ;;  %v5486_v25 = vadd.f32 %v5485_v8, %v5484_v63  ;;  %v1629_v7 = vld [vmem:[%s11706_s10 + $0x720] sm:$0xff]  ;;  %v1688_v18 = vld [vmem:[%s11706_s10 + $0x8f8] sm:$0xff]  ;;  %v1643_v23 = vld [vmem:[%s11706_s10 + $0x790] sm:$0xff] }
 0x135   :  { %5860 = vmatprep.subr.mxu0 %v1610_v1  ;;  %5890 = vmatprep.subr.mxu1 %v1646_v61  ;;  %v953_v14 = vadd.f32 %v5451_v5, %v8727_v0  ;;  %v5487_v15 = vpop.f32.mrf.mxu1  ;;  %v1628_v19 = vld [vmem:[%s11706_s10 + $0x718] sm:$0xff]  ;;  %v1687_v24 = vld [vmem:[%s11706_s10 + $0x8f0] sm:$0xff]  ;;  %v1642_v30 = vld [vmem:[%s11706_s10 + $0x788] sm:$0xff]  ;;  %p7005_p4 = pnand %p7004_p3, %p6998_p0 }
 0x136   :  { %5861 = vmatpush3.msra.mxu0 %v1594_v4  ;;  %5891 = vmatpush3.msra.mxu1 %v1630_v53  ;;  %v8920_v16 = vadd.f32 %v5486_v25, %v950_v62  ;;  %v1672_v21 = vld [vmem:[%s11706_s10 + $0x878] sm:$0xff]  ;;  %v1627_v26 = vld [vmem:[%s11706_s10 + $0x710] sm:$0xff]  ;;  %v1686_v31 = vld [vmem:[%s11706_s10 + $0x8e8] sm:$0xff] }
 0x137   :  { %5862 = vmatprep.subr.mxu0 %v1609_v9  ;;  %5892 = vmatprep.subr.mxu1 %v1645_v10  ;;  %v5488_v0 = vpop.f32.mrf.mxu1  ;;  %v1671_v27 = vld [vmem:[%s11706_s10 + $0x870] sm:$0xff]  ;;  %v1626_v32 = vld [vmem:[%s11706_s10 + $0x708] sm:$0xff]  ;;  %v1641_v34 = vld [vmem:[%s11706_s10 + $0x780] sm:$0xff] }
 0x138   :  { %5863 = vmatpush3.msra.mxu0 %v1593_v12  ;;  %3230 = vmatprep.mubr.bf16.mxu0 %v6923_v11  ;;  %v5489_v22 = vadd.f32 %v5488_v0, %v5487_v15  ;;  %v1670_v33 = vld [vmem:[%s11706_s10 + $0x868] sm:$0xff]  ;;  %v1685_v35 = vld [vmem:[%s11706_s10 + $0x8e0] sm:$0xff]  ;;  %v6926_v36 = vld [vmem:[%s11699_s3 + $0x3c] ss:$252 sps:$4 sm:$0xff]  }
 0x139   :  { %5893 = vmatpush3.msra.mxu1 %v1629_v7  ;;  %3231 = vmatmul.mubr.bf16.vlgmr.msra.gmra.mxu0 %v6921_v13  ;;  %v1625_v37 = vld [vmem:[%s11706_s10 + $0x700] sm:$0xff]  ;;  %v6924_v39 = vld [vmem:[%s11699_s3 + $0x38] ss:$252 sps:$4 sm:$0xff]   ;;  %v1682_v48 = vld [vmem:[%s11706_s10 + $0x8c8] sm:$0xff] }
 0x13a   :  { %5894 = vmatprep.subr.mxu1 %v1644_v17  ;;  %5908 = vmatprep.subr.mxu0 %v1688_v18  ;;  %v8946_v29 = vadd.f32 %v5489_v22, %v953_v14  ;;  %v1669_v40 = vld [vmem:[%s11706_s10 + $0x860] sm:$0xff]  ;;  %v1684_v41 = vld [vmem:[%s11706_s10 + $0x8d8] sm:$0xff]  ;;  %v1683_v44 = vld [vmem:[%s11706_s10 + $0x8d0] sm:$0xff] }
 0x13b   :  { %5895 = vmatpush3.msra.mxu1 %v1628_v19  ;;  %5909 = vmatpush3.msra.mxu0 %v1672_v21  ;;  %v1720_v28 = vld [vmem:[%s11706_s10 + $0x9f8] sm:$0xff]  ;;  %v1719_v45 = vld [vmem:[%s11706_s10 + $0x9f0] sm:$0xff]  ;;  %v1718_v49 = vld [vmem:[%s11706_s10 + $0x9e8] sm:$0xff] }
 0x13c   :  { %5896 = vmatprep.subr.mxu1 %v1643_v23  ;;  %5910 = vmatprep.subr.mxu0 %v1687_v24  ;;  %v1668_v42 = vld [vmem:[%s11706_s10 + $0x858] sm:$0xff]  ;;  %v1667_v46 = vld [vmem:[%s11706_s10 + $0x850] sm:$0xff]  ;;  %v1666_v50 = vld [vmem:[%s11706_s10 + $0x848] sm:$0xff] }
 0x13d   :  { %5897 = vmatpush3.msra.mxu1 %v1627_v26  ;;  %5911 = vmatpush3.msra.mxu0 %v1671_v27  ;;  %v1704_v43 = vld [vmem:[%s11706_s10 + $0x978] sm:$0xff]  ;;  %v1703_v47 = vld [vmem:[%s11706_s10 + $0x970] sm:$0xff]  ;;  %v1702_v51 = vld [vmem:[%s11706_s10 + $0x968] sm:$0xff] }
 0x13e   :  { %5898 = vmatprep.subr.mxu1 %v1642_v30  ;;  %5912 = vmatprep.subr.mxu0 %v1686_v31  ;;  %v1681_v52 = vld [vmem:[%s11706_s10 + $0x8c0] sm:$0xff]  ;;  %v1680_v56 = vld [vmem:[%s11706_s10 + $0x8b8] sm:$0xff]  ;;  %v1679_v60 = vld [vmem:[%s11706_s10 + $0x8b0] sm:$0xff] }
 0x13f   :  { %5899 = vmatpush3.msra.mxu1 %v1626_v32  ;;  %5913 = vmatpush3.msra.mxu0 %v1670_v33  ;;  %v1717_v54 = vld [vmem:[%s11706_s10 + $0x9e0] sm:$0xff]  ;;  %v1716_v57 = vld [vmem:[%s11706_s10 + $0x9d8] sm:$0xff]  ;;  %v1715_v62 = vld [vmem:[%s11706_s10 + $0x9d0] sm:$0xff] }
 0x140   :  { %5900 = vmatprep.subr.mxu1 %v1641_v34  ;;  %5914 = vmatprep.subr.mxu0 %v1685_v35  ;;  %v1665_v38 = vld [vmem:[%s11706_s10 + $0x840] sm:$0xff]  ;;  %v1664_v58 = vld [vmem:[%s11706_s10 + $0x838] sm:$0xff]  ;;  %v1663_v63 = vld [vmem:[%s11706_s10 + $0x830] sm:$0xff] }
 0x141   :  { %5901 = vmatpush3.msra.mxu1 %v1625_v37  ;;  %3303 = vmatprep.mubr.bf16.mxu1 %v6926_v36  ;;  %v1701_v55 = vld [vmem:[%s11706_s10 + $0x960] sm:$0xff]  ;;  %v1700_v59 = vld [vmem:[%s11706_s10 + $0x958] sm:$0xff]  ;;  %v1699_v1 = vld [vmem:[%s11706_s10 + $0x950] sm:$0xff] }
 0x142   :  { %5915 = vmatpush3.msra.mxu0 %v1669_v40  ;;  %3304 = vmatmul.mubr.bf16.vlgmr.msra.gmra.mxu1 %v6924_v39  ;;  %v1678_v61 = vld [vmem:[%s11706_s10 + $0x8a8] sm:$0xff]  ;;  %v1677_v5 = vld [vmem:[%s11706_s10 + $0x8a0] sm:$0xff]  ;;  %v1676_v25 = vld [vmem:[%s11706_s10 + $0x898] sm:$0xff] }
 0x143   :  { %5916 = vmatprep.subr.mxu0 %v1684_v41  ;;  %5946 = vmatprep.subr.mxu1 %v1720_v28  ;;  %v1714_v3 = vld [vmem:[%s11706_s10 + $0x9c8] sm:$0xff]  ;;  %v1713_v8 = vld [vmem:[%s11706_s10 + $0x9c0] sm:$0xff]  ;;  %v1712_v12 = vld [vmem:[%s11706_s10 + $0x9b8] sm:$0xff] }
 0x144   :  { %5917 = vmatpush3.msra.mxu0 %v1668_v42  ;;  %5947 = vmatpush3.msra.mxu1 %v1704_v43  ;;  %v1662_v4 = vld [vmem:[%s11706_s10 + $0x828] sm:$0xff]  ;;  %v1661_v10 = vld [vmem:[%s11706_s10 + $0x820] sm:$0xff]  ;;  %v1660_v14 = vld [vmem:[%s11706_s10 + $0x818] sm:$0xff] }
 0x145   :  { %5918 = vmatprep.subr.mxu0 %v1683_v44  ;;  %5948 = vmatprep.subr.mxu1 %v1719_v45  ;;  %v1698_v53 = vld [vmem:[%s11706_s10 + $0x948] sm:$0xff]  ;;  %v1697_v11 = vld [vmem:[%s11706_s10 + $0x940] sm:$0xff]  ;;  %v1696_v15 = vld [vmem:[%s11706_s10 + $0x938] sm:$0xff] }
 0x146   :  { %5919 = vmatpush3.msra.mxu0 %v1667_v46  ;;  %5949 = vmatpush3.msra.mxu1 %v1703_v47  ;;  %v1675_v17 = vld [vmem:[%s11706_s10 + $0x890] sm:$0xff]  ;;  %v1674_v24 = vld [vmem:[%s11706_s10 + $0x888] sm:$0xff]  ;;  %v1673_v33 = vld [vmem:[%s11706_s10 + $0x880] sm:$0xff] }
 0x147   :  { %5920 = vmatprep.subr.mxu0 %v1682_v48  ;;  %5950 = vmatprep.subr.mxu1 %v1718_v49  ;;  %v1711_v18 = vld [vmem:[%s11706_s10 + $0x9b0] sm:$0xff]  ;;  %v1710_v26 = vld [vmem:[%s11706_s10 + $0x9a8] sm:$0xff]  ;;  %v1709_v34 = vld [vmem:[%s11706_s10 + $0x9a0] sm:$0xff] }
 0x148   :  { %5921 = vmatpush3.msra.mxu0 %v1666_v50  ;;  %5951 = vmatpush3.msra.mxu1 %v1702_v51  ;;  %v1659_v19 = vld [vmem:[%s11706_s10 + $0x810] sm:$0xff]  ;;  %v1658_v30 = vld [vmem:[%s11706_s10 + $0x808] sm:$0xff]  ;;  %v6929_v35 = vld [vmem:[%s11699_s3 + $0x44] ss:$252 sps:$4 sm:$0xff]  }
 0x149   :  { %5922 = vmatprep.subr.mxu0 %v1681_v52  ;;  %5952 = vmatprep.subr.mxu1 %v1717_v54  ;;  %v1695_v21 = vld [vmem:[%s11706_s10 + $0x930] sm:$0xff]  ;;  %v1657_v37 = vld [vmem:[%s11706_s10 + $0x800] sm:$0xff]  ;;  %v1708_v43 = vld [vmem:[%s11706_s10 + $0x998] sm:$0xff] }
 0x14a   :  { %5923 = vmatpush3.msra.mxu0 %v1665_v38  ;;  %5953 = vmatpush3.msra.mxu1 %v1701_v55  ;;  %v6927_v39 = vld [vmem:[%s11699_s3 + $0x40] ss:$252 sps:$4 sm:$0xff]   ;;  %v1707_v48 = vld [vmem:[%s11706_s10 + $0x990] sm:$0xff]  ;;  %v1706_v54 = vld [vmem:[%s11706_s10 + $0x988] sm:$0xff] }
 0x14b   :  { %5924 = vmatprep.subr.mxu0 %v1680_v56  ;;  %5954 = vmatprep.subr.mxu1 %v1716_v57  ;;  %v1693_v28 = vld [vmem:[%s11706_s10 + $0x920] sm:$0xff]  ;;  %v1752_v44 = vld [vmem:[%s11706_s10 + $0xaf8] sm:$0xff]  ;;  %v1751_v49 = vld [vmem:[%s11706_s10 + $0xaf0] sm:$0xff] }
 0x14c   :  { %5925 = vmatpush3.msra.mxu0 %v1664_v58  ;;  %5955 = vmatpush3.msra.mxu1 %v1700_v59  ;;  %v1692_v45 = vld [vmem:[%s11706_s10 + $0x918] sm:$0xff]  ;;  %v1691_v50 = vld [vmem:[%s11706_s10 + $0x910] sm:$0xff]  ;;  %v1750_v38 = vld [vmem:[%s11706_s10 + $0xae8] sm:$0xff] }
 0x14d   :  { %5926 = vmatprep.subr.mxu0 %v1679_v60  ;;  %5956 = vmatprep.subr.mxu1 %v1715_v62  ;;  %v1736_v46 = vld [vmem:[%s11706_s10 + $0xa78] sm:$0xff]  ;;  %v1735_v51 = vld [vmem:[%s11706_s10 + $0xa70] sm:$0xff]  ;;  %v1690_v55 = vld [vmem:[%s11706_s10 + $0x908] sm:$0xff] }
 0x14e   :  { %5927 = vmatpush3.msra.mxu0 %v1663_v63  ;;  %5957 = vmatpush3.msra.mxu1 %v1699_v1  ;;  %v5522_v9 = vpop.f32.mrf.mxu0  ;;  %v1734_v56 = vld [vmem:[%s11706_s10 + $0xa68] sm:$0xff]  ;;  %v1705_v57 = vld [vmem:[%s11706_s10 + $0x980] sm:$0xff]  ;;  %v1748_v1 = vld [vmem:[%s11706_s10 + $0xad8] sm:$0xff] }
 0x14f   :  { %5928 = vmatprep.subr.mxu0 %v1678_v61  ;;  %5958 = vmatprep.subr.mxu1 %v1714_v3  ;;  %v1749_v58 = vld [vmem:[%s11706_s10 + $0xae0] sm:$0xff]  ;;  %v6932_v59 = vld [vmem:[%s11699_s3 + $0x4c] ss:$252 sps:$4 sm:$0xff]   ;;  %v1784_v61 = vld [vmem:[%s11706_s10 + $0xbf8] sm:$0xff] }
 0x150   :  { %5929 = vmatpush3.msra.mxu0 %v1662_v4  ;;  %5959 = vmatpush3.msra.mxu1 %v1698_v53  ;;  %v5523_v13 = vpop.f32.mrf.mxu0  ;;  %v1689_v60 = vld [vmem:[%s11706_s10 + $0x900] sm:$0xff]  ;;  %v1732_v3 = vld [vmem:[%s11706_s10 + $0xa58] sm:$0xff]  ;;  %v1747_v53 = vld [vmem:[%s11706_s10 + $0xad0] sm:$0xff] }
 0x151   :  { %5930 = vmatprep.subr.mxu0 %v1677_v5  ;;  %5960 = vmatprep.subr.mxu1 %v1713_v8  ;;  %v5524_v7 = vadd.f32 %v5523_v13, %v5522_v9  ;;  %v6930_v62 = vld [vmem:[%s11699_s3 + $0x48] ss:$252 sps:$4 sm:$0xff]   ;;  %v1768_v4 = vld [vmem:[%s11706_s10 + $0xb78] sm:$0xff]  ;;  %v1783_v5 = vld [vmem:[%s11706_s10 + $0xbf0] sm:$0xff] }
 0x152   :  { %5931 = vmatpush3.msra.mxu0 %v1661_v10  ;;  %5961 = vmatpush3.msra.mxu1 %v1697_v11  ;;  %v5525_v0 = vpop.f32.mrf.mxu0  ;;  %v1733_v63 = vld [vmem:[%s11706_s10 + $0xa60] sm:$0xff]  ;;  %v1731_v8 = vld [vmem:[%s11706_s10 + $0xa50] sm:$0xff]  ;;  %v1746_v10 = vld [vmem:[%s11706_s10 + $0xac8] sm:$0xff] }
 0x153   :  { %5932 = vmatprep.subr.mxu0 %v1676_v25  ;;  %5962 = vmatprep.subr.mxu1 %v1712_v12  ;;  %v1096_v22 = vadd.f32 %v5524_v7, %v8920_v16  ;;  %v5560_v23 = vpop.f32.mrf.mxu1  ;;  %v1694_v16 = vld [vmem:[%s11706_s10 + $0x928] sm:$0xff]  ;;  %v1767_v9 = vld [vmem:[%s11706_s10 + $0xb70] sm:$0xff]  ;;  %v1745_v13 = vld [vmem:[%s11706_s10 + $0xac0] sm:$0xff] }
 0x154   :  { %5933 = vmatpush3.msra.mxu0 %v1660_v14  ;;  %5963 = vmatpush3.msra.mxu1 %v1696_v15  ;;  %v5526_v27 = vpop.f32.mrf.mxu0  ;;  %v1782_v11 = vld [vmem:[%s11706_s10 + $0xbe8] sm:$0xff]  ;;  %v1781_v14 = vld [vmem:[%s11706_s10 + $0xbe0] sm:$0xff] }
 0x155   :  { %5934 = vmatprep.subr.mxu0 %v1675_v17  ;;  %5964 = vmatprep.subr.mxu1 %v1711_v18  ;;  %v5527_v31 = vadd.f32 %v5526_v27, %v5525_v0  ;;  %v5561_v32 = vpop.f32.mrf.mxu1  ;;  %v1730_v25 = vld [vmem:[%s11706_s10 + $0xa48] sm:$0xff]  ;;  %v1729_v15 = vld [vmem:[%s11706_s10 + $0xa40] sm:$0xff]  ;;  %v1744_v17 = vld [vmem:[%s11706_s10 + $0xab8] sm:$0xff] }
 0x156   :  { %5935 = vmatpush3.msra.mxu0 %v1659_v19  ;;  %5965 = vmatpush3.msra.mxu1 %v1695_v21  ;;  %v5562_v36 = vadd.f32 %v5561_v32, %v5560_v23  ;;  %v1766_v12 = vld [vmem:[%s11706_s10 + $0xb68] sm:$0xff]  ;;  %v1765_v7 = vld [vmem:[%s11706_s10 + $0xb60] sm:$0xff]  ;;  %v1780_v18 = vld [vmem:[%s11706_s10 + $0xbd8] sm:$0xff] }
 0x157   :  { %5936 = vmatprep.subr.mxu0 %v1674_v24  ;;  %5966 = vmatprep.subr.mxu1 %v1710_v26  ;;  %v1099_v40 = vadd.f32 %v5527_v31, %v8946_v29  ;;  %v5563_v41 = vpop.f32.mrf.mxu1  ;;  %v1728_v0 = vld [vmem:[%s11706_s10 + $0xa38] sm:$0xff]  ;;  %v1743_v21 = vld [vmem:[%s11706_s10 + $0xab0] sm:$0xff]  ;;  %v1742_v26 = vld [vmem:[%s11706_s10 + $0xaa8] sm:$0xff] }
 0x158   :  { %5937 = vmatpush3.msra.mxu0 %v1658_v30  ;;  %5967 = vmatpush3.msra.mxu1 %v1694_v16  ;;  %v9130_v42 = vadd.f32 %v5562_v36, %v1096_v22  ;;  %v1764_v19 = vld [vmem:[%s11706_s10 + $0xb58] sm:$0xff]  ;;  %v1779_v22 = vld [vmem:[%s11706_s10 + $0xbd0] sm:$0xff]  ;;  %v1778_v27 = vld [vmem:[%s11706_s10 + $0xbc8] sm:$0xff] }
 0x159   :  { %5938 = vmatprep.subr.mxu0 %v1673_v33  ;;  %5968 = vmatprep.subr.mxu1 %v1709_v34  ;;  %v5564_v29 = vpop.f32.mrf.mxu1  ;;  %v1727_v23 = vld [vmem:[%s11706_s10 + $0xa30] sm:$0xff]  ;;  %v1726_v30 = vld [vmem:[%s11706_s10 + $0xa28] sm:$0xff]  ;;  %v1741_v31 = vld [vmem:[%s11706_s10 + $0xaa0] sm:$0xff] }
 0x15a   :  { %5939 = vmatpush3.msra.mxu0 %v1657_v37  ;;  %3376 = vmatprep.mubr.bf16.mxu0 %v6929_v35  ;;  %v5565_v47 = vadd.f32 %v5564_v29, %v5563_v41  ;;  %v1763_v24 = vld [vmem:[%s11706_s10 + $0xb50] sm:$0xff]  ;;  %v1762_v16 = vld [vmem:[%s11706_s10 + $0xb48] sm:$0xff]  ;;  %v1777_v32 = vld [vmem:[%s11706_s10 + $0xbc0] sm:$0xff] }
 0x15b   :  { %5969 = vmatpush3.msra.mxu1 %v1693_v28  ;;  %3377 = vmatmul.mubr.bf16.vlgmr.msra.gmra.mxu0 %v6927_v39  ;;  %v1725_v34 = vld [vmem:[%s11706_s10 + $0xa20] sm:$0xff]  ;;  %v1740_v36 = vld [vmem:[%s11706_s10 + $0xa98] sm:$0xff] }
 0x15c   :  { %5970 = vmatprep.subr.mxu1 %v1708_v43  ;;  %5984 = vmatprep.subr.mxu0 %v1752_v44  ;;  %v9156_v52 = vadd.f32 %v5565_v47, %v1099_v40  ;;  %v1761_v35 = vld [vmem:[%s11706_s10 + $0xb40] sm:$0xff]  ;;  %v1776_v37 = vld [vmem:[%s11706_s10 + $0xbb8] sm:$0xff]  ;;  %v1739_v43 = vld [vmem:[%s11706_s10 + $0xa90] sm:$0xff] }
 0x15d   :  { %5971 = vmatpush3.msra.mxu1 %v1692_v45  ;;  %5985 = vmatpush3.msra.mxu0 %v1736_v46  ;;  %v1724_v40 = vld [vmem:[%s11706_s10 + $0xa18] sm:$0xff]  ;;  %v1775_v44 = vld [vmem:[%s11706_s10 + $0xbb0] sm:$0xff] }
 0x15e   :  { %5972 = vmatprep.subr.mxu1 %v1707_v48  ;;  %5986 = vmatprep.subr.mxu0 %v1751_v49  ;;  %v1760_v41 = vld [vmem:[%s11706_s10 + $0xb38] sm:$0xff]  ;;  %v1723_v45 = vld [vmem:[%s11706_s10 + $0xa10] sm:$0xff]  ;;  %v1738_v48 = vld [vmem:[%s11706_s10 + $0xa88] sm:$0xff] }
 0x15f   :  { %5973 = vmatpush3.msra.mxu1 %v1691_v50  ;;  %5987 = vmatpush3.msra.mxu0 %v1735_v51  ;;  %v1759_v46 = vld [vmem:[%s11706_s10 + $0xb30] sm:$0xff]  ;;  %v1774_v49 = vld [vmem:[%s11706_s10 + $0xba8] sm:$0xff] }
 0x160   :  { %5974 = vmatprep.subr.mxu1 %v1706_v54  ;;  %5988 = vmatprep.subr.mxu0 %v1750_v38  ;;  %v1722_v51 = vld [vmem:[%s11706_s10 + $0xa08] sm:$0xff]  ;;  %v1737_v38 = vld [vmem:[%s11706_s10 + $0xa80] sm:$0xff] }
 0x161   :  { %5975 = vmatpush3.msra.mxu1 %v1690_v55  ;;  %5989 = vmatpush3.msra.mxu0 %v1734_v56  ;;  %v1773_v55 = vld [vmem:[%s11706_s10 + $0xba0] sm:$0xff]  ;;  %v6935_v56 = vld [vmem:[%s11699_s3 + $0x54] ss:$252 sps:$4 sm:$0xff]  }
 0x162   :  { %5976 = vmatprep.subr.mxu1 %v1705_v57  ;;  %5990 = vmatprep.subr.mxu0 %v1749_v58  ;;  %v1721_v57 = vld [vmem:[%s11706_s10 + $0xa00] sm:$0xff]  ;;  %v6933_v58 = vld [vmem:[%s11699_s3 + $0x50] ss:$252 sps:$4 sm:$0xff]  }
 0x163   :  { %5977 = vmatpush3.msra.mxu1 %v1689_v60  ;;  %3449 = vmatprep.mubr.bf16.mxu1 %v6932_v59 }
 0x164   :  { %5991 = vmatpush3.msra.mxu0 %v1733_v63  ;;  %3450 = vmatmul.mubr.bf16.vlgmr.msra.gmra.mxu1 %v6930_v62  ;;  %v1757_v62 = vld [vmem:[%s11706_s10 + $0xb20] sm:$0xff] }
 0x165   :  { %5992 = vmatprep.subr.mxu0 %v1748_v1  ;;  %6022 = vmatprep.subr.mxu1 %v1784_v61  ;;  %v1772_v1 = vld [vmem:[%s11706_s10 + $0xb98] sm:$0xff] }
 0x166   :  { %5993 = vmatpush3.msra.mxu0 %v1732_v3  ;;  %6023 = vmatpush3.msra.mxu1 %v1768_v4  ;;  %v1816_v61 = vld [vmem:[%s11706_s10 + $0xcf8] sm:$0xff] }
 0x167   :  { %5994 = vmatprep.subr.mxu0 %v1747_v53  ;;  %6024 = vmatprep.subr.mxu1 %v1783_v5  ;;  %v1800_v4 = vld [vmem:[%s11706_s10 + $0xc78] sm:$0xff]  ;;  %v1771_v53 = vld [vmem:[%s11706_s10 + $0xb90] sm:$0xff] }
 0x168   :  { %5995 = vmatpush3.msra.mxu0 %v1731_v8  ;;  %6025 = vmatpush3.msra.mxu1 %v1767_v9  ;;  %v1815_v5 = vld [vmem:[%s11706_s10 + $0xcf0] sm:$0xff] }
 0x169   :  { %5996 = vmatprep.subr.mxu0 %v1746_v10  ;;  %6026 = vmatprep.subr.mxu1 %v1782_v11  ;;  %v1755_v9 = vld [vmem:[%s11706_s10 + $0xb10] sm:$0xff] }
 0x16a   :  { %5997 = vmatpush3.msra.mxu0 %v1730_v25  ;;  %6027 = vmatpush3.msra.mxu1 %v1766_v12  ;;  %v1799_v10 = vld [vmem:[%s11706_s10 + $0xc70] sm:$0xff]  ;;  %v1770_v25 = vld [vmem:[%s11706_s10 + $0xb88] sm:$0xff] }
 0x16b   :  { %5998 = vmatprep.subr.mxu0 %v1745_v13  ;;  %6028 = vmatprep.subr.mxu1 %v1781_v14  ;;  %v1814_v12 = vld [vmem:[%s11706_s10 + $0xce8] sm:$0xff] }
 0x16c   :  { %5999 = vmatpush3.msra.mxu0 %v1729_v15  ;;  %6029 = vmatpush3.msra.mxu1 %v1765_v7  ;;  %v1754_v14 = vld [vmem:[%s11706_s10 + $0xb08] sm:$0xff] }
 0x16d   :  { %6000 = vmatprep.subr.mxu0 %v1744_v17  ;;  %6030 = vmatprep.subr.mxu1 %v1780_v18  ;;  %v1798_v15 = vld [vmem:[%s11706_s10 + $0xc68] sm:$0xff]  ;;  %v1769_v17 = vld [vmem:[%s11706_s10 + $0xb80] sm:$0xff] }
 0x16e   :  { %6001 = vmatpush3.msra.mxu0 %v1728_v0  ;;  %6031 = vmatpush3.msra.mxu1 %v1764_v19  ;;  %v1813_v18 = vld [vmem:[%s11706_s10 + $0xce0] sm:$0xff]  ;;  %v6938_v0 = vld [vmem:[%s11699_s3 + $0x5c] ss:$252 sps:$4 sm:$0xff]  }
 0x16f   :  { %6002 = vmatprep.subr.mxu0 %v1743_v21  ;;  %6032 = vmatprep.subr.mxu1 %v1779_v22  ;;  %v1753_v21 = vld [vmem:[%s11706_s10 + $0xb00] sm:$0xff]  ;;  %v6936_v22 = vld [vmem:[%s11699_s3 + $0x58] ss:$252 sps:$4 sm:$0xff]  }
 0x170   :  { %6003 = vmatpush3.msra.mxu0 %v1727_v23  ;;  %6033 = vmatpush3.msra.mxu1 %v1763_v24  ;;  %v5598_v33 = vpop.f32.mrf.mxu0  ;;  %v1797_v23 = vld [vmem:[%s11706_s10 + $0xc60] sm:$0xff] }
 0x171   :  { %6004 = vmatprep.subr.mxu0 %v1742_v26  ;;  %6034 = vmatprep.subr.mxu1 %v1778_v27  ;;  %v1812_v26 = vld [vmem:[%s11706_s10 + $0xcd8] sm:$0xff] }
 0x172   :  { %6005 = vmatpush3.msra.mxu0 %v1726_v30  ;;  %6035 = vmatpush3.msra.mxu1 %v1762_v16  ;;  %v5599_v39 = vpop.f32.mrf.mxu0  ;;  %v1848_v27 = vld [vmem:[%s11706_s10 + $0xdf8] sm:$0xff] }
 0x173   :  { %6006 = vmatprep.subr.mxu0 %v1741_v31  ;;  %6036 = vmatprep.subr.mxu1 %v1777_v32  ;;  %v5600_v28 = vadd.f32 %v5599_v39, %v5598_v33  ;;  %v1796_v16 = vld [vmem:[%s11706_s10 + $0xc58] sm:$0xff]  ;;  %v1811_v32 = vld [vmem:[%s11706_s10 + $0xcd0] sm:$0xff]  ;;  %v1846_v39 = vld [vmem:[%s11706_s10 + $0xde8] sm:$0xff] }
 0x174   :  { %6007 = vmatpush3.msra.mxu0 %v1725_v34  ;;  %6037 = vmatpush3.msra.mxu1 %v1761_v35  ;;  %v5601_v29 = vpop.f32.mrf.mxu0  ;;  %v1847_v33 = vld [vmem:[%s11706_s10 + $0xdf0] sm:$0xff] }
 0x175   :  { %6008 = vmatprep.subr.mxu0 %v1740_v36  ;;  %6038 = vmatprep.subr.mxu1 %v1776_v37  ;;  %v1242_v47 = vadd.f32 %v5600_v28, %v9130_v42  ;;  %v1758_v42 = vld [vmem:[%s11706_s10 + $0xb28] sm:$0xff]  ;;  %v1795_v34 = vld [vmem:[%s11706_s10 + $0xc50] sm:$0xff]  ;;  %v1845_v28 = vld [vmem:[%s11706_s10 + $0xde0] sm:$0xff] }
 0x176   :  { %6009 = vmatpush3.msra.mxu0 %v1724_v40  ;;  %6039 = vmatpush3.msra.mxu1 %v1760_v41  ;;  %v5602_v50 = vpop.f32.mrf.mxu0  ;;  %v1831_v35 = vld [vmem:[%s11706_s10 + $0xd70] sm:$0xff]  ;;  %v1810_v37 = vld [vmem:[%s11706_s10 + $0xcc8] sm:$0xff]  ;;  %v1809_v41 = vld [vmem:[%s11706_s10 + $0xcc0] sm:$0xff] }
 0x177   :  { %6010 = vmatprep.subr.mxu0 %v1739_v43  ;;  %6040 = vmatprep.subr.mxu1 %v1775_v44  ;;  %v5603_v54 = vadd.f32 %v5602_v50, %v5601_v29  ;;  %v1794_v40 = vld [vmem:[%s11706_s10 + $0xc48] sm:$0xff]  ;;  %v1793_v43 = vld [vmem:[%s11706_s10 + $0xc40] sm:$0xff]  ;;  %v1808_v29 = vld [vmem:[%s11706_s10 + $0xcb8] sm:$0xff] }
 0x178   :  { %6011 = vmatpush3.msra.mxu0 %v1723_v45  ;;  %6041 = vmatpush3.msra.mxu1 %v1759_v46  ;;  %v1829_v44 = vld [vmem:[%s11706_s10 + $0xd60] sm:$0xff]  ;;  %v1844_v45 = vld [vmem:[%s11706_s10 + $0xdd8] sm:$0xff]  ;;  %v1791_v50 = vld [vmem:[%s11706_s10 + $0xc30] sm:$0xff] }
 0x179   :  { %6012 = vmatprep.subr.mxu0 %v1738_v48  ;;  %6042 = vmatprep.subr.mxu1 %v1774_v49  ;;  %v1314_v59 = vpop.f32.mrf.mxu1  ;;  %v1245_v60 = vadd.f32 %v5603_v54, %v9156_v52  ;;  %v1756_v52 = vld [vmem:[%s11706_s10 + $0xb18] sm:$0xff]  ;;  %v1807_v48 = vld [vmem:[%s11706_s10 + $0xcb0] sm:$0xff]  ;;  %v1842_v54 = vld [vmem:[%s11706_s10 + $0xdc8] sm:$0xff] }
 0x17a   :  { %6013 = vmatpush3.msra.mxu0 %v1722_v51  ;;  %6043 = vmatpush3.msra.mxu1 %v1758_v42  ;;  %v1315_v63 = vadd.f32 %v1314_v59, %v1242_v47  ;;  %v1792_v46 = vld [vmem:[%s11706_s10 + $0xc38] sm:$0xff]  ;;  %v1843_v49 = vld [vmem:[%s11706_s10 + $0xdd0] sm:$0xff]  ;;  %v1806_v42 = vld [vmem:[%s11706_s10 + $0xca8] sm:$0xff] }
 0x17b   :  { %6014 = vmatprep.subr.mxu0 %v1737_v38  ;;  %6044 = vmatprep.subr.mxu1 %v1773_v55  ;;  %v1316_v3 = vpop.f32.mrf.mxu1  ;;  %v1828_v47 = vld [vmem:[%s11706_s10 + $0xd58] sm:$0xff]  ;;  %v1827_v51 = vld [vmem:[%s11706_s10 + $0xd50] sm:$0xff]  ;;  %v1790_v38 = vld [vmem:[%s11706_s10 + $0xc28] sm:$0xff] }
 0x17c   :  { %6015 = vmatpush3.msra.mxu0 %v1721_v57  ;;  %3522 = vmatprep.mubr.bf16.mxu0 %v6935_v56  ;;  %v1826_v55 = vld [vmem:[%s11706_s10 + $0xd48] sm:$0xff]  ;;  %v1805_v56 = vld [vmem:[%s11706_s10 + $0xca0] sm:$0xff]  ;;  %v1803_v3 = vld [vmem:[%s11706_s10 + $0xc90] sm:$0xff] }
 0x17d   :  { %6045 = vmatpush3.msra.mxu1 %v1757_v62  ;;  %3523 = vmatmul.mubr.bf16.vlgmr.msra.gmra.mxu0 %v6933_v58  ;;  %v1317_v8 = vpop.f32.mrf.mxu1  ;;  %v1841_v57 = vld [vmem:[%s11706_s10 + $0xdc0] sm:$0xff]  ;;  %v1804_v62 = vld [vmem:[%s11706_s10 + $0xc98] sm:$0xff] }
 0x17e   :  { %6046 = vmatprep.subr.mxu1 %v1772_v1  ;;  %6060 = vmatprep.subr.mxu0 %v1816_v61  ;;  %v1318_v11 = vadd.f32 %v1317_v8, %v1245_v60  ;;  %v1789_v58 = vld [vmem:[%s11706_s10 + $0xc20] sm:$0xff]  ;;  %v1788_v1 = vld [vmem:[%s11706_s10 + $0xc18] sm:$0xff]  ;;  %v1802_v8 = vld [vmem:[%s11706_s10 + $0xc88] sm:$0xff] }
 0x17f   :  { %6047 = vmatpush3.msra.mxu1 %v1756_v52  ;;  %6061 = vmatpush3.msra.mxu0 %v1800_v4  ;;  %v1319_v13 = vpop.f32.mrf.mxu1  ;;  %v1825_v59 = vld [vmem:[%s11706_s10 + $0xd40] sm:$0xff]  ;;  %v1824_v61 = vld [vmem:[%s11706_s10 + $0xd38] sm:$0xff]  ;;  %v1839_v52 = vld [vmem:[%s11706_s10 + $0xdb0] sm:$0xff] }
 0x180   :  { %6048 = vmatprep.subr.mxu1 %v1771_v53  ;;  %6062 = vmatprep.subr.mxu0 %v1815_v5  ;;  %v1326_v7 = vpop.permute.xlu1 %1325  ;;  %v1787_v4 = vld [vmem:[%s11706_s10 + $0xc10] sm:$0xff]  ;;  %v6941_v13 = vld [vmem:[%s11699_s3 + $0x64] ss:$252 sps:$4 sm:$0xff]  }
 0x181   :  { %6049 = vmatpush3.msra.mxu1 %v1755_v9  ;;  %6063 = vmatpush3.msra.mxu0 %v1799_v10  ;;  %v1333_v19 = vmul.f32 %v1326_v7, %v1315_v63  ;;  %v1840_v63 = vld [vmem:[%s11706_s10 + $0xdb8] sm:$0xff]  ;;  %v1823_v53 = vld [vmem:[%s11706_s10 + $0xd30] sm:$0xff]  ;;  %v1838_v9 = vld [vmem:[%s11706_s10 + $0xda8] sm:$0xff] }
 0x182   :  { %6050 = vmatprep.subr.mxu1 %v1770_v25  ;;  %6064 = vmatprep.subr.mxu0 %v1814_v12  ;;  %v1786_v10 = vld [vmem:[%s11706_s10 + $0xc08] sm:$0xff]  ;;  %v1801_v25 = vld [vmem:[%s11706_s10 + $0xc80] sm:$0xff] }
 0x183   :  { %6051 = vmatpush3.msra.mxu1 %v1754_v14  ;;  %6065 = vmatpush3.msra.mxu0 %v1798_v15  ;;  %v9395_v24 = vadd.f32 %v1333_v19, %v8443_v6  ;;  %v1832_v6 = vld [vmem:[%s11706_s10 + $0xd78] sm:$0xff]  ;;  %v1837_v12 = vld [vmem:[%s11706_s10 + $0xda0] sm:$0xff] }
 0x184   :  { %6052 = vmatprep.subr.mxu1 %v1769_v17  ;;  %6066 = vmatprep.subr.mxu0 %v1813_v18  ;;  %v1331_v30 = vpop.permute.xlu1 %1330  ;;  %v1785_v14 = vld [vmem:[%s11706_s10 + $0xc00] sm:$0xff]  ;;  %v1880_v19 = vld [vmem:[%s11706_s10 + $0xef8] sm:$0xff] }
 0x185   :  { %11711 = vst [vmem:[#allocation5_spill] sm:$0xff] %v9395_v24  ;;  %6053 = vmatpush3.msra.mxu1 %v1753_v21  ;;  %3595 = vmatprep.mubr.bf16.mxu1 %v6938_v0  ;;  %v1334_v31 = vmul.f32 %v1331_v30, %v1318_v11  ;;  %v1822_v11 = vld [vmem:[%s11706_s10 + $0xd28] sm:$0xff]  ;;  %v6939_v15 = vld [vmem:[%s11699_s3 + $0x60] ss:$252 sps:$4 sm:$0xff]   ;;  %v1835_v30 = vld [vmem:[%s11706_s10 + $0xd90] sm:$0xff] }
 0x186   :  { %6067 = vmatpush3.msra.mxu0 %v1797_v23  ;;  %3596 = vmatmul.mubr.bf16.vlgmr.msra.gmra.mxu1 %v6936_v22  ;;  %v1821_v18 = vld [vmem:[%s11706_s10 + $0xd20] sm:$0xff]  ;;  %v1836_v0 = vld [vmem:[%s11706_s10 + $0xd98] sm:$0xff] }
 0x187   :  { %6068 = vmatprep.subr.mxu0 %v1812_v26  ;;  %6098 = vmatprep.subr.mxu1 %v1848_v27  ;;  %v9422_v36 = vadd.f32 %v1334_v31, %v8470_v20  ;;  %v1830_v20 = vld [vmem:[%s11706_s10 + $0xd68] sm:$0xff]  ;;  %v1820_v22 = vld [vmem:[%s11706_s10 + $0xd18] sm:$0xff] }
 0x188   :  { %6069 = vmatpush3.msra.mxu0 %v1796_v16  ;;  %6099 = vmatpush3.msra.mxu1 %v1832_v6  ;;  %v1864_v23 = vld [vmem:[%s11706_s10 + $0xe78] sm:$0xff]  ;;  %v1879_v16 = vld [vmem:[%s11706_s10 + $0xef0] sm:$0xff] }
 0x189   :  { %11712 = vst [vmem:[#allocation6_spill] sm:$0xff] %v9422_v36  ;;  %6070 = vmatprep.subr.mxu0 %v1811_v32  ;;  %6100 = vmatprep.subr.mxu1 %v1847_v33  ;;  %v1819_v32 = vld [vmem:[%s11706_s10 + $0xd10] sm:$0xff] }
 0x18a   :  { %6071 = vmatpush3.msra.mxu0 %v1795_v34  ;;  %6101 = vmatpush3.msra.mxu1 %v1831_v35  ;;  %v1863_v33 = vld [vmem:[%s11706_s10 + $0xe70] sm:$0xff]  ;;  %v1834_v35 = vld [vmem:[%s11706_s10 + $0xd88] sm:$0xff] }
 0x18b   :  { %6072 = vmatprep.subr.mxu0 %v1810_v37  ;;  %6102 = vmatprep.subr.mxu1 %v1846_v39  ;;  %v1878_v37 = vld [vmem:[%s11706_s10 + $0xee8] sm:$0xff] }
 0x18c   :  { %6073 = vmatpush3.msra.mxu0 %v1794_v40  ;;  %6103 = vmatpush3.msra.mxu1 %v1830_v20  ;;  %v1818_v40 = vld [vmem:[%s11706_s10 + $0xd08] sm:$0xff] }
 0x18d   :  { %6074 = vmatprep.subr.mxu0 %v1809_v41  ;;  %6104 = vmatprep.subr.mxu1 %v1845_v28  ;;  %v1862_v20 = vld [vmem:[%s11706_s10 + $0xe68] sm:$0xff] }
 0x18e   :  { %6075 = vmatpush3.msra.mxu0 %v1793_v43  ;;  %6105 = vmatpush3.msra.mxu1 %v1829_v44  ;;  %v1833_v43 = vld [vmem:[%s11706_s10 + $0xd80] sm:$0xff] }
 0x18f   :  { %6076 = vmatprep.subr.mxu0 %v1808_v29  ;;  %6106 = vmatprep.subr.mxu1 %v1844_v45  ;;  %v1877_v44 = vld [vmem:[%s11706_s10 + $0xee0] sm:$0xff]  ;;  %v6944_v29 = vld [vmem:[%s11699_s3 + $0x6c] ss:$252 sps:$4 sm:$0xff]  }
 0x190   :  { %6077 = vmatpush3.msra.mxu0 %v1792_v46  ;;  %6107 = vmatpush3.msra.mxu1 %v1828_v47  ;;  %v1817_v45 = vld [vmem:[%s11706_s10 + $0xd00] sm:$0xff] }
 0x191   :  { %6078 = vmatprep.subr.mxu0 %v1807_v48  ;;  %6108 = vmatprep.subr.mxu1 %v1843_v49  ;;  %v6942_v46 = vld [vmem:[%s11699_s3 + $0x68] ss:$252 sps:$4 sm:$0xff]   ;;  %v1876_v49 = vld [vmem:[%s11706_s10 + $0xed8] sm:$0xff] }
 0x192   :  { %6079 = vmatpush3.msra.mxu0 %v1791_v50  ;;  %6109 = vmatpush3.msra.mxu1 %v1827_v51  ;;  %v5636_v60 = vpop.f32.mrf.mxu0  ;;  %v1861_v48 = vld [vmem:[%s11706_s10 + $0xe60] sm:$0xff]  ;;  %v1912_v50 = vld [vmem:[%s11706_s10 + $0xff8] sm:$0xff] }
 0x193   :  { %6080 = vmatprep.subr.mxu0 %v1806_v42  ;;  %6110 = vmatprep.subr.mxu1 %v1842_v54  ;;  %v1860_v51 = vld [vmem:[%s11706_s10 + $0xe58] sm:$0xff]  ;;  %v1875_v54 = vld [vmem:[%s11706_s10 + $0xed0] sm:$0xff] }
 0x194   :  { %6081 = vmatpush3.msra.mxu0 %v1790_v38  ;;  %6111 = vmatpush3.msra.mxu1 %v1826_v55  ;;  %v5637_v5 = vpop.f32.mrf.mxu0  ;;  %v1896_v42 = vld [vmem:[%s11706_s10 + $0xf78] sm:$0xff]  ;;  %v1911_v38 = vld [vmem:[%s11706_s10 + $0xff0] sm:$0xff] }
 0x195   :  { %6082 = vmatprep.subr.mxu0 %v1805_v56  ;;  %6112 = vmatprep.subr.mxu1 %v1841_v57  ;;  %v5638_v26 = vadd.f32 %v5637_v5, %v5636_v60  ;;  %v1859_v55 = vld [vmem:[%s11706_s10 + $0xe50] sm:$0xff]  ;;  %v1874_v57 = vld [vmem:[%s11706_s10 + $0xec8] sm:$0xff] }
 0x196   :  { %6083 = vmatpush3.msra.mxu0 %v1789_v58  ;;  %6113 = vmatpush3.msra.mxu1 %v1825_v59  ;;  %v5639_v7 = vpop.f32.mrf.mxu0  ;;  %v1895_v56 = vld [vmem:[%s11706_s10 + $0xf70] sm:$0xff]  ;;  %v1910_v58 = vld [vmem:[%s11706_s10 + $0xfe8] sm:$0xff] }
 0x197   :  { %6084 = vmatprep.subr.mxu0 %v1804_v62  ;;  %6114 = vmatprep.subr.mxu1 %v1840_v63  ;;  %v1858_v59 = vld [vmem:[%s11706_s10 + $0xe48] sm:$0xff]  ;;  %v1873_v62 = vld [vmem:[%s11706_s10 + $0xec0] sm:$0xff]  ;;  %v1871_v5 = vld [vmem:[%s11706_s10 + $0xeb0] sm:$0xff] }
 0x198   :  { %6085 = vmatpush3.msra.mxu0 %v1788_v1  ;;  %6115 = vmatpush3.msra.mxu1 %v1824_v61  ;;  %v5640_v6 = vpop.f32.mrf.mxu0  ;;  %v1894_v60 = vld [vmem:[%s11706_s10 + $0xf68] sm:$0xff]  ;;  %v1909_v63 = vld [vmem:[%s11706_s10 + $0xfe0] sm:$0xff] }
 0x199   :  { %6086 = vmatprep.subr.mxu0 %v1803_v3  ;;  %6116 = vmatprep.subr.mxu1 %v1839_v52  ;;  %v5641_v41 = vadd.f32 %v5640_v6, %v5639_v7  ;;  %v1857_v1 = vld [vmem:[%s11706_s10 + $0xe40] sm:$0xff]  ;;  %v1872_v3 = vld [vmem:[%s11706_s10 + $0xeb8] sm:$0xff]  ;;  %v1850_v6 = vld [vmem:[%s11706_s10 + $0xe08] sm:$0xff] }
 0x19a   :  { %6087 = vmatpush3.msra.mxu0 %v1787_v4  ;;  %6117 = vmatpush3.msra.mxu1 %v1823_v53  ;;  %v1893_v61 = vld [vmem:[%s11706_s10 + $0xf60] sm:$0xff]  ;;  %v1908_v52 = vld [vmem:[%s11706_s10 + $0xfd8] sm:$0xff] }
 0x19b   :  { %6088 = vmatprep.subr.mxu0 %v1802_v8  ;;  %6118 = vmatprep.subr.mxu1 %v1838_v9  ;;  %v5674_v17 = vpop.f32.mrf.mxu1  ;;  %v1856_v4 = vld [vmem:[%s11706_s10 + $0xe38] sm:$0xff]  ;;  %v1907_v8 = vld [vmem:[%s11706_s10 + $0xfd0] sm:$0xff]  ;;  %v1853_v7 = vld [vmem:[%s11706_s10 + $0xe20] sm:$0xff] }
 0x19c   :  { %6089 = vmatpush3.msra.mxu0 %v1786_v10  ;;  %6119 = vmatpush3.msra.mxu1 %v1822_v11  ;;  %v1892_v53 = vld [vmem:[%s11706_s10 + $0xf58] sm:$0xff]  ;;  %v1855_v9 = vld [vmem:[%s11706_s10 + $0xe30] sm:$0xff]  ;;  %v1870_v11 = vld [vmem:[%s11706_s10 + $0xea8] sm:$0xff] }
 0x19d   :  { %6090 = vmatprep.subr.mxu0 %v1801_v25  ;;  %6120 = vmatprep.subr.mxu1 %v1837_v12  ;;  %v5675_v21 = vpop.f32.mrf.mxu1  ;;  %v1891_v10 = vld [vmem:[%s11706_s10 + $0xf50] sm:$0xff]  ;;  %v1906_v25 = vld [vmem:[%s11706_s10 + $0xfc8] sm:$0xff] }
 0x19e   :  { %6091 = vmatpush3.msra.mxu0 %v1785_v14  ;;  %3668 = vmatprep.mubr.bf16.mxu0 %v6941_v13  ;;  %v5676_v27 = vadd.f32 %v5675_v21, %v5674_v17  ;;  %v1854_v12 = vld [vmem:[%s11706_s10 + $0xe28] sm:$0xff]  ;;  %v1869_v14 = vld [vmem:[%s11706_s10 + $0xea0] sm:$0xff]  ;;  %v1888_v21 = vld [vmem:[%s11706_s10 + $0xf38] sm:$0xff] }
 0x19f   :  { %6121 = vmatpush3.msra.mxu1 %v1821_v18  ;;  %3669 = vmatmul.mubr.bf16.vlgmr.msra.gmra.mxu0 %v6939_v15  ;;  %v5677_v31 = vpop.f32.mrf.mxu1  ;;  %v1890_v13 = vld [vmem:[%s11706_s10 + $0xf48] sm:$0xff]  ;;  %v1905_v15 = vld [vmem:[%s11706_s10 + $0xfc0] sm:$0xff]  ;;  %v1868_v18 = vld [vmem:[%s11706_s10 + $0xe98] sm:$0xff] }
 0x1a0   :  { %6122 = vmatprep.subr.mxu1 %v1836_v0  ;;  %6136 = vmatprep.subr.mxu0 %v1880_v19  ;;  %v9574_v34 = vadd.f32 %v5676_v27, %v5638_v26  ;;  %v1889_v17 = vld [vmem:[%s11706_s10 + $0xf40] sm:$0xff]  ;;  %v1904_v0 = vld [vmem:[%s11706_s10 + $0xfb8] sm:$0xff]  ;;  %v1851_v26 = vld [vmem:[%s11706_s10 + $0xe10] sm:$0xff] }
 0x1a1   :  { %6123 = vmatpush3.msra.mxu1 %v1820_v22  ;;  %6137 = vmatpush3.msra.mxu0 %v1864_v23  ;;  %v5678_v39 = vpop.f32.mrf.mxu1  ;;  %v1852_v19 = vld [vmem:[%s11706_s10 + $0xe18] sm:$0xff]  ;;  %v1867_v22 = vld [vmem:[%s11706_s10 + $0xe90] sm:$0xff] }
 0x1a2   :  { %6124 = vmatprep.subr.mxu1 %v1835_v30  ;;  %6138 = vmatprep.subr.mxu0 %v1879_v16  ;;  %v5679_v28 = vadd.f32 %v5678_v39, %v5677_v31  ;;  %v1903_v23 = vld [vmem:[%s11706_s10 + $0xfb0] sm:$0xff]  ;;  %v1866_v30 = vld [vmem:[%s11706_s10 + $0xe88] sm:$0xff] }
 0x1a3   :  { %6125 = vmatpush3.msra.mxu1 %v1819_v32  ;;  %6139 = vmatpush3.msra.mxu0 %v1863_v33  ;;  %v1887_v27 = vld [vmem:[%s11706_s10 + $0xf30] sm:$0xff]  ;;  %v1902_v16 = vld [vmem:[%s11706_s10 + $0xfa8] sm:$0xff]  ;;  %v1865_v32 = vld [vmem:[%s11706_s10 + $0xe80] sm:$0xff] }
 0x1a4   :  { %6126 = vmatprep.subr.mxu1 %v1834_v35  ;;  %6140 = vmatprep.subr.mxu0 %v1878_v37  ;;  %v9603_v47 = vadd.f32 %v5679_v28, %v5641_v41  ;;  %v1886_v31 = vld [vmem:[%s11706_s10 + $0xf28] sm:$0xff]  ;;  %v1901_v33 = vld [vmem:[%s11706_s10 + $0xfa0] sm:$0xff]  ;;  %v6947_v35 = vld [vmem:[%s11699_s3 + $0x74] ss:$252 sps:$4 sm:$0xff]  }
 0x1a5   :  { %6127 = vmatpush3.msra.mxu1 %v1818_v40  ;;  %6141 = vmatpush3.msra.mxu0 %v1862_v20  ;;  %v1849_v37 = vld [vmem:[%s11706_s10 + $0xe00] sm:$0xff]  ;;  %v6945_v39 = vld [vmem:[%s11699_s3 + $0x70] ss:$252 sps:$4 sm:$0xff]   ;;  %v1900_v20 = vld [vmem:[%s11706_s10 + $0xf98] sm:$0xff] }
 0x1a6   :  { %6128 = vmatprep.subr.mxu1 %v1833_v43  ;;  %6142 = vmatprep.subr.mxu0 %v1877_v44  ;;  %v1885_v40 = vld [vmem:[%s11706_s10 + $0xf20] sm:$0xff]  ;;  %v1944_v41 = vld [vmem:[%s11706_s10 + $0x10f8] sm:$0xff]  ;;  %v1899_v44 = vld [vmem:[%s11706_s10 + $0xf90] sm:$0xff] }
 0x1a7   :  { %6129 = vmatpush3.msra.mxu1 %v1817_v45  ;;  %3741 = vmatprep.mubr.bf16.mxu1 %v6944_v29  ;;  %v1884_v28 = vld [vmem:[%s11706_s10 + $0xf18] sm:$0xff]  ;;  %v1943_v29 = vld [vmem:[%s11706_s10 + $0x10f0] sm:$0xff] }
 0x1a8   :  { %6143 = vmatpush3.msra.mxu0 %v1861_v48  ;;  %3742 = vmatmul.mubr.bf16.vlgmr.msra.gmra.mxu1 %v6942_v46  ;;  %v1928_v43 = vld [vmem:[%s11706_s10 + $0x1078] sm:$0xff]  ;;  %v1883_v45 = vld [vmem:[%s11706_s10 + $0xf10] sm:$0xff]  ;;  %v1898_v48 = vld [vmem:[%s11706_s10 + $0xf88] sm:$0xff] }
 0x1a9   :  { %6144 = vmatprep.subr.mxu0 %v1876_v49  ;;  %6174 = vmatprep.subr.mxu1 %v1912_v50  ;;  %v1927_v46 = vld [vmem:[%s11706_s10 + $0x1070] sm:$0xff]  ;;  %v1942_v49 = vld [vmem:[%s11706_s10 + $0x10e8] sm:$0xff] }
 0x1aa   :  { %6145 = vmatpush3.msra.mxu0 %v1860_v51  ;;  %6175 = vmatpush3.msra.mxu1 %v1896_v42  ;;  %v1882_v50 = vld [vmem:[%s11706_s10 + $0xf08] sm:$0xff]  ;;  %v1897_v42 = vld [vmem:[%s11706_s10 + $0xf80] sm:$0xff] }
 0x1ab   :  { %6146 = vmatprep.subr.mxu0 %v1875_v54  ;;  %6176 = vmatprep.subr.mxu1 %v1911_v38  ;;  %v1926_v51 = vld [vmem:[%s11706_s10 + $0x1068] sm:$0xff]  ;;  %v1941_v54 = vld [vmem:[%s11706_s10 + $0x10e0] sm:$0xff]  ;;  %v6950_v38 = vld [vmem:[%s11699_s3 + $0x7c] ss:$252 sps:$4 sm:$0xff]  }
 0x1ac   :  { %6147 = vmatpush3.msra.mxu0 %v1859_v55  ;;  %6177 = vmatpush3.msra.mxu1 %v1895_v56  ;;  %v1881_v55 = vld [vmem:[%s11706_s10 + $0xf00] sm:$0xff]  ;;  %v6948_v56 = vld [vmem:[%s11699_s3 + $0x78] ss:$252 sps:$4 sm:$0xff]  }
 0x1ad   :  { %6148 = vmatprep.subr.mxu0 %v1874_v57  ;;  %6178 = vmatprep.subr.mxu1 %v1910_v58  ;;  %v1925_v57 = vld [vmem:[%s11706_s10 + $0x1060] sm:$0xff]  ;;  %v1940_v58 = vld [vmem:[%s11706_s10 + $0x10d8] sm:$0xff] }
 0x1ae   :  { %6149 = vmatpush3.msra.mxu0 %v1858_v59  ;;  %6179 = vmatpush3.msra.mxu1 %v1894_v60  ;;  %v1976_v59 = vld [vmem:[%s11706_s10 + $0x11f8] sm:$0xff] }
 0x1af   :  { %6150 = vmatprep.subr.mxu0 %v1873_v62  ;;  %6180 = vmatprep.subr.mxu1 %v1909_v63  ;;  %v1924_v60 = vld [vmem:[%s11706_s10 + $0x1058] sm:$0xff]  ;;  %v1939_v63 = vld [vmem:[%s11706_s10 + $0x10d0] sm:$0xff] }
 0x1b0   :  { %6151 = vmatpush3.msra.mxu0 %v1857_v1  ;;  %6181 = vmatpush3.msra.mxu1 %v1893_v61  ;;  %v1960_v62 = vld [vmem:[%s11706_s10 + $0x1178] sm:$0xff]  ;;  %v1975_v1 = vld [vmem:[%s11706_s10 + $0x11f0] sm:$0xff] }
 0x1b1   :  { %6152 = vmatprep.subr.mxu0 %v1872_v3  ;;  %6182 = vmatprep.subr.mxu1 %v1908_v52  ;;  %v1923_v61 = vld [vmem:[%s11706_s10 + $0x1050] sm:$0xff]  ;;  %v1938_v52 = vld [vmem:[%s11706_s10 + $0x10c8] sm:$0xff] }
 0x1b2   :  { %6153 = vmatpush3.msra.mxu0 %v1856_v4  ;;  %6183 = vmatpush3.msra.mxu1 %v1892_v53  ;;  %v1959_v3 = vld [vmem:[%s11706_s10 + $0x1170] sm:$0xff]  ;;  %v1974_v4 = vld [vmem:[%s11706_s10 + $0x11e8] sm:$0xff] }
 0x1b3   :  { %6154 = vmatprep.subr.mxu0 %v1871_v5  ;;  %6184 = vmatprep.subr.mxu1 %v1907_v8  ;;  %v1922_v53 = vld [vmem:[%s11706_s10 + $0x1048] sm:$0xff]  ;;  %v1937_v8 = vld [vmem:[%s11706_s10 + $0x10c0] sm:$0xff] }
 0x1b4   :  { %6155 = vmatpush3.msra.mxu0 %v1855_v9  ;;  %6185 = vmatpush3.msra.mxu1 %v1891_v10  ;;  %v1958_v5 = vld [vmem:[%s11706_s10 + $0x1168] sm:$0xff]  ;;  %v1973_v9 = vld [vmem:[%s11706_s10 + $0x11e0] sm:$0xff] }
 0x1b5   :  { %6156 = vmatprep.subr.mxu0 %v1870_v11  ;;  %6186 = vmatprep.subr.mxu1 %v1906_v25  ;;  %v1921_v10 = vld [vmem:[%s11706_s10 + $0x1040] sm:$0xff]  ;;  %v1936_v25 = vld [vmem:[%s11706_s10 + $0x10b8] sm:$0xff] }
 0x1b6   :  { %6157 = vmatpush3.msra.mxu0 %v1854_v12  ;;  %6187 = vmatpush3.msra.mxu1 %v1890_v13  ;;  %v1957_v11 = vld [vmem:[%s11706_s10 + $0x1160] sm:$0xff]  ;;  %v1972_v12 = vld [vmem:[%s11706_s10 + $0x11d8] sm:$0xff] }
 0x1b7   :  { %6158 = vmatprep.subr.mxu0 %v1869_v14  ;;  %6188 = vmatprep.subr.mxu1 %v1905_v15  ;;  %v1920_v13 = vld [vmem:[%s11706_s10 + $0x1038] sm:$0xff]  ;;  %v1935_v15 = vld [vmem:[%s11706_s10 + $0x10b0] sm:$0xff] }
 0x1b8   :  { %6159 = vmatpush3.msra.mxu0 %v1853_v7  ;;  %6189 = vmatpush3.msra.mxu1 %v1889_v17  ;;  %v1956_v14 = vld [vmem:[%s11706_s10 + $0x1158] sm:$0xff]  ;;  %v1971_v7 = vld [vmem:[%s11706_s10 + $0x11d0] sm:$0xff] }
 0x1b9   :  { %6160 = vmatprep.subr.mxu0 %v1868_v18  ;;  %6190 = vmatprep.subr.mxu1 %v1904_v0  ;;  %v1919_v17 = vld [vmem:[%s11706_s10 + $0x1030] sm:$0xff]  ;;  %v1934_v0 = vld [vmem:[%s11706_s10 + $0x10a8] sm:$0xff] }
 0x1ba   :  { %6161 = vmatpush3.msra.mxu0 %v1852_v19  ;;  %6191 = vmatpush3.msra.mxu1 %v1888_v21  ;;  %v1955_v18 = vld [vmem:[%s11706_s10 + $0x1150] sm:$0xff]  ;;  %v1970_v19 = vld [vmem:[%s11706_s10 + $0x11c8] sm:$0xff] }
 0x1bb   :  { %6162 = vmatprep.subr.mxu0 %v1867_v22  ;;  %6192 = vmatprep.subr.mxu1 %v1903_v23  ;;  %v1918_v21 = vld [vmem:[%s11706_s10 + $0x1028] sm:$0xff]  ;;  %v1933_v23 = vld [vmem:[%s11706_s10 + $0x10a0] sm:$0xff] }
 0x1bc   :  { %6163 = vmatpush3.msra.mxu0 %v1851_v26  ;;  %6193 = vmatpush3.msra.mxu1 %v1887_v27  ;;  %v1954_v22 = vld [vmem:[%s11706_s10 + $0x1148] sm:$0xff]  ;;  %v1969_v26 = vld [vmem:[%s11706_s10 + $0x11c0] sm:$0xff] }
 0x1bd   :  { %6164 = vmatprep.subr.mxu0 %v1866_v30  ;;  %6194 = vmatprep.subr.mxu1 %v1902_v16  ;;  %v1917_v27 = vld [vmem:[%s11706_s10 + $0x1020] sm:$0xff]  ;;  %v1932_v16 = vld [vmem:[%s11706_s10 + $0x1098] sm:$0xff] }
 0x1be   :  { %6165 = vmatpush3.msra.mxu0 %v1850_v6  ;;  %6195 = vmatpush3.msra.mxu1 %v1886_v31  ;;  %v1953_v30 = vld [vmem:[%s11706_s10 + $0x1140] sm:$0xff]  ;;  %v1968_v6 = vld [vmem:[%s11706_s10 + $0x11b8] sm:$0xff] }
 0x1bf   :  { %6166 = vmatprep.subr.mxu0 %v1865_v32  ;;  %6196 = vmatprep.subr.mxu1 %v1901_v33  ;;  %v1916_v31 = vld [vmem:[%s11706_s10 + $0x1018] sm:$0xff]  ;;  %v1931_v33 = vld [vmem:[%s11706_s10 + $0x1090] sm:$0xff] }
 0x1c0   :  { %6167 = vmatpush3.msra.mxu0 %v1849_v37  ;;  %3814 = vmatprep.mubr.bf16.mxu0 %v6947_v35  ;;  %v1952_v32 = vld [vmem:[%s11706_s10 + $0x1138] sm:$0xff]  ;;  %v1967_v35 = vld [vmem:[%s11706_s10 + $0x11b0] sm:$0xff] }
 0x1c1   :  { %6197 = vmatpush3.msra.mxu1 %v1885_v40  ;;  %3815 = vmatmul.mubr.bf16.vlgmr.msra.gmra.mxu0 %v6945_v39  ;;  %v1915_v37 = vld [vmem:[%s11706_s10 + $0x1010] sm:$0xff]  ;;  %v1930_v40 = vld [vmem:[%s11706_s10 + $0x1088] sm:$0xff] }
 0x1c2   :  { %6198 = vmatprep.subr.mxu1 %v1900_v20  ;;  %6212 = vmatprep.subr.mxu0 %v1944_v41  ;;  %v1951_v39 = vld [vmem:[%s11706_s10 + $0x1130] sm:$0xff]  ;;  %v1966_v20 = vld [vmem:[%s11706_s10 + $0x11a8] sm:$0xff] }
 0x1c3   :  { %6199 = vmatpush3.msra.mxu1 %v1884_v28  ;;  %6213 = vmatpush3.msra.mxu0 %v1928_v43  ;;  %v1914_v41 = vld [vmem:[%s11706_s10 + $0x1008] sm:$0xff]  ;;  %v1929_v43 = vld [vmem:[%s11706_s10 + $0x1080] sm:$0xff] }
 0x1c4   :  { %6200 = vmatprep.subr.mxu1 %v1899_v44  ;;  %6214 = vmatprep.subr.mxu0 %v1943_v29  ;;  %v1950_v28 = vld [vmem:[%s11706_s10 + $0x1128] sm:$0xff]  ;;  %v1965_v44 = vld [vmem:[%s11706_s10 + $0x11a0] sm:$0xff] }
 0x1c5   :  { %6201 = vmatpush3.msra.mxu1 %v1883_v45  ;;  %6215 = vmatpush3.msra.mxu0 %v1927_v46  ;;  %v6953_v29 = vld [vmem:[%s11699_s3 + $0x84] ss:$252 sps:$4 sm:$0xff]  }
 0x1c6   :  { %6202 = vmatprep.subr.mxu1 %v1898_v48  ;;  %6216 = vmatprep.subr.mxu0 %v1942_v49  ;;  %v1913_v45 = vld [vmem:[%s11706_s10 + $0x1000] sm:$0xff]  ;;  %v1964_v49 = vld [vmem:[%s11706_s10 + $0x1198] sm:$0xff] }
 0x1c7   :  { %6203 = vmatpush3.msra.mxu1 %v1882_v50  ;;  %6217 = vmatpush3.msra.mxu0 %v1926_v51  ;;  %v6951_v46 = vld [vmem:[%s11699_s3 + $0x80] ss:$252 sps:$4 sm:$0xff]  }
 0x1c8   :  { %6204 = vmatprep.subr.mxu1 %v1897_v42  ;;  %6218 = vmatprep.subr.mxu0 %v1941_v54  ;;  %v1949_v48 = vld [vmem:[%s11706_s10 + $0x1120] sm:$0xff]  ;;  %v2008_v50 = vld [vmem:[%s11706_s10 + $0x12f8] sm:$0xff]  ;;  %v1963_v54 = vld [vmem:[%s11706_s10 + $0x1190] sm:$0xff] }
 0x1c9   :  { %6205 = vmatpush3.msra.mxu1 %v1881_v55  ;;  %3887 = vmatprep.mubr.bf16.mxu1 %v6950_v38  ;;  %v1948_v51 = vld [vmem:[%s11706_s10 + $0x1118] sm:$0xff]  ;;  %v2007_v38 = vld [vmem:[%s11706_s10 + $0x12f0] sm:$0xff] }
 0x1ca   :  { %6219 = vmatpush3.msra.mxu0 %v1925_v57  ;;  %3888 = vmatmul.mubr.bf16.vlgmr.msra.gmra.mxu1 %v6948_v56  ;;  %v1992_v42 = vld [vmem:[%s11706_s10 + $0x1278] sm:$0xff]  ;;  %v1947_v55 = vld [vmem:[%s11706_s10 + $0x1110] sm:$0xff]  ;;  %v1962_v57 = vld [vmem:[%s11706_s10 + $0x1188] sm:$0xff] }
 0x1cb   :  { %6220 = vmatprep.subr.mxu0 %v1940_v58  ;;  %6250 = vmatprep.subr.mxu1 %v1976_v59  ;;  %v1991_v56 = vld [vmem:[%s11706_s10 + $0x1270] sm:$0xff]  ;;  %v2006_v58 = vld [vmem:[%s11706_s10 + $0x12e8] sm:$0xff] }
 0x1cc   :  { %6221 = vmatpush3.msra.mxu0 %v1924_v60  ;;  %6251 = vmatpush3.msra.mxu1 %v1960_v62  ;;  %v1946_v59 = vld [vmem:[%s11706_s10 + $0x1108] sm:$0xff]  ;;  %v1961_v62 = vld [vmem:[%s11706_s10 + $0x1180] sm:$0xff] }
 0x1cd   :  { %6222 = vmatprep.subr.mxu0 %v1939_v63  ;;  %6252 = vmatprep.subr.mxu1 %v1975_v1  ;;  %v1990_v60 = vld [vmem:[%s11706_s10 + $0x1268] sm:$0xff]  ;;  %v2005_v63 = vld [vmem:[%s11706_s10 + $0x12e0] sm:$0xff] }
 0x1ce   :  { %6223 = vmatpush3.msra.mxu0 %v1923_v61  ;;  %6253 = vmatpush3.msra.mxu1 %v1959_v3  ;;  %v6956_v1 = vld [vmem:[%s11699_s3 + $0x8c] ss:$252 sps:$4 sm:$0xff]   ;;  %v1945_v61 = vld [vmem:[%s11706_s10 + $0x1100] sm:$0xff] }
 0x1cf   :  { %6224 = vmatprep.subr.mxu0 %v1938_v52  ;;  %6254 = vmatprep.subr.mxu1 %v1974_v4  ;;  %v6954_v3 = vld [vmem:[%s11699_s3 + $0x88] ss:$252 sps:$4 sm:$0xff]   ;;  %v2004_v4 = vld [vmem:[%s11706_s10 + $0x12d8] sm:$0xff] }
 0x1d0   :  { %6225 = vmatpush3.msra.mxu0 %v1922_v53  ;;  %6255 = vmatpush3.msra.mxu1 %v1958_v5  ;;  %v1989_v52 = vld [vmem:[%s11706_s10 + $0x1260] sm:$0xff]  ;;  %v2040_v53 = vld [vmem:[%s11706_s10 + $0x13f8] sm:$0xff] }
 0x1d1   :  { %6226 = vmatprep.subr.mxu0 %v1937_v8  ;;  %6256 = vmatprep.subr.mxu1 %v1973_v9  ;;  %v1988_v5 = vld [vmem:[%s11706_s10 + $0x1258] sm:$0xff]  ;;  %v2003_v9 = vld [vmem:[%s11706_s10 + $0x12d0] sm:$0xff] }
 0x1d2   :  { %6227 = vmatpush3.msra.mxu0 %v1921_v10  ;;  %6257 = vmatpush3.msra.mxu1 %v1957_v11  ;;  %v2024_v8 = vld [vmem:[%s11706_s10 + $0x1378] sm:$0xff]  ;;  %v2039_v10 = vld [vmem:[%s11706_s10 + $0x13f0] sm:$0xff] }
 0x1d3   :  { %6228 = vmatprep.subr.mxu0 %v1936_v25  ;;  %6258 = vmatprep.subr.mxu1 %v1972_v12  ;;  %v1987_v11 = vld [vmem:[%s11706_s10 + $0x1250] sm:$0xff]  ;;  %v2002_v12 = vld [vmem:[%s11706_s10 + $0x12c8] sm:$0xff] }
 0x1d4   :  { %6229 = vmatpush3.msra.mxu0 %v1920_v13  ;;  %6259 = vmatpush3.msra.mxu1 %v1956_v14  ;;  %v2023_v25 = vld [vmem:[%s11706_s10 + $0x1370] sm:$0xff]  ;;  %v2038_v13 = vld [vmem:[%s11706_s10 + $0x13e8] sm:$0xff] }
 0x1d5   :  { %6230 = vmatprep.subr.mxu0 %v1935_v15  ;;  %6260 = vmatprep.subr.mxu1 %v1971_v7  ;;  %v1986_v14 = vld [vmem:[%s11706_s10 + $0x1248] sm:$0xff]  ;;  %v2001_v7 = vld [vmem:[%s11706_s10 + $0x12c0] sm:$0xff] }
 0x1d6   :  { %6231 = vmatpush3.msra.mxu0 %v1919_v17  ;;  %6261 = vmatpush3.msra.mxu1 %v1955_v18  ;;  %v2022_v15 = vld [vmem:[%s11706_s10 + $0x1368] sm:$0xff]  ;;  %v2037_v17 = vld [vmem:[%s11706_s10 + $0x13e0] sm:$0xff] }
 0x1d7   :  { %6232 = vmatprep.subr.mxu0 %v1934_v0  ;;  %6262 = vmatprep.subr.mxu1 %v1970_v19  ;;  %v1985_v18 = vld [vmem:[%s11706_s10 + $0x1240] sm:$0xff]  ;;  %v2000_v19 = vld [vmem:[%s11706_s10 + $0x12b8] sm:$0xff] }
 0x1d8   :  { %6233 = vmatpush3.msra.mxu0 %v1918_v21  ;;  %6263 = vmatpush3.msra.mxu1 %v1954_v22  ;;  %v2021_v0 = vld [vmem:[%s11706_s10 + $0x1360] sm:$0xff]  ;;  %v2036_v21 = vld [vmem:[%s11706_s10 + $0x13d8] sm:$0xff] }
 0x1d9   :  { %6234 = vmatprep.subr.mxu0 %v1933_v23  ;;  %6264 = vmatprep.subr.mxu1 %v1969_v26  ;;  %v1984_v22 = vld [vmem:[%s11706_s10 + $0x1238] sm:$0xff]  ;;  %v1999_v26 = vld [vmem:[%s11706_s10 + $0x12b0] sm:$0xff] }
 0x1da   :  { %6235 = vmatpush3.msra.mxu0 %v1917_v27  ;;  %6265 = vmatpush3.msra.mxu1 %v1953_v30  ;;  %v2020_v23 = vld [vmem:[%s11706_s10 + $0x1358] sm:$0xff]  ;;  %v2035_v27 = vld [vmem:[%s11706_s10 + $0x13d0] sm:$0xff] }
 0x1db   :  { %6236 = vmatprep.subr.mxu0 %v1932_v16  ;;  %6266 = vmatprep.subr.mxu1 %v1968_v6  ;;  %v1983_v30 = vld [vmem:[%s11706_s10 + $0x1230] sm:$0xff]  ;;  %v1998_v6 = vld [vmem:[%s11706_s10 + $0x12a8] sm:$0xff] }
 0x1dc   :  { %6237 = vmatpush3.msra.mxu0 %v1916_v31  ;;  %6267 = vmatpush3.msra.mxu1 %v1952_v32  ;;  %v2019_v16 = vld [vmem:[%s11706_s10 + $0x1350] sm:$0xff]  ;;  %v2034_v31 = vld [vmem:[%s11706_s10 + $0x13c8] sm:$0xff] }
 0x1dd   :  { %6238 = vmatprep.subr.mxu0 %v1931_v33  ;;  %6268 = vmatprep.subr.mxu1 %v1967_v35  ;;  %v1982_v32 = vld [vmem:[%s11706_s10 + $0x1228] sm:$0xff]  ;;  %v1997_v35 = vld [vmem:[%s11706_s10 + $0x12a0] sm:$0xff] }
 0x1de   :  { %6239 = vmatpush3.msra.mxu0 %v1915_v37  ;;  %6269 = vmatpush3.msra.mxu1 %v1951_v39  ;;  %v2018_v33 = vld [vmem:[%s11706_s10 + $0x1348] sm:$0xff]  ;;  %v2033_v37 = vld [vmem:[%s11706_s10 + $0x13c0] sm:$0xff] }
 0x1df   :  { %6240 = vmatprep.subr.mxu0 %v1930_v40  ;;  %6270 = vmatprep.subr.mxu1 %v1966_v20  ;;  %v1981_v39 = vld [vmem:[%s11706_s10 + $0x1220] sm:$0xff]  ;;  %v1996_v20 = vld [vmem:[%s11706_s10 + $0x1298] sm:$0xff] }
 0x1e0   :  { %6241 = vmatpush3.msra.mxu0 %v1914_v41  ;;  %6271 = vmatpush3.msra.mxu1 %v1950_v28  ;;  %v2017_v40 = vld [vmem:[%s11706_s10 + $0x1340] sm:$0xff]  ;;  %v2032_v41 = vld [vmem:[%s11706_s10 + $0x13b8] sm:$0xff] }
 0x1e1   :  { %6242 = vmatprep.subr.mxu0 %v1929_v43  ;;  %6272 = vmatprep.subr.mxu1 %v1965_v44  ;;  %v1980_v28 = vld [vmem:[%s11706_s10 + $0x1218] sm:$0xff]  ;;  %v1995_v44 = vld [vmem:[%s11706_s10 + $0x1290] sm:$0xff] }
 0x1e2   :  { %6243 = vmatpush3.msra.mxu0 %v1913_v45  ;;  %3960 = vmatprep.mubr.bf16.mxu0 %v6953_v29  ;;  %v2016_v43 = vld [vmem:[%s11706_s10 + $0x1338] sm:$0xff]  ;;  %v2031_v29 = vld [vmem:[%s11706_s10 + $0x13b0] sm:$0xff] }
 0x1e3   :  { %6273 = vmatpush3.msra.mxu1 %v1949_v48  ;;  %3961 = vmatmul.mubr.bf16.vlgmr.msra.gmra.mxu0 %v6951_v46  ;;  %v1979_v45 = vld [vmem:[%s11706_s10 + $0x1210] sm:$0xff]  ;;  %v1994_v48 = vld [vmem:[%s11706_s10 + $0x1288] sm:$0xff] }
 0x1e4   :  { %6274 = vmatprep.subr.mxu1 %v1964_v49  ;;  %6288 = vmatprep.subr.mxu0 %v2008_v50  ;;  %v2015_v46 = vld [vmem:[%s11706_s10 + $0x1330] sm:$0xff]  ;;  %v2030_v49 = vld [vmem:[%s11706_s10 + $0x13a8] sm:$0xff] }
 0x1e5   :  { %6275 = vmatpush3.msra.mxu1 %v1948_v51  ;;  %6289 = vmatpush3.msra.mxu0 %v1992_v42  ;;  %v1978_v50 = vld [vmem:[%s11706_s10 + $0x1208] sm:$0xff]  ;;  %v1993_v42 = vld [vmem:[%s11706_s10 + $0x1280] sm:$0xff] }
 0x1e6   :  { %6276 = vmatprep.subr.mxu1 %v1963_v54  ;;  %6290 = vmatprep.subr.mxu0 %v2007_v38  ;;  %v2014_v51 = vld [vmem:[%s11706_s10 + $0x1328] sm:$0xff]  ;;  %v2029_v54 = vld [vmem:[%s11706_s10 + $0x13a0] sm:$0xff]  ;;  %v6959_v38 = vld [vmem:[%s11699_s3 + $0x94] ss:$252 sps:$4 sm:$0xff]  }
 0x1e7   :  { %6277 = vmatpush3.msra.mxu1 %v1947_v55  ;;  %6291 = vmatpush3.msra.mxu0 %v1991_v56  ;;  %v1977_v55 = vld [vmem:[%s11706_s10 + $0x1200] sm:$0xff]  ;;  %v6957_v56 = vld [vmem:[%s11699_s3 + $0x90] ss:$252 sps:$4 sm:$0xff]  }
 0x1e8   :  { %6278 = vmatprep.subr.mxu1 %v1962_v57  ;;  %6292 = vmatprep.subr.mxu0 %v2006_v58  ;;  %v2013_v57 = vld [vmem:[%s11706_s10 + $0x1320] sm:$0xff]  ;;  %v2028_v58 = vld [vmem:[%s11706_s10 + $0x1398] sm:$0xff] }
 0x1e9   :  { %6279 = vmatpush3.msra.mxu1 %v1946_v59  ;;  %6293 = vmatpush3.msra.mxu0 %v1990_v60  ;;  %v2072_v59 = vld [vmem:[%s11706_s10 + $0x14f8] sm:$0xff] }
 0x1ea   :  { %6280 = vmatprep.subr.mxu1 %v1961_v62  ;;  %6294 = vmatprep.subr.mxu0 %v2005_v63  ;;  %v2012_v60 = vld [vmem:[%s11706_s10 + $0x1318] sm:$0xff]  ;;  %v2027_v63 = vld [vmem:[%s11706_s10 + $0x1390] sm:$0xff] }
 0x1eb   :  { %6281 = vmatpush3.msra.mxu1 %v1945_v61  ;;  %4033 = vmatprep.mubr.bf16.mxu1 %v6956_v1  ;;  %v2056_v62 = vld [vmem:[%s11706_s10 + $0x1478] sm:$0xff]  ;;  %v2071_v1 = vld [vmem:[%s11706_s10 + $0x14f0] sm:$0xff] }
 0x1ec   :  { %6295 = vmatpush3.msra.mxu0 %v1989_v52  ;;  %4034 = vmatmul.mubr.bf16.vlgmr.msra.gmra.mxu1 %v6954_v3  ;;  %v2011_v61 = vld [vmem:[%s11706_s10 + $0x1310] sm:$0xff]  ;;  %v2026_v52 = vld [vmem:[%s11706_s10 + $0x1388] sm:$0xff] }
 0x1ed   :  { %6296 = vmatprep.subr.mxu0 %v2004_v4  ;;  %6326 = vmatprep.subr.mxu1 %v2040_v53  ;;  %v2055_v3 = vld [vmem:[%s11706_s10 + $0x1470] sm:$0xff]  ;;  %v2070_v4 = vld [vmem:[%s11706_s10 + $0x14e8] sm:$0xff] }
 0x1ee   :  { %6297 = vmatpush3.msra.mxu0 %v1988_v5  ;;  %6327 = vmatpush3.msra.mxu1 %v2024_v8  ;;  %v2010_v53 = vld [vmem:[%s11706_s10 + $0x1308] sm:$0xff]  ;;  %v2025_v8 = vld [vmem:[%s11706_s10 + $0x1380] sm:$0xff] }
 0x1ef   :  { %6298 = vmatprep.subr.mxu0 %v2003_v9  ;;  %6328 = vmatprep.subr.mxu1 %v2039_v10  ;;  %v2054_v5 = vld [vmem:[%s11706_s10 + $0x1468] sm:$0xff]  ;;  %v2069_v9 = vld [vmem:[%s11706_s10 + $0x14e0] sm:$0xff]  ;;  %v6962_v10 = vld [vmem:[%s11699_s3 + $0x9c] ss:$252 sps:$4 sm:$0xff]  }
 0x1f0   :  { %6299 = vmatpush3.msra.mxu0 %v1987_v11  ;;  %6329 = vmatpush3.msra.mxu1 %v2023_v25  ;;  %v2009_v11 = vld [vmem:[%s11706_s10 + $0x1300] sm:$0xff]  ;;  %v6960_v25 = vld [vmem:[%s11699_s3 + $0x98] ss:$252 sps:$4 sm:$0xff]  }
 0x1f1   :  { %6300 = vmatprep.subr.mxu0 %v2002_v12  ;;  %6330 = vmatprep.subr.mxu1 %v2038_v13  ;;  %v2053_v12 = vld [vmem:[%s11706_s10 + $0x1460] sm:$0xff]  ;;  %v2068_v13 = vld [vmem:[%s11706_s10 + $0x14d8] sm:$0xff] }
 0x1f2   :  { %6301 = vmatpush3.msra.mxu0 %v1986_v14  ;;  %6331 = vmatpush3.msra.mxu1 %v2022_v15  ;;  %v2104_v14 = vld [vmem:[%s11706_s10 + $0x15f8] sm:$0xff] }
 0x1f3   :  { %6302 = vmatprep.subr.mxu0 %v2001_v7  ;;  %6332 = vmatprep.subr.mxu1 %v2037_v17  ;;  %v2052_v15 = vld [vmem:[%s11706_s10 + $0x1458] sm:$0xff]  ;;  %v2067_v17 = vld [vmem:[%s11706_s10 + $0x14d0] sm:$0xff] }
 0x1f4   :  { %6303 = vmatpush3.msra.mxu0 %v1985_v18  ;;  %6333 = vmatpush3.msra.mxu1 %v2021_v0  ;;  %v2088_v7 = vld [vmem:[%s11706_s10 + $0x1578] sm:$0xff]  ;;  %v2103_v18 = vld [vmem:[%s11706_s10 + $0x15f0] sm:$0xff] }
 0x1f5   :  { %6304 = vmatprep.subr.mxu0 %v2000_v19  ;;  %6334 = vmatprep.subr.mxu1 %v2036_v21  ;;  %v2051_v0 = vld [vmem:[%s11706_s10 + $0x1450] sm:$0xff]  ;;  %v2066_v21 = vld [vmem:[%s11706_s10 + $0x14c8] sm:$0xff] }
 0x1f6   :  { %6305 = vmatpush3.msra.mxu0 %v1984_v22  ;;  %6335 = vmatpush3.msra.mxu1 %v2020_v23  ;;  %v2087_v19 = vld [vmem:[%s11706_s10 + $0x1570] sm:$0xff]  ;;  %v2102_v22 = vld [vmem:[%s11706_s10 + $0x15e8] sm:$0xff] }
 0x1f7   :  { %6306 = vmatprep.subr.mxu0 %v1999_v26  ;;  %6336 = vmatprep.subr.mxu1 %v2035_v27  ;;  %v2050_v23 = vld [vmem:[%s11706_s10 + $0x1448] sm:$0xff]  ;;  %v2065_v27 = vld [vmem:[%s11706_s10 + $0x14c0] sm:$0xff] }
 0x1f8   :  { %6307 = vmatpush3.msra.mxu0 %v1983_v30  ;;  %6337 = vmatpush3.msra.mxu1 %v2019_v16  ;;  %v2086_v26 = vld [vmem:[%s11706_s10 + $0x1568] sm:$0xff]  ;;  %v2101_v30 = vld [vmem:[%s11706_s10 + $0x15e0] sm:$0xff] }
 0x1f9   :  { %6308 = vmatprep.subr.mxu0 %v1998_v6  ;;  %6338 = vmatprep.subr.mxu1 %v2034_v31  ;;  %v2049_v16 = vld [vmem:[%s11706_s10 + $0x1440] sm:$0xff]  ;;  %v2064_v31 = vld [vmem:[%s11706_s10 + $0x14b8] sm:$0xff] }
 0x1fa   :  { %6309 = vmatpush3.msra.mxu0 %v1982_v32  ;;  %6339 = vmatpush3.msra.mxu1 %v2018_v33  ;;  %v2085_v6 = vld [vmem:[%s11706_s10 + $0x1560] sm:$0xff]  ;;  %v2100_v32 = vld [vmem:[%s11706_s10 + $0x15d8] sm:$0xff] }
 0x1fb   :  { %6310 = vmatprep.subr.mxu0 %v1997_v35  ;;  %6340 = vmatprep.subr.mxu1 %v2033_v37  ;;  %v2048_v33 = vld [vmem:[%s11706_s10 + $0x1438] sm:$0xff]  ;;  %v2063_v37 = vld [vmem:[%s11706_s10 + $0x14b0] sm:$0xff] }
 0x1fc   :  { %6311 = vmatpush3.msra.mxu0 %v1981_v39  ;;  %6341 = vmatpush3.msra.mxu1 %v2017_v40  ;;  %v2084_v35 = vld [vmem:[%s11706_s10 + $0x1558] sm:$0xff]  ;;  %v2099_v39 = vld [vmem:[%s11706_s10 + $0x15d0] sm:$0xff] }
 0x1fd   :  { %6312 = vmatprep.subr.mxu0 %v1996_v20  ;;  %6342 = vmatprep.subr.mxu1 %v2032_v41  ;;  %v2047_v40 = vld [vmem:[%s11706_s10 + $0x1430] sm:$0xff]  ;;  %v2062_v41 = vld [vmem:[%s11706_s10 + $0x14a8] sm:$0xff] }
 0x1fe   :  { %6313 = vmatpush3.msra.mxu0 %v1980_v28  ;;  %6343 = vmatpush3.msra.mxu1 %v2016_v43  ;;  %v2083_v20 = vld [vmem:[%s11706_s10 + $0x1550] sm:$0xff]  ;;  %v2098_v28 = vld [vmem:[%s11706_s10 + $0x15c8] sm:$0xff] }
 0x1ff   :  { %6314 = vmatprep.subr.mxu0 %v1995_v44  ;;  %6344 = vmatprep.subr.mxu1 %v2031_v29  ;;  %v2046_v43 = vld [vmem:[%s11706_s10 + $0x1428] sm:$0xff]  ;;  %v2061_v29 = vld [vmem:[%s11706_s10 + $0x14a0] sm:$0xff] }
 0x200   :  { %6315 = vmatpush3.msra.mxu0 %v1979_v45  ;;  %6345 = vmatpush3.msra.mxu1 %v2015_v46  ;;  %v2082_v44 = vld [vmem:[%s11706_s10 + $0x1548] sm:$0xff]  ;;  %v2097_v45 = vld [vmem:[%s11706_s10 + $0x15c0] sm:$0xff] }
 0x201   :  { %6316 = vmatprep.subr.mxu0 %v1994_v48  ;;  %6346 = vmatprep.subr.mxu1 %v2030_v49  ;;  %v2045_v46 = vld [vmem:[%s11706_s10 + $0x1420] sm:$0xff]  ;;  %v2060_v49 = vld [vmem:[%s11706_s10 + $0x1498] sm:$0xff] }
 0x202   :  { %6317 = vmatpush3.msra.mxu0 %v1978_v50  ;;  %6347 = vmatpush3.msra.mxu1 %v2014_v51  ;;  %v2081_v48 = vld [vmem:[%s11706_s10 + $0x1540] sm:$0xff]  ;;  %v2096_v50 = vld [vmem:[%s11706_s10 + $0x15b8] sm:$0xff] }
 0x203   :  { %6318 = vmatprep.subr.mxu0 %v1993_v42  ;;  %6348 = vmatprep.subr.mxu1 %v2029_v54  ;;  %v2044_v51 = vld [vmem:[%s11706_s10 + $0x1418] sm:$0xff]  ;;  %v2059_v54 = vld [vmem:[%s11706_s10 + $0x1490] sm:$0xff] }
 0x204   :  { %6319 = vmatpush3.msra.mxu0 %v1977_v55  ;;  %4106 = vmatprep.mubr.bf16.mxu0 %v6959_v38  ;;  %v2080_v42 = vld [vmem:[%s11706_s10 + $0x1538] sm:$0xff]  ;;  %v2095_v38 = vld [vmem:[%s11706_s10 + $0x15b0] sm:$0xff] }
 0x205   :  { %6349 = vmatpush3.msra.mxu1 %v2013_v57  ;;  %4107 = vmatmul.mubr.bf16.vlgmr.msra.gmra.mxu0 %v6957_v56  ;;  %v2043_v55 = vld [vmem:[%s11706_s10 + $0x1410] sm:$0xff]  ;;  %v2058_v57 = vld [vmem:[%s11706_s10 + $0x1488] sm:$0xff] }
 0x206   :  { %6350 = vmatprep.subr.mxu1 %v2028_v58  ;;  %6364 = vmatprep.subr.mxu0 %v2072_v59  ;;  %v2079_v56 = vld [vmem:[%s11706_s10 + $0x1530] sm:$0xff]  ;;  %v2094_v58 = vld [vmem:[%s11706_s10 + $0x15a8] sm:$0xff] }
 0x207   :  { %6351 = vmatpush3.msra.mxu1 %v2012_v60  ;;  %6365 = vmatpush3.msra.mxu0 %v2056_v62  ;;  %v2042_v59 = vld [vmem:[%s11706_s10 + $0x1408] sm:$0xff]  ;;  %v2057_v62 = vld [vmem:[%s11706_s10 + $0x1480] sm:$0xff] }
 0x208   :  { %6352 = vmatprep.subr.mxu1 %v2027_v63  ;;  %6366 = vmatprep.subr.mxu0 %v2071_v1  ;;  %v2078_v60 = vld [vmem:[%s11706_s10 + $0x1528] sm:$0xff]  ;;  %v2093_v63 = vld [vmem:[%s11706_s10 + $0x15a0] sm:$0xff] }
 0x209   :  { %6353 = vmatpush3.msra.mxu1 %v2011_v61  ;;  %6367 = vmatpush3.msra.mxu0 %v2055_v3  ;;  %v6965_v1 = vld [vmem:[%s11699_s3 + $0xa4] ss:$252 sps:$4 sm:$0xff]  }
 0x20a   :  { %6354 = vmatprep.subr.mxu1 %v2026_v52  ;;  %6368 = vmatprep.subr.mxu0 %v2070_v4  ;;  %v2041_v61 = vld [vmem:[%s11706_s10 + $0x1400] sm:$0xff]  ;;  %v2092_v4 = vld [vmem:[%s11706_s10 + $0x1598] sm:$0xff] }
 0x20b   :  { %6355 = vmatpush3.msra.mxu1 %v2010_v53  ;;  %6369 = vmatpush3.msra.mxu0 %v2054_v5  ;;  %v6963_v3 = vld [vmem:[%s11699_s3 + $0xa0] ss:$252 sps:$4 sm:$0xff]  }
 0x20c   :  { %6356 = vmatprep.subr.mxu1 %v2025_v8  ;;  %6370 = vmatprep.subr.mxu0 %v2069_v9  ;;  %v2077_v52 = vld [vmem:[%s11706_s10 + $0x1520] sm:$0xff]  ;;  %v2136_v53 = vld [vmem:[%s11706_s10 + $0x16f8] sm:$0xff]  ;;  %v2091_v9 = vld [vmem:[%s11706_s10 + $0x1590] sm:$0xff] }
 0x20d   :  { %6357 = vmatpush3.msra.mxu1 %v2009_v11  ;;  %4179 = vmatprep.mubr.bf16.mxu1 %v6962_v10  ;;  %v2076_v5 = vld [vmem:[%s11706_s10 + $0x1518] sm:$0xff]  ;;  %v2135_v10 = vld [vmem:[%s11706_s10 + $0x16f0] sm:$0xff] }
 0x20e   :  { %6371 = vmatpush3.msra.mxu0 %v2053_v12  ;;  %4180 = vmatmul.mubr.bf16.vlgmr.msra.gmra.mxu1 %v6960_v25  ;;  %v2120_v8 = vld [vmem:[%s11706_s10 + $0x1678] sm:$0xff]  ;;  %v2075_v11 = vld [vmem:[%s11706_s10 + $0x1510] sm:$0xff]  ;;  %v2090_v12 = vld [vmem:[%s11706_s10 + $0x1588] sm:$0xff] }
 0x20f   :  { %6372 = vmatprep.subr.mxu0 %v2068_v13  ;;  %6402 = vmatprep.subr.mxu1 %v2104_v14  ;;  %v2119_v25 = vld [vmem:[%s11706_s10 + $0x1670] sm:$0xff]  ;;  %v2134_v13 = vld [vmem:[%s11706_s10 + $0x16e8] sm:$0xff] }
 0x210   :  { %6373 = vmatpush3.msra.mxu0 %v2052_v15  ;;  %6403 = vmatpush3.msra.mxu1 %v2088_v7  ;;  %v2074_v14 = vld [vmem:[%s11706_s10 + $0x1508] sm:$0xff]  ;;  %v2089_v7 = vld [vmem:[%s11706_s10 + $0x1580] sm:$0xff] }
 0x211   :  { %6374 = vmatprep.subr.mxu0 %v2067_v17  ;;  %6404 = vmatprep.subr.mxu1 %v2103_v18  ;;  %v2118_v15 = vld [vmem:[%s11706_s10 + $0x1668] sm:$0xff]  ;;  %v2133_v17 = vld [vmem:[%s11706_s10 + $0x16e0] sm:$0xff] }
 0x212   :  { %6375 = vmatpush3.msra.mxu0 %v2051_v0  ;;  %6405 = vmatpush3.msra.mxu1 %v2087_v19  ;;  %v6968_v18 = vld [vmem:[%s11699_s3 + $0xac] ss:$252 sps:$4 sm:$0xff]   ;;  %v2073_v0 = vld [vmem:[%s11706_s10 + $0x1500] sm:$0xff] }
 0x213   :  { %6376 = vmatprep.subr.mxu0 %v2066_v21  ;;  %6406 = vmatprep.subr.mxu1 %v2102_v22  ;;  %v6966_v19 = vld [vmem:[%s11699_s3 + $0xa8] ss:$252 sps:$4 sm:$0xff]   ;;  %v2132_v22 = vld [vmem:[%s11706_s10 + $0x16d8] sm:$0xff] }
 0x214   :  { %6377 = vmatpush3.msra.mxu0 %v2050_v23  ;;  %6407 = vmatpush3.msra.mxu1 %v2086_v26  ;;  %v2117_v21 = vld [vmem:[%s11706_s10 + $0x1660] sm:$0xff]  ;;  %v2168_v23 = vld [vmem:[%s11706_s10 + $0x17f8] sm:$0xff] }
 0x215   :  { %6378 = vmatprep.subr.mxu0 %v2065_v27  ;;  %6408 = vmatprep.subr.mxu1 %v2101_v30  ;;  %v2116_v26 = vld [vmem:[%s11706_s10 + $0x1658] sm:$0xff]  ;;  %v2131_v30 = vld [vmem:[%s11706_s10 + $0x16d0] sm:$0xff] }
 0x216   :  { %6379 = vmatpush3.msra.mxu0 %v2049_v16  ;;  %6409 = vmatpush3.msra.mxu1 %v2085_v6  ;;  %v2152_v27 = vld [vmem:[%s11706_s10 + $0x1778] sm:$0xff]  ;;  %v2167_v16 = vld [vmem:[%s11706_s10 + $0x17f0] sm:$0xff] }
 0x217   :  { %6380 = vmatprep.subr.mxu0 %v2064_v31  ;;  %6410 = vmatprep.subr.mxu1 %v2100_v32  ;;  %v2115_v6 = vld [vmem:[%s11706_s10 + $0x1650] sm:$0xff]  ;;  %v2130_v32 = vld [vmem:[%s11706_s10 + $0x16c8] sm:$0xff] }
 0x218   :  { %6381 = vmatpush3.msra.mxu0 %v2048_v33  ;;  %6411 = vmatpush3.msra.mxu1 %v2084_v35  ;;  %v2151_v31 = vld [vmem:[%s11706_s10 + $0x1770] sm:$0xff]  ;;  %v2166_v33 = vld [vmem:[%s11706_s10 + $0x17e8] sm:$0xff] }
 0x219   :  { %6382 = vmatprep.subr.mxu0 %v2063_v37  ;;  %6412 = vmatprep.subr.mxu1 %v2099_v39  ;;  %v2114_v35 = vld [vmem:[%s11706_s10 + $0x1648] sm:$0xff]  ;;  %v2129_v39 = vld [vmem:[%s11706_s10 + $0x16c0] sm:$0xff] }
 0x21a   :  { %6383 = vmatpush3.msra.mxu0 %v2047_v40  ;;  %6413 = vmatpush3.msra.mxu1 %v2083_v20  ;;  %v2150_v37 = vld [vmem:[%s11706_s10 + $0x1768] sm:$0xff]  ;;  %v2165_v40 = vld [vmem:[%s11706_s10 + $0x17e0] sm:$0xff] }
 0x21b   :  { %6384 = vmatprep.subr.mxu0 %v2062_v41  ;;  %6414 = vmatprep.subr.mxu1 %v2098_v28  ;;  %v2113_v20 = vld [vmem:[%s11706_s10 + $0x1640] sm:$0xff]  ;;  %v2128_v28 = vld [vmem:[%s11706_s10 + $0x16b8] sm:$0xff] }
 0x21c   :  { %6385 = vmatpush3.msra.mxu0 %v2046_v43  ;;  %6415 = vmatpush3.msra.mxu1 %v2082_v44  ;;  %v2149_v41 = vld [vmem:[%s11706_s10 + $0x1760] sm:$0xff]  ;;  %v2164_v43 = vld [vmem:[%s11706_s10 + $0x17d8] sm:$0xff] }
 0x21d   :  { %6386 = vmatprep.subr.mxu0 %v2061_v29  ;;  %6416 = vmatprep.subr.mxu1 %v2097_v45  ;;  %v2112_v44 = vld [vmem:[%s11706_s10 + $0x1638] sm:$0xff]  ;;  %v2127_v45 = vld [vmem:[%s11706_s10 + $0x16b0] sm:$0xff] }
 0x21e   :  { %6387 = vmatpush3.msra.mxu0 %v2045_v46  ;;  %6417 = vmatpush3.msra.mxu1 %v2081_v48  ;;  %v2148_v29 = vld [vmem:[%s11706_s10 + $0x1758] sm:$0xff]  ;;  %v2163_v46 = vld [vmem:[%s11706_s10 + $0x17d0] sm:$0xff] }
 0x21f   :  { %6388 = vmatprep.subr.mxu0 %v2060_v49  ;;  %6418 = vmatprep.subr.mxu1 %v2096_v50  ;;  %v2111_v48 = vld [vmem:[%s11706_s10 + $0x1630] sm:$0xff]  ;;  %v2126_v50 = vld [vmem:[%s11706_s10 + $0x16a8] sm:$0xff] }
 0x220   :  { %6389 = vmatpush3.msra.mxu0 %v2044_v51  ;;  %6419 = vmatpush3.msra.mxu1 %v2080_v42  ;;  %v2147_v49 = vld [vmem:[%s11706_s10 + $0x1750] sm:$0xff]  ;;  %v2162_v51 = vld [vmem:[%s11706_s10 + $0x17c8] sm:$0xff] }
 0x221   :  { %6390 = vmatprep.subr.mxu0 %v2059_v54  ;;  %6420 = vmatprep.subr.mxu1 %v2095_v38  ;;  %v2110_v42 = vld [vmem:[%s11706_s10 + $0x1628] sm:$0xff]  ;;  %v2125_v38 = vld [vmem:[%s11706_s10 + $0x16a0] sm:$0xff] }
 0x222   :  { %6391 = vmatpush3.msra.mxu0 %v2043_v55  ;;  %6421 = vmatpush3.msra.mxu1 %v2079_v56  ;;  %v2146_v54 = vld [vmem:[%s11706_s10 + $0x1748] sm:$0xff]  ;;  %v2161_v55 = vld [vmem:[%s11706_s10 + $0x17c0] sm:$0xff] }
 0x223   :  { %6392 = vmatprep.subr.mxu0 %v2058_v57  ;;  %6422 = vmatprep.subr.mxu1 %v2094_v58  ;;  %v2109_v56 = vld [vmem:[%s11706_s10 + $0x1620] sm:$0xff]  ;;  %v2124_v58 = vld [vmem:[%s11706_s10 + $0x1698] sm:$0xff] }
 0x224   :  { %6393 = vmatpush3.msra.mxu0 %v2042_v59  ;;  %6423 = vmatpush3.msra.mxu1 %v2078_v60  ;;  %v2145_v57 = vld [vmem:[%s11706_s10 + $0x1740] sm:$0xff]  ;;  %v2160_v59 = vld [vmem:[%s11706_s10 + $0x17b8] sm:$0xff] }
 0x225   :  { %6394 = vmatprep.subr.mxu0 %v2057_v62  ;;  %6424 = vmatprep.subr.mxu1 %v2093_v63  ;;  %v2108_v60 = vld [vmem:[%s11706_s10 + $0x1618] sm:$0xff]  ;;  %v2123_v63 = vld [vmem:[%s11706_s10 + $0x1690] sm:$0xff] }
 0x226   :  { %6395 = vmatpush3.msra.mxu0 %v2041_v61  ;;  %4252 = vmatprep.mubr.bf16.mxu0 %v6965_v1  ;;  %v2144_v62 = vld [vmem:[%s11706_s10 + $0x1738] sm:$0xff]  ;;  %v2159_v1 = vld [vmem:[%s11706_s10 + $0x17b0] sm:$0xff] }
 0x227   :  { %6425 = vmatpush3.msra.mxu1 %v2077_v52  ;;  %4253 = vmatmul.mubr.bf16.vlgmr.msra.gmra.mxu0 %v6963_v3  ;;  %v2107_v61 = vld [vmem:[%s11706_s10 + $0x1610] sm:$0xff]  ;;  %v2122_v52 = vld [vmem:[%s11706_s10 + $0x1688] sm:$0xff] }
 0x228   :  { %6426 = vmatprep.subr.mxu1 %v2092_v4  ;;  %6440 = vmatprep.subr.mxu0 %v2136_v53  ;;  %v2143_v3 = vld [vmem:[%s11706_s10 + $0x1730] sm:$0xff]  ;;  %v2158_v4 = vld [vmem:[%s11706_s10 + $0x17a8] sm:$0xff] }
 0x229   :  { %6427 = vmatpush3.msra.mxu1 %v2076_v5  ;;  %6441 = vmatpush3.msra.mxu0 %v2120_v8  ;;  %v2106_v53 = vld [vmem:[%s11706_s10 + $0x1608] sm:$0xff]  ;;  %v2121_v8 = vld [vmem:[%s11706_s10 + $0x1680] sm:$0xff] }
 0x22a   :  { %6428 = vmatprep.subr.mxu1 %v2091_v9  ;;  %6442 = vmatprep.subr.mxu0 %v2135_v10  ;;  %v2142_v5 = vld [vmem:[%s11706_s10 + $0x1728] sm:$0xff]  ;;  %v2157_v9 = vld [vmem:[%s11706_s10 + $0x17a0] sm:$0xff]  ;;  %v6971_v10 = vld [vmem:[%s11699_s3 + $0xb4] ss:$252 sps:$4 sm:$0xff]  }
 0x22b   :  { %6429 = vmatpush3.msra.mxu1 %v2075_v11  ;;  %6443 = vmatpush3.msra.mxu0 %v2119_v25  ;;  %v2105_v11 = vld [vmem:[%s11706_s10 + $0x1600] sm:$0xff]  ;;  %v6969_v25 = vld [vmem:[%s11699_s3 + $0xb0] ss:$252 sps:$4 sm:$0xff]  }
 0x22c   :  { %6430 = vmatprep.subr.mxu1 %v2090_v12  ;;  %6444 = vmatprep.subr.mxu0 %v2134_v13  ;;  %v2141_v12 = vld [vmem:[%s11706_s10 + $0x1720] sm:$0xff]  ;;  %v2156_v13 = vld [vmem:[%s11706_s10 + $0x1798] sm:$0xff] }
 0x22d   :  { %6431 = vmatpush3.msra.mxu1 %v2074_v14  ;;  %6445 = vmatpush3.msra.mxu0 %v2118_v15  ;;  %v2200_v14 = vld [vmem:[%s11706_s10 + $0x18f8] sm:$0xff] }
 0x22e   :  { %6432 = vmatprep.subr.mxu1 %v2089_v7  ;;  %6446 = vmatprep.subr.mxu0 %v2133_v17  ;;  %v2140_v15 = vld [vmem:[%s11706_s10 + $0x1718] sm:$0xff]  ;;  %v2155_v17 = vld [vmem:[%s11706_s10 + $0x1790] sm:$0xff] }
 0x22f   :  { %6433 = vmatpush3.msra.mxu1 %v2073_v0  ;;  %4325 = vmatprep.mubr.bf16.mxu1 %v6968_v18  ;;  %v2184_v7 = vld [vmem:[%s11706_s10 + $0x1878] sm:$0xff]  ;;  %v2199_v18 = vld [vmem:[%s11706_s10 + $0x18f0] sm:$0xff] }
 0x230   :  { %6447 = vmatpush3.msra.mxu0 %v2117_v21  ;;  %4326 = vmatmul.mubr.bf16.vlgmr.msra.gmra.mxu1 %v6966_v19  ;;  %v2139_v0 = vld [vmem:[%s11706_s10 + $0x1710] sm:$0xff]  ;;  %v2154_v21 = vld [vmem:[%s11706_s10 + $0x1788] sm:$0xff] }
 0x231   :  { %6448 = vmatprep.subr.mxu0 %v2132_v22  ;;  %6478 = vmatprep.subr.mxu1 %v2168_v23  ;;  %v2183_v19 = vld [vmem:[%s11706_s10 + $0x1870] sm:$0xff]  ;;  %v2198_v22 = vld [vmem:[%s11706_s10 + $0x18e8] sm:$0xff] }
 0x232   :  { %6449 = vmatpush3.msra.mxu0 %v2116_v26  ;;  %6479 = vmatpush3.msra.mxu1 %v2152_v27  ;;  %v2138_v23 = vld [vmem:[%s11706_s10 + $0x1708] sm:$0xff]  ;;  %v2153_v27 = vld [vmem:[%s11706_s10 + $0x1780] sm:$0xff] }
 0x233   :  { %6450 = vmatprep.subr.mxu0 %v2131_v30  ;;  %6480 = vmatprep.subr.mxu1 %v2167_v16  ;;  %v2182_v26 = vld [vmem:[%s11706_s10 + $0x1868] sm:$0xff]  ;;  %v2197_v30 = vld [vmem:[%s11706_s10 + $0x18e0] sm:$0xff]  ;;  %v6974_v16 = vld [vmem:[%s11699_s3 + $0xbc] ss:$252 sps:$4 sm:$0xff]  }
 0x234   :  { %6451 = vmatpush3.msra.mxu0 %v2115_v6  ;;  %6481 = vmatpush3.msra.mxu1 %v2151_v31  ;;  %v2137_v6 = vld [vmem:[%s11706_s10 + $0x1700] sm:$0xff]  ;;  %v6972_v31 = vld [vmem:[%s11699_s3 + $0xb8] ss:$252 sps:$4 sm:$0xff]  }
 0x235   :  { %6452 = vmatprep.subr.mxu0 %v2130_v32  ;;  %6482 = vmatprep.subr.mxu1 %v2166_v33  ;;  %v2181_v32 = vld [vmem:[%s11706_s10 + $0x1860] sm:$0xff]  ;;  %v2196_v33 = vld [vmem:[%s11706_s10 + $0x18d8] sm:$0xff] }
 0x236   :  { %6453 = vmatpush3.msra.mxu0 %v2114_v35  ;;  %6483 = vmatpush3.msra.mxu1 %v2150_v37  ;;  %v2232_v35 = vld [vmem:[%s11706_s10 + $0x19f8] sm:$0xff] }
 0x237   :  { %6454 = vmatprep.subr.mxu0 %v2129_v39  ;;  %6484 = vmatprep.subr.mxu1 %v2165_v40  ;;  %v2180_v37 = vld [vmem:[%s11706_s10 + $0x1858] sm:$0xff]  ;;  %v2195_v40 = vld [vmem:[%s11706_s10 + $0x18d0] sm:$0xff] }
 0x238   :  { %6455 = vmatpush3.msra.mxu0 %v2113_v20  ;;  %6485 = vmatpush3.msra.mxu1 %v2149_v41  ;;  %v2216_v39 = vld [vmem:[%s11706_s10 + $0x1978] sm:$0xff]  ;;  %v2231_v20 = vld [vmem:[%s11706_s10 + $0x19f0] sm:$0xff] }
 0x239   :  { %6456 = vmatprep.subr.mxu0 %v2128_v28  ;;  %6486 = vmatprep.subr.mxu1 %v2164_v43  ;;  %v2179_v41 = vld [vmem:[%s11706_s10 + $0x1850] sm:$0xff]  ;;  %v2194_v43 = vld [vmem:[%s11706_s10 + $0x18c8] sm:$0xff] }
 0x23a   :  { %6457 = vmatpush3.msra.mxu0 %v2112_v44  ;;  %6487 = vmatpush3.msra.mxu1 %v2148_v29  ;;  %v2215_v28 = vld [vmem:[%s11706_s10 + $0x1970] sm:$0xff]  ;;  %v2230_v44 = vld [vmem:[%s11706_s10 + $0x19e8] sm:$0xff] }
 0x23b   :  { %6458 = vmatprep.subr.mxu0 %v2127_v45  ;;  %6488 = vmatprep.subr.mxu1 %v2163_v46  ;;  %v2178_v29 = vld [vmem:[%s11706_s10 + $0x1848] sm:$0xff]  ;;  %v2193_v46 = vld [vmem:[%s11706_s10 + $0x18c0] sm:$0xff] }
 0x23c   :  { %6459 = vmatpush3.msra.mxu0 %v2111_v48  ;;  %6489 = vmatpush3.msra.mxu1 %v2147_v49  ;;  %v2214_v45 = vld [vmem:[%s11706_s10 + $0x1968] sm:$0xff]  ;;  %v2229_v48 = vld [vmem:[%s11706_s10 + $0x19e0] sm:$0xff] }
 0x23d   :  { %6460 = vmatprep.subr.mxu0 %v2126_v50  ;;  %6490 = vmatprep.subr.mxu1 %v2162_v51  ;;  %v2177_v49 = vld [vmem:[%s11706_s10 + $0x1840] sm:$0xff]  ;;  %v2192_v51 = vld [vmem:[%s11706_s10 + $0x18b8] sm:$0xff] }
 0x23e   :  { %6461 = vmatpush3.msra.mxu0 %v2110_v42  ;;  %6491 = vmatpush3.msra.mxu1 %v2146_v54  ;;  %v2213_v50 = vld [vmem:[%s11706_s10 + $0x1960] sm:$0xff]  ;;  %v2228_v42 = vld [vmem:[%s11706_s10 + $0x19d8] sm:$0xff] }
 0x23f   :  { %6462 = vmatprep.subr.mxu0 %v2125_v38  ;;  %6492 = vmatprep.subr.mxu1 %v2161_v55  ;;  %v2176_v54 = vld [vmem:[%s11706_s10 + $0x1838] sm:$0xff]  ;;  %v2191_v55 = vld [vmem:[%s11706_s10 + $0x18b0] sm:$0xff] }
 0x240   :  { %6463 = vmatpush3.msra.mxu0 %v2109_v56  ;;  %6493 = vmatpush3.msra.mxu1 %v2145_v57  ;;  %v2212_v38 = vld [vmem:[%s11706_s10 + $0x1958] sm:$0xff]  ;;  %v2227_v56 = vld [vmem:[%s11706_s10 + $0x19d0] sm:$0xff] }
 0x241   :  { %6464 = vmatprep.subr.mxu0 %v2124_v58  ;;  %6494 = vmatprep.subr.mxu1 %v2160_v59  ;;  %v2175_v57 = vld [vmem:[%s11706_s10 + $0x1830] sm:$0xff]  ;;  %v2190_v59 = vld [vmem:[%s11706_s10 + $0x18a8] sm:$0xff] }
 0x242   :  { %6465 = vmatpush3.msra.mxu0 %v2108_v60  ;;  %6495 = vmatpush3.msra.mxu1 %v2144_v62  ;;  %v2211_v58 = vld [vmem:[%s11706_s10 + $0x1950] sm:$0xff]  ;;  %v2226_v60 = vld [vmem:[%s11706_s10 + $0x19c8] sm:$0xff] }
 0x243   :  { %6466 = vmatprep.subr.mxu0 %v2123_v63  ;;  %6496 = vmatprep.subr.mxu1 %v2159_v1  ;;  %v2174_v62 = vld [vmem:[%s11706_s10 + $0x1828] sm:$0xff]  ;;  %v2189_v1 = vld [vmem:[%s11706_s10 + $0x18a0] sm:$0xff] }
 0x244   :  { %6467 = vmatpush3.msra.mxu0 %v2107_v61  ;;  %6497 = vmatpush3.msra.mxu1 %v2143_v3  ;;  %v2210_v63 = vld [vmem:[%s11706_s10 + $0x1948] sm:$0xff]  ;;  %v2225_v61 = vld [vmem:[%s11706_s10 + $0x19c0] sm:$0xff] }
 0x245   :  { %6468 = vmatprep.subr.mxu0 %v2122_v52  ;;  %6498 = vmatprep.subr.mxu1 %v2158_v4  ;;  %v2173_v3 = vld [vmem:[%s11706_s10 + $0x1820] sm:$0xff]  ;;  %v2188_v4 = vld [vmem:[%s11706_s10 + $0x1898] sm:$0xff] }
 0x246   :  { %6469 = vmatpush3.msra.mxu0 %v2106_v53  ;;  %6499 = vmatpush3.msra.mxu1 %v2142_v5  ;;  %v2209_v52 = vld [vmem:[%s11706_s10 + $0x1940] sm:$0xff]  ;;  %v2224_v53 = vld [vmem:[%s11706_s10 + $0x19b8] sm:$0xff] }
 0x247   :  { %6470 = vmatprep.subr.mxu0 %v2121_v8  ;;  %6500 = vmatprep.subr.mxu1 %v2157_v9  ;;  %v2172_v5 = vld [vmem:[%s11706_s10 + $0x1818] sm:$0xff]  ;;  %v2187_v9 = vld [vmem:[%s11706_s10 + $0x1890] sm:$0xff] }
 0x248   :  { %6471 = vmatpush3.msra.mxu0 %v2105_v11  ;;  %4398 = vmatprep.mubr.bf16.mxu0 %v6971_v10  ;;  %v2208_v8 = vld [vmem:[%s11706_s10 + $0x1938] sm:$0xff]  ;;  %v2223_v10 = vld [vmem:[%s11706_s10 + $0x19b0] sm:$0xff] }
 0x249   :  { %6501 = vmatpush3.msra.mxu1 %v2141_v12  ;;  %4399 = vmatmul.mubr.bf16.vlgmr.msra.gmra.mxu0 %v6969_v25  ;;  %v2171_v11 = vld [vmem:[%s11706_s10 + $0x1810] sm:$0xff]  ;;  %v2186_v12 = vld [vmem:[%s11706_s10 + $0x1888] sm:$0xff] }
 0x24a   :  { %6502 = vmatprep.subr.mxu1 %v2156_v13  ;;  %6516 = vmatprep.subr.mxu0 %v2200_v14  ;;  %v2207_v25 = vld [vmem:[%s11706_s10 + $0x1930] sm:$0xff]  ;;  %v2222_v13 = vld [vmem:[%s11706_s10 + $0x19a8] sm:$0xff] }
 0x24b   :  { %6503 = vmatpush3.msra.mxu1 %v2140_v15  ;;  %6517 = vmatpush3.msra.mxu0 %v2184_v7  ;;  %v2170_v14 = vld [vmem:[%s11706_s10 + $0x1808] sm:$0xff]  ;;  %v2185_v7 = vld [vmem:[%s11706_s10 + $0x1880] sm:$0xff] }
 0x24c   :  { %6504 = vmatprep.subr.mxu1 %v2155_v17  ;;  %6518 = vmatprep.subr.mxu0 %v2199_v18  ;;  %v2206_v15 = vld [vmem:[%s11706_s10 + $0x1928] sm:$0xff]  ;;  %v2221_v17 = vld [vmem:[%s11706_s10 + $0x19a0] sm:$0xff] }
 0x24d   :  { %6505 = vmatpush3.msra.mxu1 %v2139_v0  ;;  %6519 = vmatpush3.msra.mxu0 %v2183_v19  ;;  %v6977_v18 = vld [vmem:[%s11699_s3 + $0xc4] ss:$252 sps:$4 sm:$0xff]  }
 0x24e   :  { %6506 = vmatprep.subr.mxu1 %v2154_v21  ;;  %6520 = vmatprep.subr.mxu0 %v2198_v22  ;;  %v2169_v0 = vld [vmem:[%s11706_s10 + $0x1800] sm:$0xff]  ;;  %v2220_v22 = vld [vmem:[%s11706_s10 + $0x1998] sm:$0xff] }
 0x24f   :  { %6507 = vmatpush3.msra.mxu1 %v2138_v23  ;;  %6521 = vmatpush3.msra.mxu0 %v2182_v26  ;;  %v6975_v19 = vld [vmem:[%s11699_s3 + $0xc0] ss:$252 sps:$4 sm:$0xff]  }
 0x250   :  { %6508 = vmatprep.subr.mxu1 %v2153_v27  ;;  %6522 = vmatprep.subr.mxu0 %v2197_v30  ;;  %v2205_v21 = vld [vmem:[%s11706_s10 + $0x1920] sm:$0xff]  ;;  %v2264_v23 = vld [vmem:[%s11706_s10 + $0x1af8] sm:$0xff]  ;;  %v2219_v30 = vld [vmem:[%s11706_s10 + $0x1990] sm:$0xff] }
 0x251   :  { %6509 = vmatpush3.msra.mxu1 %v2137_v6  ;;  %4471 = vmatprep.mubr.bf16.mxu1 %v6974_v16  ;;  %v2204_v26 = vld [vmem:[%s11706_s10 + $0x1918] sm:$0xff]  ;;  %v2263_v16 = vld [vmem:[%s11706_s10 + $0x1af0] sm:$0xff] }
 0x252   :  { %6523 = vmatpush3.msra.mxu0 %v2181_v32  ;;  %4472 = vmatmul.mubr.bf16.vlgmr.msra.gmra.mxu1 %v6972_v31  ;;  %v2248_v27 = vld [vmem:[%s11706_s10 + $0x1a78] sm:$0xff]  ;;  %v2203_v6 = vld [vmem:[%s11706_s10 + $0x1910] sm:$0xff]  ;;  %v2218_v32 = vld [vmem:[%s11706_s10 + $0x1988] sm:$0xff] }
 0x253   :  { %6524 = vmatprep.subr.mxu0 %v2196_v33  ;;  %6554 = vmatprep.subr.mxu1 %v2232_v35  ;;  %v2247_v31 = vld [vmem:[%s11706_s10 + $0x1a70] sm:$0xff]  ;;  %v2262_v33 = vld [vmem:[%s11706_s10 + $0x1ae8] sm:$0xff] }
 0x254   :  { %6525 = vmatpush3.msra.mxu0 %v2180_v37  ;;  %6555 = vmatpush3.msra.mxu1 %v2216_v39  ;;  %v2202_v35 = vld [vmem:[%s11706_s10 + $0x1908] sm:$0xff]  ;;  %v2217_v39 = vld [vmem:[%s11706_s10 + $0x1980] sm:$0xff] }
 0x255   :  { %6526 = vmatprep.subr.mxu0 %v2195_v40  ;;  %6556 = vmatprep.subr.mxu1 %v2231_v20  ;;  %v2246_v37 = vld [vmem:[%s11706_s10 + $0x1a68] sm:$0xff]  ;;  %v2261_v40 = vld [vmem:[%s11706_s10 + $0x1ae0] sm:$0xff] }
 0x256   :  { %6527 = vmatpush3.msra.mxu0 %v2179_v41  ;;  %6557 = vmatpush3.msra.mxu1 %v2215_v28  ;;  %v6980_v20 = vld [vmem:[%s11699_s3 + $0xcc] ss:$252 sps:$4 sm:$0xff]   ;;  %v2201_v41 = vld [vmem:[%s11706_s10 + $0x1900] sm:$0xff] }
 0x257   :  { %6528 = vmatprep.subr.mxu0 %v2194_v43  ;;  %6558 = vmatprep.subr.mxu1 %v2230_v44  ;;  %v6978_v28 = vld [vmem:[%s11699_s3 + $0xc8] ss:$252 sps:$4 sm:$0xff]   ;;  %v2260_v44 = vld [vmem:[%s11706_s10 + $0x1ad8] sm:$0xff] }
 0x258   :  { %6529 = vmatpush3.msra.mxu0 %v2178_v29  ;;  %6559 = vmatpush3.msra.mxu1 %v2214_v45  ;;  %v2245_v43 = vld [vmem:[%s11706_s10 + $0x1a60] sm:$0xff]  ;;  %v2296_v29 = vld [vmem:[%s11706_s10 + $0x1bf8] sm:$0xff] }
 0x259   :  { %6530 = vmatprep.subr.mxu0 %v2193_v46  ;;  %6560 = vmatprep.subr.mxu1 %v2229_v48  ;;  %v2244_v45 = vld [vmem:[%s11706_s10 + $0x1a58] sm:$0xff]  ;;  %v2259_v48 = vld [vmem:[%s11706_s10 + $0x1ad0] sm:$0xff] }
 0x25a   :  { %6531 = vmatpush3.msra.mxu0 %v2177_v49  ;;  %6561 = vmatpush3.msra.mxu1 %v2213_v50  ;;  %v2280_v46 = vld [vmem:[%s11706_s10 + $0x1b78] sm:$0xff]  ;;  %v2295_v49 = vld [vmem:[%s11706_s10 + $0x1bf0] sm:$0xff] }
 0x25b   :  { %6532 = vmatprep.subr.mxu0 %v2192_v51  ;;  %6562 = vmatprep.subr.mxu1 %v2228_v42  ;;  %v2243_v50 = vld [vmem:[%s11706_s10 + $0x1a50] sm:$0xff]  ;;  %v2258_v42 = vld [vmem:[%s11706_s10 + $0x1ac8] sm:$0xff] }
 0x25c   :  { %6533 = vmatpush3.msra.mxu0 %v2176_v54  ;;  %6563 = vmatpush3.msra.mxu1 %v2212_v38  ;;  %v2279_v51 = vld [vmem:[%s11706_s10 + $0x1b70] sm:$0xff]  ;;  %v2294_v54 = vld [vmem:[%s11706_s10 + $0x1be8] sm:$0xff] }
 0x25d   :  { %6534 = vmatprep.subr.mxu0 %v2191_v55  ;;  %6564 = vmatprep.subr.mxu1 %v2227_v56  ;;  %v2242_v38 = vld [vmem:[%s11706_s10 + $0x1a48] sm:$0xff]  ;;  %v2257_v56 = vld [vmem:[%s11706_s10 + $0x1ac0] sm:$0xff] }
 0x25e   :  { %6535 = vmatpush3.msra.mxu0 %v2175_v57  ;;  %6565 = vmatpush3.msra.mxu1 %v2211_v58  ;;  %v2278_v55 = vld [vmem:[%s11706_s10 + $0x1b68] sm:$0xff]  ;;  %v2293_v57 = vld [vmem:[%s11706_s10 + $0x1be0] sm:$0xff] }
 0x25f   :  { %6536 = vmatprep.subr.mxu0 %v2190_v59  ;;  %6566 = vmatprep.subr.mxu1 %v2226_v60  ;;  %v2241_v58 = vld [vmem:[%s11706_s10 + $0x1a40] sm:$0xff]  ;;  %v2256_v60 = vld [vmem:[%s11706_s10 + $0x1ab8] sm:$0xff] }
 0x260   :  { %6537 = vmatpush3.msra.mxu0 %v2174_v62  ;;  %6567 = vmatpush3.msra.mxu1 %v2210_v63  ;;  %v2277_v59 = vld [vmem:[%s11706_s10 + $0x1b60] sm:$0xff]  ;;  %v2292_v62 = vld [vmem:[%s11706_s10 + $0x1bd8] sm:$0xff] }
 0x261   :  { %6538 = vmatprep.subr.mxu0 %v2189_v1  ;;  %6568 = vmatprep.subr.mxu1 %v2225_v61  ;;  %v2240_v63 = vld [vmem:[%s11706_s10 + $0x1a38] sm:$0xff]  ;;  %v2255_v61 = vld [vmem:[%s11706_s10 + $0x1ab0] sm:$0xff] }
 0x262   :  { %6539 = vmatpush3.msra.mxu0 %v2173_v3  ;;  %6569 = vmatpush3.msra.mxu1 %v2209_v52  ;;  %v2276_v1 = vld [vmem:[%s11706_s10 + $0x1b58] sm:$0xff]  ;;  %v2291_v3 = vld [vmem:[%s11706_s10 + $0x1bd0] sm:$0xff] }
 0x263   :  { %6540 = vmatprep.subr.mxu0 %v2188_v4  ;;  %6570 = vmatprep.subr.mxu1 %v2224_v53  ;;  %v2239_v52 = vld [vmem:[%s11706_s10 + $0x1a30] sm:$0xff]  ;;  %v2254_v53 = vld [vmem:[%s11706_s10 + $0x1aa8] sm:$0xff] }
 0x264   :  { %6541 = vmatpush3.msra.mxu0 %v2172_v5  ;;  %6571 = vmatpush3.msra.mxu1 %v2208_v8  ;;  %v2275_v4 = vld [vmem:[%s11706_s10 + $0x1b50] sm:$0xff]  ;;  %v2290_v5 = vld [vmem:[%s11706_s10 + $0x1bc8] sm:$0xff] }
 0x265   :  { %6542 = vmatprep.subr.mxu0 %v2187_v9  ;;  %6572 = vmatprep.subr.mxu1 %v2223_v10  ;;  %v2238_v8 = vld [vmem:[%s11706_s10 + $0x1a28] sm:$0xff]  ;;  %v2253_v10 = vld [vmem:[%s11706_s10 + $0x1aa0] sm:$0xff] }
 0x266   :  { %6543 = vmatpush3.msra.mxu0 %v2171_v11  ;;  %6573 = vmatpush3.msra.mxu1 %v2207_v25  ;;  %v2274_v9 = vld [vmem:[%s11706_s10 + $0x1b48] sm:$0xff]  ;;  %v2289_v11 = vld [vmem:[%s11706_s10 + $0x1bc0] sm:$0xff] }
 0x267   :  { %6544 = vmatprep.subr.mxu0 %v2186_v12  ;;  %6574 = vmatprep.subr.mxu1 %v2222_v13  ;;  %v2237_v25 = vld [vmem:[%s11706_s10 + $0x1a20] sm:$0xff]  ;;  %v2252_v13 = vld [vmem:[%s11706_s10 + $0x1a98] sm:$0xff] }
 0x268   :  { %6545 = vmatpush3.msra.mxu0 %v2170_v14  ;;  %6575 = vmatpush3.msra.mxu1 %v2206_v15  ;;  %v2273_v12 = vld [vmem:[%s11706_s10 + $0x1b40] sm:$0xff]  ;;  %v2288_v14 = vld [vmem:[%s11706_s10 + $0x1bb8] sm:$0xff] }
 0x269   :  { %6546 = vmatprep.subr.mxu0 %v2185_v7  ;;  %6576 = vmatprep.subr.mxu1 %v2221_v17  ;;  %v2236_v15 = vld [vmem:[%s11706_s10 + $0x1a18] sm:$0xff]  ;;  %v2251_v17 = vld [vmem:[%s11706_s10 + $0x1a90] sm:$0xff] }
 0x26a   :  { %6547 = vmatpush3.msra.mxu0 %v2169_v0  ;;  %4544 = vmatprep.mubr.bf16.mxu0 %v6977_v18  ;;  %v2272_v7 = vld [vmem:[%s11706_s10 + $0x1b38] sm:$0xff]  ;;  %v2287_v18 = vld [vmem:[%s11706_s10 + $0x1bb0] sm:$0xff] }
 0x26b   :  { %6577 = vmatpush3.msra.mxu1 %v2205_v21  ;;  %4545 = vmatmul.mubr.bf16.vlgmr.msra.gmra.mxu0 %v6975_v19  ;;  %v2235_v0 = vld [vmem:[%s11706_s10 + $0x1a10] sm:$0xff]  ;;  %v2250_v21 = vld [vmem:[%s11706_s10 + $0x1a88] sm:$0xff] }
 0x26c   :  { %6578 = vmatprep.subr.mxu1 %v2220_v22  ;;  %6592 = vmatprep.subr.mxu0 %v2264_v23  ;;  %v2271_v19 = vld [vmem:[%s11706_s10 + $0x1b30] sm:$0xff]  ;;  %v2286_v22 = vld [vmem:[%s11706_s10 + $0x1ba8] sm:$0xff] }
 0x26d   :  { %6579 = vmatpush3.msra.mxu1 %v2204_v26  ;;  %6593 = vmatpush3.msra.mxu0 %v2248_v27  ;;  %v2234_v23 = vld [vmem:[%s11706_s10 + $0x1a08] sm:$0xff]  ;;  %v2249_v27 = vld [vmem:[%s11706_s10 + $0x1a80] sm:$0xff] }
 0x26e   :  { %6580 = vmatprep.subr.mxu1 %v2219_v30  ;;  %6594 = vmatprep.subr.mxu0 %v2263_v16  ;;  %v2270_v26 = vld [vmem:[%s11706_s10 + $0x1b28] sm:$0xff]  ;;  %v2285_v30 = vld [vmem:[%s11706_s10 + $0x1ba0] sm:$0xff]  ;;  %v6983_v16 = vld [vmem:[%s11699_s3 + $0xd4] ss:$252 sps:$4 sm:$0xff]  }
 0x26f   :  { %6581 = vmatpush3.msra.mxu1 %v2203_v6  ;;  %6595 = vmatpush3.msra.mxu0 %v2247_v31  ;;  %v2233_v6 = vld [vmem:[%s11706_s10 + $0x1a00] sm:$0xff]  ;;  %v6981_v31 = vld [vmem:[%s11699_s3 + $0xd0] ss:$252 sps:$4 sm:$0xff]  }
 0x270   :  { %6582 = vmatprep.subr.mxu1 %v2218_v32  ;;  %6596 = vmatprep.subr.mxu0 %v2262_v33  ;;  %v2269_v32 = vld [vmem:[%s11706_s10 + $0x1b20] sm:$0xff]  ;;  %v2284_v33 = vld [vmem:[%s11706_s10 + $0x1b98] sm:$0xff] }
 0x271   :  { %6583 = vmatpush3.msra.mxu1 %v2202_v35  ;;  %6597 = vmatpush3.msra.mxu0 %v2246_v37  ;;  %v2328_v35 = vld [vmem:[%s11706_s10 + $0x1cf8] sm:$0xff] }
 0x272   :  { %6584 = vmatprep.subr.mxu1 %v2217_v39  ;;  %6598 = vmatprep.subr.mxu0 %v2261_v40  ;;  %v2268_v37 = vld [vmem:[%s11706_s10 + $0x1b18] sm:$0xff]  ;;  %v2283_v40 = vld [vmem:[%s11706_s10 + $0x1b90] sm:$0xff] }
 0x273   :  { %6585 = vmatpush3.msra.mxu1 %v2201_v41  ;;  %4617 = vmatprep.mubr.bf16.mxu1 %v6980_v20  ;;  %v2312_v39 = vld [vmem:[%s11706_s10 + $0x1c78] sm:$0xff]  ;;  %v2327_v20 = vld [vmem:[%s11706_s10 + $0x1cf0] sm:$0xff] }
 0x274   :  { %6599 = vmatpush3.msra.mxu0 %v2245_v43  ;;  %4618 = vmatmul.mubr.bf16.vlgmr.msra.gmra.mxu1 %v6978_v28  ;;  %v2267_v41 = vld [vmem:[%s11706_s10 + $0x1b10] sm:$0xff]  ;;  %v2282_v43 = vld [vmem:[%s11706_s10 + $0x1b88] sm:$0xff] }
 0x275   :  { %6600 = vmatprep.subr.mxu0 %v2260_v44  ;;  %6630 = vmatprep.subr.mxu1 %v2296_v29  ;;  %v2311_v28 = vld [vmem:[%s11706_s10 + $0x1c70] sm:$0xff]  ;;  %v2326_v44 = vld [vmem:[%s11706_s10 + $0x1ce8] sm:$0xff] }
 0x276   :  { %6601 = vmatpush3.msra.mxu0 %v2244_v45  ;;  %6631 = vmatpush3.msra.mxu1 %v2280_v46  ;;  %v2266_v29 = vld [vmem:[%s11706_s10 + $0x1b08] sm:$0xff]  ;;  %v2281_v46 = vld [vmem:[%s11706_s10 + $0x1b80] sm:$0xff] }
 0x277   :  { %6602 = vmatprep.subr.mxu0 %v2259_v48  ;;  %6632 = vmatprep.subr.mxu1 %v2295_v49  ;;  %v2310_v45 = vld [vmem:[%s11706_s10 + $0x1c68] sm:$0xff]  ;;  %v2325_v48 = vld [vmem:[%s11706_s10 + $0x1ce0] sm:$0xff]  ;;  %v6986_v49 = vld [vmem:[%s11699_s3 + $0xdc] ss:$252 sps:$4 sm:$0xff]  }
 0x278   :  { %6603 = vmatpush3.msra.mxu0 %v2243_v50  ;;  %6633 = vmatpush3.msra.mxu1 %v2279_v51  ;;  %v2265_v50 = vld [vmem:[%s11706_s10 + $0x1b00] sm:$0xff]  ;;  %v6984_v51 = vld [vmem:[%s11699_s3 + $0xd8] ss:$252 sps:$4 sm:$0xff]  }
 0x279   :  { %6604 = vmatprep.subr.mxu0 %v2258_v42  ;;  %6634 = vmatprep.subr.mxu1 %v2294_v54  ;;  %v2309_v42 = vld [vmem:[%s11706_s10 + $0x1c60] sm:$0xff]  ;;  %v2324_v54 = vld [vmem:[%s11706_s10 + $0x1cd8] sm:$0xff] }
 0x27a   :  { %6605 = vmatpush3.msra.mxu0 %v2242_v38  ;;  %6635 = vmatpush3.msra.mxu1 %v2278_v55  ;;  %v2360_v38 = vld [vmem:[%s11706_s10 + $0x1df8] sm:$0xff] }
 0x27b   :  { %6606 = vmatprep.subr.mxu0 %v2257_v56  ;;  %6636 = vmatprep.subr.mxu1 %v2293_v57  ;;  %v2308_v55 = vld [vmem:[%s11706_s10 + $0x1c58] sm:$0xff]  ;;  %v2323_v57 = vld [vmem:[%s11706_s10 + $0x1cd0] sm:$0xff] }
 0x27c   :  { %6607 = vmatpush3.msra.mxu0 %v2241_v58  ;;  %6637 = vmatpush3.msra.mxu1 %v2277_v59  ;;  %v2344_v56 = vld [vmem:[%s11706_s10 + $0x1d78] sm:$0xff]  ;;  %v2359_v58 = vld [vmem:[%s11706_s10 + $0x1df0] sm:$0xff] }
 0x27d   :  { %6608 = vmatprep.subr.mxu0 %v2256_v60  ;;  %6638 = vmatprep.subr.mxu1 %v2292_v62  ;;  %v2307_v59 = vld [vmem:[%s11706_s10 + $0x1c50] sm:$0xff]  ;;  %v2322_v62 = vld [vmem:[%s11706_s10 + $0x1cc8] sm:$0xff] }
 0x27e   :  { %6609 = vmatpush3.msra.mxu0 %v2240_v63  ;;  %6639 = vmatpush3.msra.mxu1 %v2276_v1  ;;  %v2343_v60 = vld [vmem:[%s11706_s10 + $0x1d70] sm:$0xff]  ;;  %v2358_v63 = vld [vmem:[%s11706_s10 + $0x1de8] sm:$0xff] }
 0x27f   :  { %6610 = vmatprep.subr.mxu0 %v2255_v61  ;;  %6640 = vmatprep.subr.mxu1 %v2291_v3  ;;  %v2306_v1 = vld [vmem:[%s11706_s10 + $0x1c48] sm:$0xff]  ;;  %v2321_v3 = vld [vmem:[%s11706_s10 + $0x1cc0] sm:$0xff] }
 0x280   :  { %6611 = vmatpush3.msra.mxu0 %v2239_v52  ;;  %6641 = vmatpush3.msra.mxu1 %v2275_v4  ;;  %v2342_v61 = vld [vmem:[%s11706_s10 + $0x1d68] sm:$0xff]  ;;  %v2357_v52 = vld [vmem:[%s11706_s10 + $0x1de0] sm:$0xff] }
 0x281   :  { %6612 = vmatprep.subr.mxu0 %v2254_v53  ;;  %6642 = vmatprep.subr.mxu1 %v2290_v5  ;;  %v2305_v4 = vld [vmem:[%s11706_s10 + $0x1c40] sm:$0xff]  ;;  %v2320_v5 = vld [vmem:[%s11706_s10 + $0x1cb8] sm:$0xff] }
 0x282   :  { %6613 = vmatpush3.msra.mxu0 %v2238_v8  ;;  %6643 = vmatpush3.msra.mxu1 %v2274_v9  ;;  %v2341_v53 = vld [vmem:[%s11706_s10 + $0x1d60] sm:$0xff]  ;;  %v2356_v8 = vld [vmem:[%s11706_s10 + $0x1dd8] sm:$0xff] }
 0x283   :  { %6614 = vmatprep.subr.mxu0 %v2253_v10  ;;  %6644 = vmatprep.subr.mxu1 %v2289_v11  ;;  %v2304_v9 = vld [vmem:[%s11706_s10 + $0x1c38] sm:$0xff]  ;;  %v2319_v11 = vld [vmem:[%s11706_s10 + $0x1cb0] sm:$0xff] }
 0x284   :  { %6615 = vmatpush3.msra.mxu0 %v2237_v25  ;;  %6645 = vmatpush3.msra.mxu1 %v2273_v12  ;;  %v2340_v10 = vld [vmem:[%s11706_s10 + $0x1d58] sm:$0xff]  ;;  %v2355_v25 = vld [vmem:[%s11706_s10 + $0x1dd0] sm:$0xff] }
 0x285   :  { %6616 = vmatprep.subr.mxu0 %v2252_v13  ;;  %6646 = vmatprep.subr.mxu1 %v2288_v14  ;;  %v2303_v12 = vld [vmem:[%s11706_s10 + $0x1c30] sm:$0xff]  ;;  %v2318_v14 = vld [vmem:[%s11706_s10 + $0x1ca8] sm:$0xff] }
 0x286   :  { %6617 = vmatpush3.msra.mxu0 %v2236_v15  ;;  %6647 = vmatpush3.msra.mxu1 %v2272_v7  ;;  %v2339_v13 = vld [vmem:[%s11706_s10 + $0x1d50] sm:$0xff]  ;;  %v2354_v15 = vld [vmem:[%s11706_s10 + $0x1dc8] sm:$0xff] }
 0x287   :  { %6618 = vmatprep.subr.mxu0 %v2251_v17  ;;  %6648 = vmatprep.subr.mxu1 %v2287_v18  ;;  %v2302_v7 = vld [vmem:[%s11706_s10 + $0x1c28] sm:$0xff]  ;;  %v2317_v18 = vld [vmem:[%s11706_s10 + $0x1ca0] sm:$0xff] }
 0x288   :  { %6619 = vmatpush3.msra.mxu0 %v2235_v0  ;;  %6649 = vmatpush3.msra.mxu1 %v2271_v19  ;;  %v2338_v17 = vld [vmem:[%s11706_s10 + $0x1d48] sm:$0xff]  ;;  %v2353_v0 = vld [vmem:[%s11706_s10 + $0x1dc0] sm:$0xff] }
 0x289   :  { %6620 = vmatprep.subr.mxu0 %v2250_v21  ;;  %6650 = vmatprep.subr.mxu1 %v2286_v22  ;;  %v2301_v19 = vld [vmem:[%s11706_s10 + $0x1c20] sm:$0xff]  ;;  %v2316_v22 = vld [vmem:[%s11706_s10 + $0x1c98] sm:$0xff] }
 0x28a   :  { %6621 = vmatpush3.msra.mxu0 %v2234_v23  ;;  %6651 = vmatpush3.msra.mxu1 %v2270_v26  ;;  %v2337_v21 = vld [vmem:[%s11706_s10 + $0x1d40] sm:$0xff]  ;;  %v2352_v23 = vld [vmem:[%s11706_s10 + $0x1db8] sm:$0xff] }
 0x28b   :  { %6622 = vmatprep.subr.mxu0 %v2249_v27  ;;  %6652 = vmatprep.subr.mxu1 %v2285_v30  ;;  %v2300_v26 = vld [vmem:[%s11706_s10 + $0x1c18] sm:$0xff]  ;;  %v2315_v30 = vld [vmem:[%s11706_s10 + $0x1c90] sm:$0xff] }
 0x28c   :  { %6623 = vmatpush3.msra.mxu0 %v2233_v6  ;;  %4690 = vmatprep.mubr.bf16.mxu0 %v6983_v16  ;;  %v2336_v27 = vld [vmem:[%s11706_s10 + $0x1d38] sm:$0xff]  ;;  %v2351_v16 = vld [vmem:[%s11706_s10 + $0x1db0] sm:$0xff] }
 0x28d   :  { %6653 = vmatpush3.msra.mxu1 %v2269_v32  ;;  %4691 = vmatmul.mubr.bf16.vlgmr.msra.gmra.mxu0 %v6981_v31  ;;  %v2299_v6 = vld [vmem:[%s11706_s10 + $0x1c10] sm:$0xff]  ;;  %v2314_v32 = vld [vmem:[%s11706_s10 + $0x1c88] sm:$0xff] }
 0x28e   :  { %6654 = vmatprep.subr.mxu1 %v2284_v33  ;;  %6668 = vmatprep.subr.mxu0 %v2328_v35  ;;  %v2335_v31 = vld [vmem:[%s11706_s10 + $0x1d30] sm:$0xff]  ;;  %v2350_v33 = vld [vmem:[%s11706_s10 + $0x1da8] sm:$0xff] }
 0x28f   :  { %6655 = vmatpush3.msra.mxu1 %v2268_v37  ;;  %6669 = vmatpush3.msra.mxu0 %v2312_v39  ;;  %v2298_v35 = vld [vmem:[%s11706_s10 + $0x1c08] sm:$0xff]  ;;  %v2313_v39 = vld [vmem:[%s11706_s10 + $0x1c80] sm:$0xff] }
 0x290   :  { %6656 = vmatprep.subr.mxu1 %v2283_v40  ;;  %6670 = vmatprep.subr.mxu0 %v2327_v20  ;;  %v2334_v37 = vld [vmem:[%s11706_s10 + $0x1d28] sm:$0xff]  ;;  %v2349_v40 = vld [vmem:[%s11706_s10 + $0x1da0] sm:$0xff] }
 0x291   :  { %6657 = vmatpush3.msra.mxu1 %v2267_v41  ;;  %6671 = vmatpush3.msra.mxu0 %v2311_v28  ;;  %v6989_v20 = vld [vmem:[%s11699_s3 + $0xe4] ss:$252 sps:$4 sm:$0xff]  }
 0x292   :  { %6658 = vmatprep.subr.mxu1 %v2282_v43  ;;  %6672 = vmatprep.subr.mxu0 %v2326_v44  ;;  %v2297_v41 = vld [vmem:[%s11706_s10 + $0x1c00] sm:$0xff]  ;;  %v2348_v44 = vld [vmem:[%s11706_s10 + $0x1d98] sm:$0xff] }
 0x293   :  { %6659 = vmatpush3.msra.mxu1 %v2266_v29  ;;  %6673 = vmatpush3.msra.mxu0 %v2310_v45  ;;  %v6987_v28 = vld [vmem:[%s11699_s3 + $0xe0] ss:$252 sps:$4 sm:$0xff]  }
 0x294   :  { %6660 = vmatprep.subr.mxu1 %v2281_v46  ;;  %6674 = vmatprep.subr.mxu0 %v2325_v48  ;;  %v2333_v43 = vld [vmem:[%s11706_s10 + $0x1d20] sm:$0xff]  ;;  %v2392_v29 = vld [vmem:[%s11706_s10 + $0x1ef8] sm:$0xff]  ;;  %v2347_v48 = vld [vmem:[%s11706_s10 + $0x1d90] sm:$0xff] }
 0x295   :  { %6661 = vmatpush3.msra.mxu1 %v2265_v50  ;;  %4763 = vmatprep.mubr.bf16.mxu1 %v6986_v49  ;;  %v2332_v45 = vld [vmem:[%s11706_s10 + $0x1d18] sm:$0xff]  ;;  %v2391_v49 = vld [vmem:[%s11706_s10 + $0x1ef0] sm:$0xff] }
 0x296   :  { %6675 = vmatpush3.msra.mxu0 %v2309_v42  ;;  %4764 = vmatmul.mubr.bf16.vlgmr.msra.gmra.mxu1 %v6984_v51  ;;  %v2376_v46 = vld [vmem:[%s11706_s10 + $0x1e78] sm:$0xff]  ;;  %v2331_v50 = vld [vmem:[%s11706_s10 + $0x1d10] sm:$0xff]  ;;  %v2346_v42 = vld [vmem:[%s11706_s10 + $0x1d88] sm:$0xff] }
 0x297   :  { %6676 = vmatprep.subr.mxu0 %v2324_v54  ;;  %6706 = vmatprep.subr.mxu1 %v2360_v38  ;;  %v2375_v51 = vld [vmem:[%s11706_s10 + $0x1e70] sm:$0xff]  ;;  %v2390_v54 = vld [vmem:[%s11706_s10 + $0x1ee8] sm:$0xff] }
 0x298   :  { %6677 = vmatpush3.msra.mxu0 %v2308_v55  ;;  %6707 = vmatpush3.msra.mxu1 %v2344_v56  ;;  %v2330_v38 = vld [vmem:[%s11706_s10 + $0x1d08] sm:$0xff]  ;;  %v2345_v56 = vld [vmem:[%s11706_s10 + $0x1d80] sm:$0xff] }
 0x299   :  { %6678 = vmatprep.subr.mxu0 %v2323_v57  ;;  %6708 = vmatprep.subr.mxu1 %v2359_v58  ;;  %v2374_v55 = vld [vmem:[%s11706_s10 + $0x1e68] sm:$0xff]  ;;  %v2389_v57 = vld [vmem:[%s11706_s10 + $0x1ee0] sm:$0xff] }
 0x29a   :  { %6679 = vmatpush3.msra.mxu0 %v2307_v59  ;;  %6709 = vmatpush3.msra.mxu1 %v2343_v60  ;;  %v6992_v58 = vld [vmem:[%s11699_s3 + $0xec] ss:$252 sps:$4 sm:$0xff]   ;;  %v2329_v59 = vld [vmem:[%s11706_s10 + $0x1d00] sm:$0xff] }
 0x29b   :  { %6680 = vmatprep.subr.mxu0 %v2322_v62  ;;  %6710 = vmatprep.subr.mxu1 %v2358_v63  ;;  %v6990_v60 = vld [vmem:[%s11699_s3 + $0xe8] ss:$252 sps:$4 sm:$0xff]   ;;  %v2388_v63 = vld [vmem:[%s11706_s10 + $0x1ed8] sm:$0xff] }
 0x29c   :  { %6681 = vmatpush3.msra.mxu0 %v2306_v1  ;;  %6711 = vmatpush3.msra.mxu1 %v2342_v61  ;;  %v2373_v62 = vld [vmem:[%s11706_s10 + $0x1e60] sm:$0xff]  ;;  %v2372_v1 = vld [vmem:[%s11706_s10 + $0x1e58] sm:$0xff] }
 0x29d   :  { %6682 = vmatprep.subr.mxu0 %v2321_v3  ;;  %6712 = vmatprep.subr.mxu1 %v2357_v52  ;;  %v2404_v61 = vld [vmem:[%s11706_s10 + $0x1f58] sm:$0x3f]  ;;  %v2387_v3 = vld [vmem:[%s11706_s10 + $0x1ed0] sm:$0xff] }
 0x29e   :  { %6683 = vmatpush3.msra.mxu0 %v2305_v4  ;;  %6713 = vmatpush3.msra.mxu1 %v2341_v53  ;;  %v2371_v52 = vld [vmem:[%s11706_s10 + $0x1e50] sm:$0xff]  ;;  %v2386_v53 = vld [vmem:[%s11706_s10 + $0x1ec8] sm:$0xff] }
 0x29f   :  { %6684 = vmatprep.subr.mxu0 %v2320_v5  ;;  %6714 = vmatprep.subr.mxu1 %v2356_v8  ;;  %v2403_v4 = vld [vmem:[%s11706_s10 + $0x1f50] sm:$0xff]  ;;  %v2370_v5 = vld [vmem:[%s11706_s10 + $0x1e48] sm:$0xff] }
 0x2a0   :  { %6685 = vmatpush3.msra.mxu0 %v2304_v9  ;;  %6715 = vmatpush3.msra.mxu1 %v2340_v10  ;;  %v2402_v8 = vld [vmem:[%s11706_s10 + $0x1f48] sm:$0xff]  ;;  %v2385_v9 = vld [vmem:[%s11706_s10 + $0x1ec0] sm:$0xff] }
 0x2a1   :  { %6686 = vmatprep.subr.mxu0 %v2319_v11  ;;  %6716 = vmatprep.subr.mxu1 %v2355_v25  ;;  %v2369_v10 = vld [vmem:[%s11706_s10 + $0x1e40] sm:$0xff]  ;;  %v2384_v25 = vld [vmem:[%s11706_s10 + $0x1eb8] sm:$0xff] }
 0x2a2   :  { %6687 = vmatpush3.msra.mxu0 %v2303_v12  ;;  %6717 = vmatpush3.msra.mxu1 %v2339_v13  ;;  %v2401_v11 = vld [vmem:[%s11706_s10 + $0x1f40] sm:$0xff]  ;;  %v2368_v12 = vld [vmem:[%s11706_s10 + $0x1e38] sm:$0xff] }
 0x2a3   :  { %6688 = vmatprep.subr.mxu0 %v2318_v14  ;;  %6718 = vmatprep.subr.mxu1 %v2354_v15  ;;  %v2400_v13 = vld [vmem:[%s11706_s10 + $0x1f38] sm:$0xff]  ;;  %v2383_v14 = vld [vmem:[%s11706_s10 + $0x1eb0] sm:$0xff] }
 0x2a4   :  { %6689 = vmatpush3.msra.mxu0 %v2302_v7  ;;  %6719 = vmatpush3.msra.mxu1 %v2338_v17  ;;  %v2367_v15 = vld [vmem:[%s11706_s10 + $0x1e30] sm:$0xff]  ;;  %v2382_v17 = vld [vmem:[%s11706_s10 + $0x1ea8] sm:$0xff] }
 0x2a5   :  { %6690 = vmatprep.subr.mxu0 %v2317_v18  ;;  %6720 = vmatprep.subr.mxu1 %v2353_v0  ;;  %v2399_v7 = vld [vmem:[%s11706_s10 + $0x1f30] sm:$0xff]  ;;  %v2366_v18 = vld [vmem:[%s11706_s10 + $0x1e28] sm:$0xff] }
 0x2a6   :  { %6691 = vmatpush3.msra.mxu0 %v2301_v19  ;;  %6721 = vmatpush3.msra.mxu1 %v2337_v21  ;;  %v2398_v0 = vld [vmem:[%s11706_s10 + $0x1f28] sm:$0xff]  ;;  %v2381_v19 = vld [vmem:[%s11706_s10 + $0x1ea0] sm:$0xff] }
 0x2a7   :  { %6692 = vmatprep.subr.mxu0 %v2316_v22  ;;  %6722 = vmatprep.subr.mxu1 %v2352_v23  ;;  %v2365_v21 = vld [vmem:[%s11706_s10 + $0x1e20] sm:$0xff]  ;;  %v2380_v23 = vld [vmem:[%s11706_s10 + $0x1e98] sm:$0xff] }
 0x2a8   :  { %6693 = vmatpush3.msra.mxu0 %v2300_v26  ;;  %6723 = vmatpush3.msra.mxu1 %v2336_v27  ;;  %v2397_v22 = vld [vmem:[%s11706_s10 + $0x1f20] sm:$0xff]  ;;  %v2364_v26 = vld [vmem:[%s11706_s10 + $0x1e18] sm:$0xff] }
 0x2a9   :  { %6694 = vmatprep.subr.mxu0 %v2315_v30  ;;  %6724 = vmatprep.subr.mxu1 %v2351_v16  ;;  %v2396_v27 = vld [vmem:[%s11706_s10 + $0x1f18] sm:$0xff]  ;;  %v2379_v30 = vld [vmem:[%s11706_s10 + $0x1e90] sm:$0xff] }
 0x2aa   :  { %6695 = vmatpush3.msra.mxu0 %v2299_v6  ;;  %6725 = vmatpush3.msra.mxu1 %v2335_v31  ;;  %v2363_v16 = vld [vmem:[%s11706_s10 + $0x1e10] sm:$0xff]  ;;  %v2378_v31 = vld [vmem:[%s11706_s10 + $0x1e88] sm:$0xff] }
 0x2ab   :  { %6696 = vmatprep.subr.mxu0 %v2314_v32  ;;  %6726 = vmatprep.subr.mxu1 %v2350_v33  ;;  %v2395_v6 = vld [vmem:[%s11706_s10 + $0x1f10] sm:$0xff]  ;;  %v2362_v32 = vld [vmem:[%s11706_s10 + $0x1e08] sm:$0xff] }
 0x2ac   :  { %6697 = vmatpush3.msra.mxu0 %v2298_v35  ;;  %6727 = vmatpush3.msra.mxu1 %v2334_v37  ;;  %v2394_v33 = vld [vmem:[%s11706_s10 + $0x1f08] sm:$0xff]  ;;  %v2377_v35 = vld [vmem:[%s11706_s10 + $0x1e80] sm:$0xff]  ;;  %v6995_v37 = vld [vmem:[%s11699_s3 + $0xf4] ss:$252 sps:$4 sm:$0xff]  }
 0x2ad   :  { %6698 = vmatprep.subr.mxu0 %v2313_v39  ;;  %6728 = vmatprep.subr.mxu1 %v2349_v40  ;;  %v2361_v39 = vld [vmem:[%s11706_s10 + $0x1e00] sm:$0xff]  ;;  %v11359_v40 = vpop.f32.mrf.mxu0 }
 0x2ae   :  { %6699 = vmatpush3.msra.mxu0 %v2297_v41  ;;  %4836 = vmatprep.mubr.bf16.mxu0 %v6989_v20  ;;  %v11361_v20 = vpop.f32.mrf.mxu1  ;;  %v6993_v41 = vld [vmem:[%s11699_s3 + $0xf0] ss:$252 sps:$4 sm:$0xff]  }
 0x2af   :  { %6729 = vmatpush3.msra.mxu1 %v2333_v43  ;;  %4837 = vmatmul.mubr.bf16.vlgmr.msra.gmra.mxu0 %v6987_v28  ;;  %v2393_v28 = vld [vmem:[%s11706_s10 + $0x1f00] sm:$0xff]  ;;  %v6996_v43 = vld [vmem:[%s11699_s3 + $0xf8] ss:$252 sps:$4 sm:$0xff]  }
 0x2b0   :  { %6730 = vmatprep.subr.mxu1 %v2348_v44  ;;  %6744 = vmatprep.subr.mxu0 %v2392_v29  ;;  %v5064_v44 = vld [vmem:[%s11702_s6] sm:$0xff]  ;;  %v5065_v29 = vld [vmem:[%s11702_s6 + $0x8] sm:$0xff] }
 0x2b1   :  { %6731 = vmatpush3.msra.mxu1 %v2332_v45  ;;  %6745 = vmatpush3.msra.mxu0 %v2376_v46  ;;  %v11381_v45 = vpop.f32.mrf.mxu0  ;;  %v11383_v46 = vpop.f32.mrf.mxu1 }
 0x2b2   :  { %6732 = vmatprep.subr.mxu1 %v2347_v48  ;;  %6746 = vmatprep.subr.mxu0 %v2391_v49 }
 0x2b3   :  { %6733 = vmatpush3.msra.mxu1 %v2331_v50  ;;  %6747 = vmatpush3.msra.mxu0 %v2375_v51  ;;  %v11385_v48 = vpop.f32.mrf.mxu0  ;;  %v11387_v49 = vpop.f32.mrf.mxu1 }
 0x2b4   :  { %6734 = vmatprep.subr.mxu1 %v2346_v42  ;;  %6748 = vmatprep.subr.mxu0 %v2390_v54 }
 0x2b5   :  { %6735 = vmatpush3.msra.mxu1 %v2330_v38  ;;  %6749 = vmatpush3.msra.mxu0 %v2374_v55  ;;  %v11389_v50 = vpop.f32.mrf.mxu0  ;;  %v11391_v51 = vpop.f32.mrf.mxu1 }
 0x2b6   :  { %6736 = vmatprep.subr.mxu1 %v2345_v56  ;;  %6750 = vmatprep.subr.mxu0 %v2389_v57 }
 0x2b7   :  { %6737 = vmatpush3.msra.mxu1 %v2329_v59  ;;  %4909 = vmatprep.mubr.bf16.mxu1 %v6992_v58  ;;  %v11393_v42 = vpop.f32.mrf.mxu0  ;;  %v11395_v54 = vpop.f32.mrf.mxu1 }
 0x2b8   :  { %6751 = vmatpush3.msra.mxu0 %v2373_v62  ;;  %4910 = vmatmul.mubr.bf16.vlgmr.msra.gmra.mxu1 %v6990_v60 }
 0x2b9   :  { %6752 = vmatprep.subr.mxu0 %v2388_v63  ;;  %6817 = vmatprep.subr.mxu1 %v7019_v2  ;;  %v11399_v38 = vpop.f32.mrf.mxu1 }
 0x2ba   :  { %6753 = vmatpush3.msra.mxu0 %v2372_v1  ;;  %6818 = vmatpush3.msk.msra.mxu1 %vm2724_vm6, %v2404_v61 }
 0x2bb   :  { %6754 = vmatprep.subr.mxu0 %v2387_v3  ;;  %6819 = vmatprep.subr.mxu1 %v7019_v2  ;;  %v11403_v56 = vpop.f32.mrf.mxu1 }
 0x2bc   :  { %6755 = vmatpush3.msra.mxu0 %v2371_v52  ;;  %6820 = vmatpush3.msra.mxu1 %v2403_v4 }
 0x2bd   :  { %6756 = vmatprep.subr.mxu0 %v2386_v53  ;;  %6821 = vmatprep.subr.mxu1 %v7019_v2  ;;  %v11407_v58 = vpop.f32.mrf.mxu1 }
 0x2be   :  { %6757 = vmatpush3.msra.mxu0 %v2370_v5  ;;  %6822 = vmatpush3.msra.mxu1 %v2402_v8 }
 0x2bf   :  { %6758 = vmatprep.subr.mxu0 %v2385_v9  ;;  %6823 = vmatprep.subr.mxu1 %v7019_v2  ;;  %v11411_v60 = vpop.f32.mrf.mxu1 }
 0x2c0   :  { %6759 = vmatpush3.msra.mxu0 %v2369_v10  ;;  %6824 = vmatpush3.msra.mxu1 %v2401_v11 }
 0x2c1   :  { %6760 = vmatprep.subr.mxu0 %v2384_v25  ;;  %6825 = vmatprep.subr.mxu1 %v7019_v2  ;;  %v11415_v63 = vpop.f32.mrf.mxu1 }
 0x2c2   :  { %6761 = vmatpush3.msra.mxu0 %v2368_v12  ;;  %6826 = vmatpush3.msra.mxu1 %v2400_v13 }
 0x2c3   :  { %6762 = vmatprep.subr.mxu0 %v2383_v14  ;;  %6827 = vmatprep.subr.mxu1 %v7019_v2  ;;  %v11419_v61 = vpop.f32.mrf.mxu1 }
 0x2c4   :  { %6763 = vmatpush3.msra.mxu0 %v2367_v15  ;;  %6828 = vmatpush3.msra.mxu1 %v2399_v7 }
 0x2c5   :  { %6764 = vmatprep.subr.mxu0 %v2382_v17  ;;  %6829 = vmatprep.subr.mxu1 %v7019_v2  ;;  %v11423_v52 = vpop.f32.mrf.mxu1 }
 0x2c6   :  { %6765 = vmatpush3.msra.mxu0 %v2366_v18  ;;  %6830 = vmatpush3.msra.mxu1 %v2398_v0 }
 0x2c7   :  { %6766 = vmatprep.subr.mxu0 %v2381_v19  ;;  %6831 = vmatprep.subr.mxu1 %v7019_v2  ;;  %v11427_v53 = vpop.f32.mrf.mxu1 }
 0x2c8   :  { %6767 = vmatpush3.msra.mxu0 %v2365_v21  ;;  %6832 = vmatpush3.msra.mxu1 %v2397_v22  ;;  %v5089_v22 = vld [vmem:[%s11708_s12 + $0x38] sm:$0xff] }
 0x2c9   :  { %6768 = vmatprep.subr.mxu0 %v2380_v23  ;;  %6833 = vmatprep.subr.mxu1 %v7019_v2  ;;  %v11431_v8 = vpop.f32.mrf.mxu1  ;;  %v5088_v23 = vld [vmem:[%s11708_s12 + $0x30] sm:$0xff] }
 0x2ca   :  { %6769 = vmatpush3.msra.mxu0 %v2364_v26  ;;  %6834 = vmatpush3.msra.mxu1 %v2396_v27 }
 0x2cb   :  { %6770 = vmatprep.subr.mxu0 %v2379_v30  ;;  %6835 = vmatprep.subr.mxu1 %v7019_v2  ;;  %v11435_v10 = vpop.f32.mrf.mxu1  ;;  %v5087_v30 = vld [vmem:[%s11708_s12 + $0x28] sm:$0xff] }
 0x2cc   :  { %6771 = vmatpush3.msra.mxu0 %v2363_v16  ;;  %6836 = vmatpush3.msra.mxu1 %v2395_v6  ;;  %v5086_v16 = vld [vmem:[%s11708_s12 + $0x20] sm:$0xff] }
 0x2cd   :  { %6772 = vmatprep.subr.mxu0 %v2378_v31  ;;  %6837 = vmatprep.subr.mxu1 %v7019_v2  ;;  %v11439_v25 = vpop.f32.mrf.mxu1 }
 0x2ce   :  { %6773 = vmatpush3.msra.mxu0 %v2362_v32  ;;  %6838 = vmatpush3.msra.mxu1 %v2394_v33  ;;  %v5085_v32 = vld [vmem:[%s11708_s12 + $0x18] sm:$0xff]  ;;  %v5084_v33 = vld [vmem:[%s11708_s12 + $0x10] sm:$0xff] }
 0x2cf   :  { %6774 = vmatprep.subr.mxu0 %v2377_v35  ;;  %6839 = vmatprep.subr.mxu1 %v7019_v2  ;;  %v11443_v13 = vpop.f32.mrf.mxu1 }
 0x2d0   :  { %6775 = vmatpush3.msra.mxu0 %v2361_v39  ;;  %4982 = vmatprep.mubr.bf16.mxu0 %v6995_v37  ;;  %v5083_v39 = vld [vmem:[%s11708_s12 + $0x8] sm:$0xff] }
 0x2d1   :  { %6840 = vmatpush3.msra.mxu1 %v2393_v28  ;;  %6841 = vmatprep.mubr.msk.bf16.mxu1 %vm7020_vm2, %v7019_v2  ;;  %v11397_v2 = vpop.f32.mrf.mxu0  ;;  %v11447_v15 = vpop.f32.mrf.mxu1 }
 0x2d2   :  { %4983 = vmatmul.mubr.bf16.vlgmr.msra.gmra.mxu0 %v6993_v41  ;;  %6842 = vmatmul.mubr.msk.bf16.vlgmr.msra.gmra.mxu1 %vm2720_vm7, %v6996_v43  ;;  %v5082_v43 = vld [vmem:[%s11708_s12] sm:$0xff] }
 0x2d3   :  { %5068 = vperm.xlu0 %6870, %v5064_v44   ;;  %5073 = vperm.xlu1 %6871, %v5065_v29   ;;  %v11401_v55 = vpop.f32.mrf.mxu0  ;;  %v11451_v17 = vpop.f32.mrf.mxu1 }
 0x2d4   :  { %6845 = vmatprep.subr.mxu0 %v5089_v22 }
 0x2d5   :  { %v11405_v57 = vpop.f32.mrf.mxu0  ;;  %v11455_v0 = vpop.f32.mrf.mxu1  ;;  %6846 = vmatpush3.msra.mxu0 %v5089_v22 }
 0x2d6   :  { %6847 = vmatprep.subr.mxu0 %v5088_v23 }
 0x2d7   :  { %v11409_v59 = vpop.f32.mrf.mxu0  ;;  %v11459_v21 = vpop.f32.mrf.mxu1  ;;  %6848 = vmatpush3.msra.mxu0 %v5088_v23 }
 0x2d8   :  { %6849 = vmatprep.subr.mxu0 %v5087_v30 }
 0x2d9   :  { %v11413_v62 = vpop.f32.mrf.mxu0  ;;  %v11469_v27 = vpop.f32.mrf.mxu1  ;;  %6850 = vmatpush3.msra.mxu0 %v5087_v30 }
 0x2da   :  { %6851 = vmatprep.subr.mxu0 %v5086_v16 }
 0x2db   :  { %v11417_v1 = vpop.f32.mrf.mxu0  ;;  %v11479_v31 = vpop.f32.mrf.mxu1  ;;  %6852 = vmatpush3.msra.mxu0 %v5086_v16 }
 0x2dc   :  { %6853 = vmatprep.subr.mxu0 %v5085_v32 }
 0x2dd   :  { %v11421_v3 = vpop.f32.mrf.mxu0  ;;  %6854 = vmatpush3.msra.mxu0 %v5085_v32  ;;  %v11489_v37 = vpop.f32.mrf.mxu1 }
 0x2de   :  { %6855 = vmatprep.subr.mxu0 %v5084_v33 }
 0x2df   :  { %v11425_v4 = vpop.f32.mrf.mxu0  ;;  %6856 = vmatpush3.msra.mxu0 %v5084_v33  ;;  %v11496_v28 = vpop.f32.mrf.mxu1 }
 0x2e0   :  { %6857 = vmatprep.subr.mxu0 %v5083_v39 }
 0x2e1   :  { %v11429_v5 = vpop.f32.mrf.mxu0  ;;  %6858 = vmatpush3.msra.mxu0 %v5083_v39  ;;  %v11503_v29 = vpop.f32.mrf.mxu1 }
 0x2e2   :  { %6859 = vmatprep.subr.mxu0 %v5082_v43  ;;  %11713 = vst [vmem:[#allocation7_spill] sm:$0xff] %v11503_v29 }
 0x2e3   :  { %v11433_v9 = vpop.f32.mrf.mxu0  ;;  %6860 = vmatpush3.msra.mxu0 %v5082_v43  ;;  %v11507_v23 = vpop.f32.mrf.mxu1 }
 0x2e4   :  { %11715 = vst [vmem:[#allocation9_spill] sm:$0xff] %v11507_v23 }
 0x2e5   :  { %v11437_v11 = vpop.f32.mrf.mxu0  ;;  %v11511_v16 = vpop.f32.mrf.mxu1 }
 0x2e6   :  { %11717 = vst [vmem:[#allocation11_spill] sm:$0xff] %v11511_v16 }
 0x2e7   :  { %v11441_v12 = vpop.f32.mrf.mxu0  ;;  %v11515_v33 = vpop.f32.mrf.mxu1 }
 0x2e8   :  { %11719 = vst [vmem:[#allocation13_spill] sm:$0xff] %v11515_v33 }
 0x2e9   :  { %v11445_v14 = vpop.f32.mrf.mxu0  ;;  %v11519_v36 = vpop.f32.mrf.mxu1 }
 0x2ea   :  { %11721 = vst [vmem:[#allocation15_spill] sm:$0xff] %v11519_v36 }
 0x2eb   :  { %v11449_v7 = vpop.f32.mrf.mxu0  ;;  %v11523_v24 = vpop.f32.mrf.mxu1 }
 0x2ec   :  { %11723 = vst [vmem:[#allocation17_spill] sm:$0xff] %v11523_v24 }
 0x2ed   :  { %v11453_v18 = vpop.f32.mrf.mxu0 }
 0x2ef   :  { %v11457_v19 = vpop.f32.mrf.mxu0 }
 0x2f1   :  { %v11467_v26 = vpop.f32.mrf.mxu0 }
 0x2f3   :  { %v11477_v6 = vpop.f32.mrf.mxu0 }
 0x2f5   :  { %v11487_v35 = vpop.f32.mrf.mxu0 }
 0x2f7   :  { %v11494_v41 = vpop.f32.mrf.mxu0 }
 0x2f9   :  { %v11501_v44 = vpop.f32.mrf.mxu0 }
 0x2fb   :  { %v11505_v22 = vpop.f32.mrf.mxu0 }
 0x2fc   :  { %11714 = vst [vmem:[#allocation8_spill] sm:$0xff] %v11505_v22  ;;  %v11527_v22 = vpop.f32.mrf.mxu1 }
 0x2fd   :  { %v11509_v30 = vpop.f32.mrf.mxu0  ;;  %11725 = vst [vmem:[#allocation19_spill] sm:$0xff] %v11527_v22 }
 0x2fe   :  { %11716 = vst [vmem:[#allocation10_spill] sm:$0xff] %v11509_v30  ;;  %v11531_v30 = vpop.f32.mrf.mxu1 }
 0x2ff   :  { %v11513_v32 = vpop.f32.mrf.mxu0  ;;  %11727 = vst [vmem:[#allocation21_spill] sm:$0xff] %v11531_v30 }
 0x300   :  { %11718 = vst [vmem:[#allocation12_spill] sm:$0xff] %v11513_v32  ;;  %v11535_v32 = vpop.f32.mrf.mxu1 }
 0x301   :  { %v11517_v39 = vpop.f32.mrf.mxu0  ;;  %11729 = vst [vmem:[#allocation23_spill] sm:$0xff] %v11535_v32 }
 0x302   :  { %11720 = vst [vmem:[#allocation14_spill] sm:$0xff] %v11517_v39  ;;  %v11539_v39 = vpop.f32.mrf.mxu1 }
 0x303   :  { %v11521_v43 = vpop.f32.mrf.mxu0  ;;  %11731 = vst [vmem:[#allocation25_spill] sm:$0xff] %v11539_v39 }
 0x304   :  { %11722 = vst [vmem:[#allocation16_spill] sm:$0xff] %v11521_v43  ;;  %v11543_v43 = vpop.f32.mrf.mxu1 }
 0x305   :  { %v11525_v29 = vpop.f32.mrf.mxu0  ;;  %11733 = vst [vmem:[#allocation27_spill] sm:$0xff] %v11543_v43  ;;  %v5714_v43 = vadd.f32 %v11381_v45, %v11359_v40  ;;  %v5828_v40 = vadd.f32 %v11399_v38, %v11395_v54 }
 0x306   :  { %11724 = vst [vmem:[#allocation18_spill] sm:$0xff] %v11525_v29  ;;  %v11547_v29 = vpop.f32.mrf.mxu1 }
 0x307   :  { %v11529_v23 = vpop.f32.mrf.mxu0  ;;  %11734 = vst [vmem:[#allocation28_spill] sm:$0xff] %v11547_v29  ;;  %v5752_v29 = vadd.f32 %v11383_v46, %v11361_v20 }
 0x308   :  { %11726 = vst [vmem:[#allocation20_spill] sm:$0xff] %v11529_v23  ;;  %v11551_v23 = vpop.f32.mrf.mxu1 }
 0x309   :  { %v11533_v16 = vpop.f32.mrf.mxu0  ;;  %11736 = vst [vmem:[#allocation30_spill] sm:$0xff] %v11551_v23 }
 0x30a   :  { %11728 = vst [vmem:[#allocation22_spill] sm:$0xff] %v11533_v16  ;;  %v11555_v16 = vpop.f32.mrf.mxu1 }
 0x30b   :  { %v11537_v33 = vpop.f32.mrf.mxu0  ;;  %11737 = vst [vmem:[#allocation31_spill] sm:$0xff] %v11555_v16  ;;  %v2941_v16 = vadd.f32 %v5714_v43, %v9574_v34 }
 0x30c   :  { %11730 = vst [vmem:[#allocation24_spill] sm:$0xff] %v11537_v33  ;;  %v11559_v33 = vpop.f32.mrf.mxu1 }
 0x30d   :  { %v11541_v36 = vpop.f32.mrf.mxu0  ;;  %11739 = vst [vmem:[#allocation33_spill] sm:$0xff] %v11559_v33  ;;  %v5790_v33 = vadd.f32 %v11397_v2, %v11393_v42 }
 0x30e   :  { %11732 = vst [vmem:[#allocation26_spill] sm:$0xff] %v11541_v36 }
 0x30f   :  { %v11545_v24 = vpop.f32.mrf.mxu0 }
 0x311   :  { %v11549_v22 = vpop.f32.mrf.mxu0 }
 0x312   :  { %11735 = vst [vmem:[#allocation29_spill] sm:$0xff] %v11549_v22  ;;  %v11563_v36 = vpop.f32.mrf.mxu1 }
 0x313   :  { %v11553_v30 = vpop.f32.mrf.mxu0  ;;  %11741 = vst [vmem:[#allocation35_spill] sm:$0xff] %v11563_v36  ;;  %v5755_v36 = vadd.f32 %v11391_v51, %v11387_v49  ;;  %v5831_v49 = vadd.f32 %v11407_v58, %v11403_v56  ;;  %v5904_v51 = vadd.f32 %v11415_v63, %v11411_v60  ;;  %v5907_v60 = vadd.f32 %v11423_v52, %v11419_v61 }
 0x314   :  { %v11571_v23 = vpop.f32.mrf.mxu1  ;;  %v5983_v61 = vadd.f32 %v11439_v25, %v11435_v10  ;;  %v6056_v52 = vadd.f32 %v11447_v15, %v11443_v13  ;;  %v6059_v10 = vadd.f32 %v11455_v0, %v11451_v17  ;;  %v6132_v25 = vadd.f32 %v11469_v27, %v11459_v21  ;;  %v11742_v17 = vld [vmem:[#allocation7_spill] sm:$0xff] }
 0x315   :  { %v11557_v32 = vpop.f32.mrf.mxu0  ;;  %v6208_v0 = vadd.f32 %v11742_v17, %v11496_v28 }
 0x316   :  { %11738 = vst [vmem:[#allocation32_spill] sm:$0xff] %v11557_v32  ;;  %v5717_v32 = vadd.f32 %v11389_v50, %v11385_v48  ;;  %v11584_v45 = vpop.f32.mrf.mxu1  ;;  %v5793_v48 = vadd.f32 %v11405_v57, %v11401_v55  ;;  %v5866_v50 = vadd.f32 %v11413_v62, %v11409_v59  ;;  %v5869_v55 = vadd.f32 %v11421_v3, %v11417_v1 }
 0x317   :  { %v11561_v39 = vpop.f32.mrf.mxu0  ;;  %v5942_v57 = vadd.f32 %v11429_v5, %v11425_v4  ;;  %v5980_v62 = vadd.f32 %v11431_v8, %v11427_v53  ;;  %v5945_v1 = vadd.f32 %v11437_v11, %v11433_v9  ;;  %v6018_v3 = vadd.f32 %v11445_v14, %v11441_v12 }
 0x318   :  { %11740 = vst [vmem:[#allocation34_spill] sm:$0xff] %v11561_v39  ;;  %v3014_v39 = vadd.f32 %v5752_v29, %v2941_v16  ;;  %v2944_v46 = vadd.f32 %v5717_v32, %v9603_v47  ;;  %v11597_v38 = vpop.f32.mrf.mxu1  ;;  %v6021_v9 = vadd.f32 %v11453_v18, %v11449_v7  ;;  %v6094_v11 = vadd.f32 %v11467_v26, %v11457_v19 }
 0x319   :  { %v11569_v22 = vpop.f32.mrf.mxu0  ;;  %v6097_v7 = vadd.f32 %v11487_v35, %v11477_v6  ;;  %v6170_v18 = vadd.f32 %v11501_v44, %v11494_v41  ;;  %v11744_v6 = vld [vmem:[#allocation10_spill] sm:$0xff] }
 0x31a   :  { %v3087_v34 = vadd.f32 %v5790_v33, %v3014_v39  ;;  %v3017_v42 = vadd.f32 %v5755_v36, %v2944_v46  ;;  %v11746_v41 = vld [vmem:[#allocation14_spill] sm:$0xff] }
 0x31b   :  { %v11582_v20 = vpop.f32.mrf.mxu0 }
 0x31c   :  { %v3160_v2 = vadd.f32 %v5828_v40, %v3087_v34  ;;  %v3090_v47 = vadd.f32 %v5793_v48, %v3017_v42  ;;  %v6135_v34 = vadd.f32 %v11489_v37, %v11479_v31  ;;  %v11743_v42 = vld [vmem:[#allocation8_spill] sm:$0xff]  ;;  %v11750_v31 = vld [vmem:[#allocation15_spill] sm:$0xff] }
 0x31d   :  { %v11595_v54 = vpop.f32.mrf.mxu0  ;;  %v6173_v35 = vadd.f32 %v11744_v6, %v11743_v42  ;;  %v11764_v42 = vld [vmem:[#allocation28_spill] sm:$0xff]  ;;  %v11765_v6 = vld [vmem:[#allocation30_spill] sm:$0xff] }
 0x31e   :  { %v3233_v29 = vadd.f32 %v5866_v50, %v3160_v2  ;;  %v3163_v56 = vadd.f32 %v5831_v49, %v3090_v47  ;;  %v11745_v2 = vld [vmem:[#allocation12_spill] sm:$0xff]  ;;  %v11747_v47 = vld [vmem:[#allocation9_spill] sm:$0xff] }
 0x31f   :  { %v6246_v44 = vadd.f32 %v11746_v41, %v11745_v2 }
 0x320   :  { %v3306_v58 = vadd.f32 %v5904_v51, %v3233_v29  ;;  %v3236_v63 = vadd.f32 %v5869_v55, %v3163_v56  ;;  %v11748_v29 = vld [vmem:[#allocation11_spill] sm:$0xff] }
 0x321   :  { %v6211_v55 = vadd.f32 %v11748_v29, %v11747_v47  ;;  %v11767_v29 = vld [vmem:[#allocation34_spill] sm:$0xff] }
 0x322   :  { %v3379_v16 = vadd.f32 %v5942_v57, %v3306_v58  ;;  %v3309_v32 = vadd.f32 %v5907_v60, %v3236_v63  ;;  %v11749_v57 = vld [vmem:[#allocation13_spill] sm:$0xff]  ;;  %v11752_v63 = vld [vmem:[#allocation18_spill] sm:$0xff] }
 0x323   :  { %v6284_v37 = vadd.f32 %v11750_v31, %v11749_v57 }
 0x324   :  { %v3452_v33 = vadd.f32 %v5980_v62, %v3379_v16  ;;  %v3382_v53 = vadd.f32 %v5945_v1, %v3309_v32  ;;  %v11751_v62 = vld [vmem:[#allocation16_spill] sm:$0xff] }
 0x325   :  { %v6249_v16 = vadd.f32 %v11752_v63, %v11751_v62  ;;  %v11753_v1 = vld [vmem:[#allocation20_spill] sm:$0xff]  ;;  %v11770_v63 = vld [vmem:[#allocation35_spill] sm:$0xff] }
 0x326   :  { %v3525_v8 = vadd.f32 %v6018_v3, %v3452_v33  ;;  %v3455_v39 = vadd.f32 %v5983_v61, %v3382_v53  ;;  %v11754_v3 = vld [vmem:[#allocation22_spill] sm:$0xff]  ;;  %v11756_v53 = vld [vmem:[#allocation19_spill] sm:$0xff] }
 0x327   :  { %v6322_v32 = vadd.f32 %v11754_v3, %v11753_v1 }
 0x328   :  { %v3598_v43 = vadd.f32 %v6056_v52, %v3525_v8  ;;  %v3528_v13 = vadd.f32 %v6021_v9, %v3455_v39  ;;  %v11755_v52 = vld [vmem:[#allocation17_spill] sm:$0xff] }
 0x329   :  { %v6287_v8 = vadd.f32 %v11756_v53, %v11755_v52  ;;  %v11757_v9 = vld [vmem:[#allocation21_spill] sm:$0xff]  ;;  %v6515_v53 = vadd.f32 %v11597_v38, %v11584_v45 }
 0x32a   :  { %v3671_v15 = vadd.f32 %v6094_v11, %v3598_v43  ;;  %v3601_v40 = vadd.f32 %v6059_v10, %v3528_v13  ;;  %v11758_v11 = vld [vmem:[#allocation23_spill] sm:$0xff] }
 0x32b   :  { %v11603_v36 = vpop.f32.mrf.mxu0  ;;  %v6360_v39 = vadd.f32 %v11758_v11, %v11757_v9 }
 0x32c   :  { %v3744_v46 = vadd.f32 %v6132_v25, %v3671_v15  ;;  %v3674_v48 = vadd.f32 %v6097_v7, %v3601_v40  ;;  %v11759_v15 = vld [vmem:[#allocation24_spill] sm:$0xff]  ;;  %v11760_v7 = vld [vmem:[#allocation26_spill] sm:$0xff]  ;;  %v11761_v40 = vld [vmem:[#allocation29_spill] sm:$0xff] }
 0x32d   :  { %v11615_v4 = vpop.f32.mrf.mxu0 }
 0x32e   :  { %v3817_v50 = vadd.f32 %v6170_v18, %v3744_v46  ;;  %v3747_v49 = vadd.f32 %v6135_v34, %v3674_v48  ;;  %v6325_v18 = vadd.f32 %v11760_v7, %v11759_v15  ;;  %v6398_v46 = vadd.f32 %v11761_v40, %v11545_v24  ;;  %v11763_v48 = vld [vmem:[#allocation27_spill] sm:$0xff] }
 0x32f   :  { %v11627_v12 = vpop.f32.mrf.mxu0 }
 0x330   :  { %v3890_v51 = vadd.f32 %v6208_v0, %v3817_v50  ;;  %v3820_v58 = vadd.f32 %v6173_v35, %v3747_v49  ;;  %v11762_v0 = vld [vmem:[#allocation25_spill] sm:$0xff]  ;;  %v6436_v35 = vadd.f32 %v11765_v6, %v11764_v42 }
 0x331   :  { %v6552_v19 = vpop.f32.mrf.mxu0  ;;  %v6363_v50 = vadd.f32 %v11763_v48, %v11762_v0 }
 0x332   :  { %v3963_v60 = vadd.f32 %v6246_v44, %v3890_v51  ;;  %v3893_v33 = vadd.f32 %v6211_v55, %v3820_v58  ;;  %v11766_v51 = vld [vmem:[#allocation32_spill] sm:$0xff]  ;;  %v6474_v55 = vadd.f32 %v11569_v22, %v11767_v29  ;;  %v11768_v58 = vld [vmem:[#allocation31_spill] sm:$0xff]  ;;  %v6553_v11 = vadd.f32 %v6552_v19, %v11627_v12  ;;  %v11771_v29 = vld [vmem:[#allocation5_spill] sm:$0xff] }
 0x333   :  { %v6401_v47 = vadd.f32 %v11766_v51, %v11553_v30  ;;  %v6550_v30 = vadd.f32 %v11615_v4, %v11603_v36 }
 0x334   :  { %v11605_v59 = vpop.f32.mrf.mxu1  ;;  %v4036_v61 = vadd.f32 %v6284_v37, %v3963_v60  ;;  %v3966_v25 = vadd.f32 %v6249_v16, %v3893_v33  ;;  %v11769_v60 = vld [vmem:[#allocation33_spill] sm:$0xff]  ;;  %v6512_v16 = vadd.f32 %v11571_v23, %v11770_v63  ;;  %v5292_v63 = vld [vmem:[%s11709_s13] ss:$0 sm:$0xff] }
 0x335   :  { %v6439_v62 = vadd.f32 %v11769_v60, %v11768_v58  ;;  %v11772_v58 = vld [vmem:[#allocation6_spill] sm:$0xff] }
 0x336   :  { %v11617_v5 = vpop.f32.mrf.mxu1  ;;  %v4109_v13 = vadd.f32 %v6322_v32, %v4036_v61  ;;  %v4039_v34 = vadd.f32 %v6287_v8, %v3966_v25  ;;  %v6477_v32 = vadd.f32 %v11595_v54, %v11582_v20 }
 0x337   :  { %v6588_v8 = vadd.f32 %v11617_v5, %v11605_v59 }
 0x338   :  { %v11629_v14 = vpop.f32.mrf.mxu1  ;;  %v4182_v17 = vadd.f32 %v6360_v39, %v4109_v13  ;;  %v4112_v44 = vadd.f32 %v6325_v18, %v4039_v34 }
 0x33a   :  { %v11639_v26 = vpop.f32.mrf.mxu1  ;;  %v4255_v49 = vadd.f32 %v6398_v46, %v4182_v17  ;;  %v4185_v31 = vadd.f32 %v6363_v50, %v4112_v44 }
 0x33b   :  { %v6591_v36 = vadd.f32 %v11639_v26, %v11629_v14 }
 0x33c   :  { %v4328_v37 = vadd.f32 %v6436_v35, %v4255_v49  ;;  %v4258_v1 = vadd.f32 %v6401_v47, %v4185_v31 }
 0x33e   :  { %v4401_v3 = vadd.f32 %v6474_v55, %v4328_v37  ;;  %v4331_v61 = vadd.f32 %v6439_v62, %v4258_v1 }
 0x340   :  { %v4474_v52 = vadd.f32 %v6512_v16, %v4401_v3  ;;  %v4404_v9 = vadd.f32 %v6477_v32, %v4331_v61 }
 0x342   :  { %v4547_v23 = vadd.f32 %v6550_v30, %v4474_v52  ;;  %v4477_v54 = vadd.f32 %v6515_v53, %v4404_v9 }
 0x344   :  { %v4620_v13 = vadd.f32 %v6588_v8, %v4547_v23  ;;  %v4550_v15 = vadd.f32 %v6553_v11, %v4477_v54 }
 0x346   :  { %v4623_v59 = vadd.f32 %v6591_v36, %v4550_v15 }
 0x34d   :  { %v6624_v21 = vpop.f32.mrf.mxu0 }
 0x34e   :  { %v5069_v49 = vpop.permute.xlu0 %5068 }
 0x34f   :  { %v6625_v56 = vpop.f32.mrf.mxu0 }
 0x350   :  { %v6626_v39 = vadd.f32 %v6625_v56, %v6624_v21 }
 0x351   :  { %v6627_v43 = vpop.f32.mrf.mxu0 }
 0x352   :  { %v4693_v7 = vadd.f32 %v6626_v39, %v4620_v13 }
 0x353   :  { %v6628_v2 = vpop.f32.mrf.mxu0 }
 0x354   :  { %v6629_v18 = vadd.f32 %v6628_v2, %v6627_v43 }
 0x356   :  { %v6662_v27 = vpop.f32.mrf.mxu1  ;;  %v4696_v21 = vadd.f32 %v6629_v18, %v4623_v59 }
 0x358   :  { %v6663_v28 = vpop.f32.mrf.mxu1 }
 0x359   :  { %v6664_v4 = vadd.f32 %v6663_v28, %v6662_v27 }
 0x35a   :  { %v6665_v10 = vpop.f32.mrf.mxu1 }
 0x35b   :  { %v4766_v5 = vadd.f32 %v6664_v4, %v4693_v7 }
 0x35c   :  { %v6666_v41 = vpop.f32.mrf.mxu1 }
 0x35d   :  { %v6667_v46 = vadd.f32 %v6666_v41, %v6665_v10 }
 0x35f   :  { %v4769_v50 = vadd.f32 %v6667_v46, %v4696_v21 }
 0x36f   :  { %v6700_v57 = vpop.f32.mrf.mxu0 }
 0x371   :  { %v6701_v33 = vpop.f32.mrf.mxu0 }
 0x372   :  { %v6702_v45 = vadd.f32 %v6701_v33, %v6700_v57 }
 0x373   :  { %v6703_v25 = vpop.f32.mrf.mxu0 }
 0x374   :  { %v4839_v56 = vadd.f32 %v6702_v45, %v4766_v5 }
 0x375   :  { %v6704_v38 = vpop.f32.mrf.mxu0 }
 0x376   :  { %v6705_v17 = vadd.f32 %v6704_v38, %v6703_v25 }
 0x378   :  { %v6738_v24 = vpop.f32.mrf.mxu1  ;;  %v4842_v42 = vadd.f32 %v6705_v17, %v4769_v50 }
 0x37a   :  { %v6739_v22 = vpop.f32.mrf.mxu1 }
 0x37b   :  { %v6740_v34 = vadd.f32 %v6739_v22, %v6738_v24  ;;  %v5074_v24 = vpop.permute.xlu1 %5073 }
 0x37c   :  { %v6741_v20 = vpop.f32.mrf.mxu1 }
 0x37d   :  { %v4912_v14 = vadd.f32 %v6740_v34, %v4839_v56 }
 0x37e   :  { %v6742_v40 = vpop.f32.mrf.mxu1 }
 0x37f   :  { %v6743_v26 = vadd.f32 %v6742_v40, %v6741_v20 }
 0x381   :  { %v4915_v44 = vadd.f32 %v6743_v26, %v4842_v42 }
 0x392   :  { %v6776_v12 = vpop.f32.mrf.mxu0  ;;  %v5057_v19 = vpop.f32.mrf.mxu1 }
 0x394   :  { %v6777_v0 = vpop.f32.mrf.mxu0  ;;  %v6843_v48 = vpop.f32.mrf.mxu1 }
 0x395   :  { %v6778_v27 = vadd.f32 %v6777_v0, %v6776_v12 }
 0x396   :  { %v6779_v28 = vpop.f32.mrf.mxu0  ;;  %v5060_v43 = vpop.f32.mrf.mxu1 }
 0x397   :  { %v4985_v6 = vadd.f32 %v6778_v27, %v4912_v14 }
 0x398   :  { %v6780_v35 = vpop.f32.mrf.mxu0  ;;  %v6844_v2 = vpop.f32.mrf.mxu1 }
 0x399   :  { %v5058_v10 = vadd.f32 %v5057_v19, %v4985_v6  ;;  %v6781_v41 = vadd.f32 %v6780_v35, %v6779_v28 }
 0x39b   :  { %v5076_v51 = vmul.f32 %v5069_v49, %v5058_v10  ;;  %v4988_v47 = vadd.f32 %v6781_v41, %v4915_v44 }
 0x39d   :  { %v5078_v55 = vadd.f32 %v5076_v51, %v11771_v29  ;;  %v5061_v57 = vadd.f32 %v5060_v43, %v4988_v47 }
 0x39f   :  { %v5080_v31 = vmax.f32 %v5078_v55, 0.0  ;;  %v5077_v37 = vmul.f32 %v5074_v24, %v5061_v57 }
 0x3a1   :  { %v5079_v60 = vadd.f32 %v5077_v37, %v11772_v58  ;;  %6861 = vmatprep.mubr.msk.f32.mxu0 %vm5097_vm8, %v5080_v31 }
 0x3a3   :  { %v5081_v62 = vmax.f32 %v5079_v60, 0.0 }
 0x3a5   :  { %6862 = vmatmul.mubr.msk.f32.vlgmr.msra.gmra.mxu0 %vm5097_vm8, %v5081_v62 }
 0x465   :  { %v6863_v16 = vpop.f32.mrf.mxu0 }
 0x466   :  { %v5176_v1 = vadd.f32 %v6863_v16, %v5292_v63 }
 0x467   :  { %v5170_v3 = vpop.f32.mrf.mxu0 }
 0x468   :  { %v5180_v32 = vmax.f32 %v5176_v1, 0.0  ;;  %v5171_v30 = vadd.f32 %v5292_v63, %v5170_v3 }
 0x46a   :  { %5182 = vst [vmem:[#allocation2 + $0x8] sm:$0xff] %v5180_v32  ;;  %v5179_v33 = vmax.f32 %v5171_v30, 0.0 }
 0x46c   :  { %5181 = vst [vmem:[#allocation2] sm:$0xff] %v5179_v33 }
 0x46d   :  { %7008 = shalt.err (!%p7005_p4)
}
 0x46e   :  { %s7023_s0 = smov 128   ;;  %s7024_s13 = smov 8  }
 0x46f   :  { %5194 = dma.vmem_to_hbm [thread:$0]  %s5189_s30, 256, %s11710_s14, [#allocation3], %s7023_s0, %s7023_s0, %s7024_s13  }
 0x470   :  { %7017 = dma.done.wait [#allocation3], 256  }
 0x471   :  { %7018 = vsyncadd [#allocation3], 4294967040 }
 0x472   :  { %5198 = vsyncpa [#allocation3], 1 }

</bundles_post_ra>
